<compile_context>
chip_gen: v7x
topology: tpu7x:2x2x1
jax: 0.10.0
libtpu: 0.0.40
codegen_flags: <defaults>
</compile_context>

<pallas_src>
import functools
import math

import jax
import jax.numpy as jnp
from jax.experimental import pallas as pl
from jax.experimental.pallas import tpu as pltpu


def rf_sample_kernel(x0_ref, w1_ref, bias_ref, w2_ref, b2_ref, out_ref, *,
                     steps, clip_during_sampling, clip_values):
    """Rectified-flow ODE sampling (Euler) fully inside the kernel.

    x0_ref:   (Bblk, D)      starting noise block (f32)
    w1_ref:   (D, Hd)        first linear weight (bf16, Hd zero-padded to 128k)
    bias_ref: (steps, Hd)    per-step bias table b1 + t_k * tvec (f32)
    w2_ref:   (Hd, D)        second linear weight (bf16)
    b2_ref:   (1, D)         second linear bias (f32)
    out_ref:  (Bblk, D)      sampled images in [0, 1] (f32)
    """
    dt = 1.0 / steps

    w1 = w1_ref[...]                 # bf16, MXU operand (loaded once)
    w2 = w2_ref[...]                 # bf16, MXU operand (loaded once)
    b2 = b2_ref[...]                 # (1, D) f32; broadcast-add inside loop

    x = x0_ref[...]                  # (Bblk, D) f32 Euler state

    # steps is a compile-time constant -> static full unroll; the LLO
    # scheduler overlaps the VPU epilogue of step k with MXU pushes of k+1.
    for k in range(steps):
        bias_k = bias_ref[pl.ds(k, 1), :]            # (1, Hd) static slice
        h = jnp.dot(x.astype(jnp.bfloat16), w1,
                    preferred_element_type=jnp.float32)
        h = h + bias_k                               # sublane-broadcast add
        h = jax.nn.gelu(h, approximate=True)         # tanh gelu -> EUP slot
        v = jnp.dot(h.astype(jnp.bfloat16), w2,
                    preferred_element_type=jnp.float32) + b2
        x = x + dt * v
        if clip_during_sampling:     # Trainer default: clip_during_sampling=True
            x = jnp.clip(x, clip_values[0], clip_values[1])

    # unnormalize [-1, 1] -> [0, 1] and apply Trainer.sample's clamp_(0, 1)
    out_ref[...] = jnp.clip((x + 1.0) * 0.5, 0.0, 1.0)


@functools.partial(
    jax.jit,
    static_argnames=("steps", "clip_during_sampling", "clip_values", "block_b"),
    donate_argnums=0)
def rectified_flow_sample(noise_flat, w1, b1, tvec, w2, b2, *, steps,
                          clip_during_sampling=True, clip_values=(-1.0, 1.0),
                          block_b=None):
    B, D = noise_flat.shape
    Hd = w1.shape[1]

    # Precompute the per-step bias table b1 + t_k * tvec (steps is static).
    ts = (jnp.arange(steps, dtype=jnp.float32) / steps)[:, None]   # (steps, 1)
    bias_table = b1 + ts * tvec                                    # (steps, Hd)

    # Zero-pad the hidden dim to a full 128-lane vreg width (numerics
    # unchanged: padded h columns are exactly 0, gelu(0)=0, padded w2 rows
    # are 0).
    hd_pad = ((Hd + 127) // 128) * 128
    if hd_pad != Hd:
        w1 = jnp.pad(w1, ((0, 0), (0, hd_pad - Hd)))
        bias_table = jnp.pad(bias_table, ((0, 0), (0, hd_pad - Hd)))
        w2 = jnp.pad(w2, ((0, hd_pad - Hd), (0, 0)))

    # Pad the batch to a multiple of the 8-row f32 sublane tile.
    b_pad = ((B + 7) // 8) * 8
    if b_pad != B:
        noise_flat = jnp.pad(noise_flat, ((0, b_pad - B), (0, 0)))

    # Default: one block covering the whole batch -> grid=(1,).  Single-TC
    # parts (v5e/v6e) get no serial grid loop and maximum MXU row
    # amortization per weight load.
    if block_b is None:
        block_b = b_pad
    assert b_pad % block_b == 0

    # bf16 MXU operands (f32 accumulation in-kernel).
    w1 = w1.astype(jnp.bfloat16)
    w2 = w2.astype(jnp.bfloat16)

    kernel = functools.partial(
        rf_sample_kernel,
        steps=steps,
        clip_during_sampling=clip_during_sampling,
        clip_values=clip_values,
    )

    grid = (b_pad // block_b,)
    flops = 4 * steps * b_pad * D * hd_pad
    bytes_accessed = (
        noise_flat.size * 4 + w1.size * 2 + w2.size * 2
        + bias_table.size * 4 + b2.size * 4
        + b_pad * D * 4)

    out = pl.pallas_call(
        kernel,
        out_shape=jax.ShapeDtypeStruct((b_pad, D), jnp.float32),
        grid_spec=pltpu.PrefetchScalarGridSpec(
            num_scalar_prefetch=0,
            grid=grid,
            in_specs=[
                pl.BlockSpec((block_b, D), lambda i: (i, 0)),     # x0 block
                pl.BlockSpec((D, hd_pad), lambda i: (0, 0)),      # w1
                pl.BlockSpec((steps, hd_pad), lambda i: (0, 0)),  # bias table
                pl.BlockSpec((hd_pad, D), lambda i: (0, 0)),      # w2
                pl.BlockSpec((1, D), lambda i: (0, 0)),           # b2
            ],
            out_specs=pl.BlockSpec((block_b, D), lambda i: (i, 0)),
        ),
        compiler_params=pltpu.CompilerParams(
            dimension_semantics=("parallel",)),
        input_output_aliases={0: 0},
        cost_estimate=pl.CostEstimate(
            flops=flops,
            transcendentals=steps * b_pad * hd_pad,
            bytes_accessed=bytes_accessed),
    )(noise_flat, w1, bias_table, w2, b2)

    # Drop padded rows (no-op when B is already a multiple of 8).
    return out[:B]


def make_sample_grid(sampled_bchw, num_sample_rows):
    """rearrange '(row col) c h w -> c (row h) (col w)' + clamp(0, 1)."""
    B, C, H, W = sampled_bchw.shape
    row = num_sample_rows
    col = B // row
    grid = sampled_bchw.reshape(row, col, C, H, W)
    grid = jnp.transpose(grid, (2, 0, 3, 1, 4))       # c, row, h, col, w
    grid = grid.reshape(C, row * H, col * W)
    return jnp.clip(grid, 0.0, 1.0)


if __name__ == "__main__":
    # Small shapes consistent with Trainer.__init__ defaults (scaled down):
    #   num_samples = 16 (Trainer default; perfect square, multiple of 8 rows)
    #   ode_sample_steps -> 8, unet_dim -> 32 (padded to 128 internally),
    #   data_shape -> (3, 16, 16)
    num_samples = 16
    ode_sample_steps = 8
    unet_dim = 32
    data_shape = (3, 16, 16)
    C, H, W = data_shape
    D = C * H * W
    num_sample_rows = int(math.sqrt(num_samples))
    assert num_sample_rows ** 2 == num_samples

    key = jax.random.PRNGKey(0)
    k_noise, k_w1, k_w2, k_tv = jax.random.split(key, 4)

    # Deterministic synthetic "model" parameters (stand-in for the Unet ckpt).
    w1 = jax.random.normal(k_w1, (D, unet_dim), jnp.float32) / math.sqrt(D)
    b1 = jnp.zeros((1, unet_dim), jnp.float32)
    tvec = jax.random.normal(k_tv, (1, unet_dim), jnp.float32)
    w2 = jax.random.normal(k_w2, (unet_dim, D), jnp.float32) / math.sqrt(unet_dim)
    b2 = jnp.zeros((1, D), jnp.float32)

    # Starting noise, shape (num_samples, C, H, W) like RectifiedFlow.sample.
    noise = jax.random.normal(k_noise, (num_samples, C, H, W), jnp.float32)
    noise_flat = noise.reshape(num_samples, D)

    sampled_flat = rectified_flow_sample(
        noise_flat, w1, b1, tvec, w2, b2,
        steps=ode_sample_steps,
        clip_during_sampling=True,          # Trainer default
        clip_values=(-1.0, 1.0),
    )
    sampled = sampled_flat.reshape(num_samples, C, H, W)

    image_grid = make_sample_grid(sampled, num_sample_rows)
    jax.block_until_ready(image_grid)

    assert image_grid.shape == (C, num_sample_rows * H,
                                (num_samples // num_sample_rows) * W)
    assert bool(jnp.all(jnp.isfinite(image_grid)))
    print("KERNEL_OK")
</pallas_src>

<mosaic_0001>
module attributes {stable_mosaic.version = 11 : i64} {
  func.func @rf_sample_kernel(%arg0: i32, %arg1: memref<16x768xf32, #tpu.memory_space<vmem>>, %arg2: memref<768x128xbf16, #tpu.memory_space<vmem>>, %arg3: memref<8x128xf32, #tpu.memory_space<vmem>>, %arg4: memref<128x768xbf16, #tpu.memory_space<vmem>>, %arg5: memref<1x768xf32, #tpu.memory_space<vmem>>, %arg6: memref<16x768xf32, #tpu.memory_space<vmem>>) attributes {dimension_semantics = [#tpu.dimension_semantics<parallel>], iteration_bounds = array<i64: 1>, scalar_prefetch = 0 : i64, scratch_operands = 0 : i64, tpu.core_type = #tpu.core_type<tc>, window_params = [{transform_indices = @transform_0, window_bounds = array<i64: 16, 768>}, {pipeline_mode = #tpu.pipeline_mode<synchronous>, transform_indices = @transform_1, window_bounds = array<i64: 768, 128>}, {pipeline_mode = #tpu.pipeline_mode<synchronous>, transform_indices = @transform_2, window_bounds = array<i64: 8, 128>}, {pipeline_mode = #tpu.pipeline_mode<synchronous>, transform_indices = @transform_3, window_bounds = array<i64: 128, 768>}, {pipeline_mode = #tpu.pipeline_mode<synchronous>, transform_indices = @transform_4, window_bounds = array<i64: 1, 768>}, {transform_indices = @transform_5, window_bounds = array<i64: 16, 768>}]} {
    %c0 = arith.constant 0 : index
    %c0_0 = arith.constant 0 : index
    %0 = vector.load %arg2[%c0, %c0_0] : memref<768x128xbf16, #tpu.memory_space<vmem>>, vector<768x128xbf16>
    %c0_1 = arith.constant 0 : index
    %c0_2 = arith.constant 0 : index
    %1 = vector.load %arg4[%c0_1, %c0_2] : memref<128x768xbf16, #tpu.memory_space<vmem>>, vector<128x768xbf16>
    %c0_3 = arith.constant 0 : index
    %c0_4 = arith.constant 0 : index
    %2 = vector.load %arg5[%c0_3, %c0_4] : memref<1x768xf32, #tpu.memory_space<vmem>>, vector<1x768xf32>
    %c0_5 = arith.constant 0 : index
    %c0_6 = arith.constant 0 : index
    %3 = vector.load %arg1[%c0_5, %c0_6] : memref<16x768xf32, #tpu.memory_space<vmem>>, vector<16x768xf32>
    %c0_7 = arith.constant 0 : index
    %c0_8 = arith.constant 0 : index
    %4 = vector.load %arg3[%c0_7, %c0_8] : memref<8x128xf32, #tpu.memory_space<vmem>>, vector<1x128xf32>
    %5 = arith.truncf %3 : vector<16x768xf32> to vector<16x768xbf16>
    %cst = arith.constant dense<0.000000e+00> : vector<16x128xf32>
    %6 = tpu.matmul %5, %0, %cst {dimension_numbers = #tpu.dot_dimension_numbers<[1], [0], [0], [1], [0, 0, 1, 1], [], []>} : vector<16x768xbf16>, vector<768x128xbf16>, vector<16x128xf32> -> vector<16x128xf32>
    %7 = vector.broadcast %4 : vector<1x128xf32> to vector<16x128xf32>
    %8 = arith.addf %6, %7 : vector<16x128xf32>
    %9 = arith.mulf %8, %8 : vector<16x128xf32>
    %10 = arith.mulf %8, %9 : vector<16x128xf32>
    %cst_9 = arith.constant 4.471500e-02 : f32
    %11 = vector.broadcast %cst_9 : f32 to vector<16x128xf32>
    %12 = arith.mulf %11, %10 : vector<16x128xf32>
    %13 = arith.addf %8, %12 : vector<16x128xf32>
    %cst_10 = arith.constant 0.797884583 : f32
    %14 = vector.broadcast %cst_10 : f32 to vector<16x128xf32>
    %15 = arith.mulf %14, %13 : vector<16x128xf32>
    %16 = math.tanh %15 : vector<16x128xf32>
    %cst_11 = arith.constant 1.000000e+00 : f32
    %17 = vector.broadcast %cst_11 : f32 to vector<16x128xf32>
    %18 = arith.addf %17, %16 : vector<16x128xf32>
    %cst_12 = arith.constant 5.000000e-01 : f32
    %19 = vector.broadcast %cst_12 : f32 to vector<16x128xf32>
    %20 = arith.mulf %19, %18 : vector<16x128xf32>
    %21 = arith.mulf %8, %20 : vector<16x128xf32>
    %22 = arith.truncf %21 : vector<16x128xf32> to vector<16x128xbf16>
    %cst_13 = arith.constant dense<0.000000e+00> : vector<16x768xf32>
    %23 = tpu.matmul %22, %1, %cst_13 {dimension_numbers = #tpu.dot_dimension_numbers<[1], [0], [0], [1], [0, 0, 1, 1], [], []>} : vector<16x128xbf16>, vector<128x768xbf16>, vector<16x768xf32> -> vector<16x768xf32>
    %24 = vector.broadcast %2 : vector<1x768xf32> to vector<16x768xf32>
    %25 = arith.addf %23, %24 : vector<16x768xf32>
    %cst_14 = arith.constant 1.250000e-01 : f32
    %26 = vector.broadcast %cst_14 : f32 to vector<16x768xf32>
    %27 = arith.mulf %26, %25 : vector<16x768xf32>
    %28 = arith.addf %3, %27 : vector<16x768xf32>
    %cst_15 = arith.constant -1.000000e+00 : f32
    %cst_16 = arith.constant 1.000000e+00 : f32
    %29 = vector.broadcast %cst_15 : f32 to vector<16x768xf32>
    %30 = arith.maximumf %29, %28 : vector<16x768xf32>
    %31 = vector.broadcast %cst_16 : f32 to vector<16x768xf32>
    %32 = arith.minimumf %31, %30 : vector<16x768xf32>
    %c1 = arith.constant 1 : index
    %c0_17 = arith.constant 0 : index
    %33 = vector.load %arg3[%c1, %c0_17] : memref<8x128xf32, #tpu.memory_space<vmem>>, vector<1x128xf32>
    %34 = arith.truncf %32 : vector<16x768xf32> to vector<16x768xbf16>
    %cst_18 = arith.constant dense<0.000000e+00> : vector<16x128xf32>
    %35 = tpu.matmul %34, %0, %cst_18 {dimension_numbers = #tpu.dot_dimension_numbers<[1], [0], [0], [1], [0, 0, 1, 1], [], []>} : vector<16x768xbf16>, vector<768x128xbf16>, vector<16x128xf32> -> vector<16x128xf32>
    %36 = vector.broadcast %33 : vector<1x128xf32> to vector<16x128xf32>
    %37 = arith.addf %35, %36 : vector<16x128xf32>
    %38 = arith.mulf %37, %37 : vector<16x128xf32>
    %39 = arith.mulf %37, %38 : vector<16x128xf32>
    %cst_19 = arith.constant 4.471500e-02 : f32
    %40 = vector.broadcast %cst_19 : f32 to vector<16x128xf32>
    %41 = arith.mulf %40, %39 : vector<16x128xf32>
    %42 = arith.addf %37, %41 : vector<16x128xf32>
    %cst_20 = arith.constant 0.797884583 : f32
    %43 = vector.broadcast %cst_20 : f32 to vector<16x128xf32>
    %44 = arith.mulf %43, %42 : vector<16x128xf32>
    %45 = math.tanh %44 : vector<16x128xf32>
    %cst_21 = arith.constant 1.000000e+00 : f32
    %46 = vector.broadcast %cst_21 : f32 to vector<16x128xf32>
    %47 = arith.addf %46, %45 : vector<16x128xf32>
    %cst_22 = arith.constant 5.000000e-01 : f32
    %48 = vector.broadcast %cst_22 : f32 to vector<16x128xf32>
    %49 = arith.mulf %48, %47 : vector<16x128xf32>
    %50 = arith.mulf %37, %49 : vector<16x128xf32>
    %51 = arith.truncf %50 : vector<16x128xf32> to vector<16x128xbf16>
    %cst_23 = arith.constant dense<0.000000e+00> : vector<16x768xf32>
    %52 = tpu.matmul %51, %1, %cst_23 {dimension_numbers = #tpu.dot_dimension_numbers<[1], [0], [0], [1], [0, 0, 1, 1], [], []>} : vector<16x128xbf16>, vector<128x768xbf16>, vector<16x768xf32> -> vector<16x768xf32>
    %53 = vector.broadcast %2 : vector<1x768xf32> to vector<16x768xf32>
    %54 = arith.addf %52, %53 : vector<16x768xf32>
    %cst_24 = arith.constant 1.250000e-01 : f32
    %55 = vector.broadcast %cst_24 : f32 to vector<16x768xf32>
    %56 = arith.mulf %55, %54 : vector<16x768xf32>
    %57 = arith.addf %32, %56 : vector<16x768xf32>
    %cst_25 = arith.constant -1.000000e+00 : f32
    %cst_26 = arith.constant 1.000000e+00 : f32
    %58 = vector.broadcast %cst_25 : f32 to vector<16x768xf32>
    %59 = arith.maximumf %58, %57 : vector<16x768xf32>
    %60 = vector.broadcast %cst_26 : f32 to vector<16x768xf32>
    %61 = arith.minimumf %60, %59 : vector<16x768xf32>
    %c2 = arith.constant 2 : index
    %c0_27 = arith.constant 0 : index
    %62 = vector.load %arg3[%c2, %c0_27] : memref<8x128xf32, #tpu.memory_space<vmem>>, vector<1x128xf32>
    %63 = arith.truncf %61 : vector<16x768xf32> to vector<16x768xbf16>
    %cst_28 = arith.constant dense<0.000000e+00> : vector<16x128xf32>
    %64 = tpu.matmul %63, %0, %cst_28 {dimension_numbers = #tpu.dot_dimension_numbers<[1], [0], [0], [1], [0, 0, 1, 1], [], []>} : vector<16x768xbf16>, vector<768x128xbf16>, vector<16x128xf32> -> vector<16x128xf32>
    %65 = vector.broadcast %62 : vector<1x128xf32> to vector<16x128xf32>
    %66 = arith.addf %64, %65 : vector<16x128xf32>
    %67 = arith.mulf %66, %66 : vector<16x128xf32>
    %68 = arith.mulf %66, %67 : vector<16x128xf32>
    %cst_29 = arith.constant 4.471500e-02 : f32
    %69 = vector.broadcast %cst_29 : f32 to vector<16x128xf32>
    %70 = arith.mulf %69, %68 : vector<16x128xf32>
    %71 = arith.addf %66, %70 : vector<16x128xf32>
    %cst_30 = arith.constant 0.797884583 : f32
    %72 = vector.broadcast %cst_30 : f32 to vector<16x128xf32>
    %73 = arith.mulf %72, %71 : vector<16x128xf32>
    %74 = math.tanh %73 : vector<16x128xf32>
    %cst_31 = arith.constant 1.000000e+00 : f32
    %75 = vector.broadcast %cst_31 : f32 to vector<16x128xf32>
    %76 = arith.addf %75, %74 : vector<16x128xf32>
    %cst_32 = arith.constant 5.000000e-01 : f32
    %77 = vector.broadcast %cst_32 : f32 to vector<16x128xf32>
    %78 = arith.mulf %77, %76 : vector<16x128xf32>
    %79 = arith.mulf %66, %78 : vector<16x128xf32>
    %80 = arith.truncf %79 : vector<16x128xf32> to vector<16x128xbf16>
    %cst_33 = arith.constant dense<0.000000e+00> : vector<16x768xf32>
    %81 = tpu.matmul %80, %1, %cst_33 {dimension_numbers = #tpu.dot_dimension_numbers<[1], [0], [0], [1], [0, 0, 1, 1], [], []>} : vector<16x128xbf16>, vector<128x768xbf16>, vector<16x768xf32> -> vector<16x768xf32>
    %82 = vector.broadcast %2 : vector<1x768xf32> to vector<16x768xf32>
    %83 = arith.addf %81, %82 : vector<16x768xf32>
    %cst_34 = arith.constant 1.250000e-01 : f32
    %84 = vector.broadcast %cst_34 : f32 to vector<16x768xf32>
    %85 = arith.mulf %84, %83 : vector<16x768xf32>
    %86 = arith.addf %61, %85 : vector<16x768xf32>
    %cst_35 = arith.constant -1.000000e+00 : f32
    %cst_36 = arith.constant 1.000000e+00 : f32
    %87 = vector.broadcast %cst_35 : f32 to vector<16x768xf32>
    %88 = arith.maximumf %87, %86 : vector<16x768xf32>
    %89 = vector.broadcast %cst_36 : f32 to vector<16x768xf32>
    %90 = arith.minimumf %89, %88 : vector<16x768xf32>
    %c3 = arith.constant 3 : index
    %c0_37 = arith.constant 0 : index
    %91 = vector.load %arg3[%c3, %c0_37] : memref<8x128xf32, #tpu.memory_space<vmem>>, vector<1x128xf32>
    %92 = arith.truncf %90 : vector<16x768xf32> to vector<16x768xbf16>
    %cst_38 = arith.constant dense<0.000000e+00> : vector<16x128xf32>
    %93 = tpu.matmul %92, %0, %cst_38 {dimension_numbers = #tpu.dot_dimension_numbers<[1], [0], [0], [1], [0, 0, 1, 1], [], []>} : vector<16x768xbf16>, vector<768x128xbf16>, vector<16x128xf32> -> vector<16x128xf32>
    %94 = vector.broadcast %91 : vector<1x128xf32> to vector<16x128xf32>
    %95 = arith.addf %93, %94 : vector<16x128xf32>
    %96 = arith.mulf %95, %95 : vector<16x128xf32>
    %97 = arith.mulf %95, %96 : vector<16x128xf32>
    %cst_39 = arith.constant 4.471500e-02 : f32
    %98 = vector.broadcast %cst_39 : f32 to vector<16x128xf32>
    %99 = arith.mulf %98, %97 : vector<16x128xf32>
    %100 = arith.addf %95, %99 : vector<16x128xf32>
    %cst_40 = arith.constant 0.797884583 : f32
    %101 = vector.broadcast %cst_40 : f32 to vector<16x128xf32>
    %102 = arith.mulf %101, %100 : vector<16x128xf32>
    %103 = math.tanh %102 : vector<16x128xf32>
    %cst_41 = arith.constant 1.000000e+00 : f32
    %104 = vector.broadcast %cst_41 : f32 to vector<16x128xf32>
    %105 = arith.addf %104, %103 : vector<16x128xf32>
    %cst_42 = arith.constant 5.000000e-01 : f32
    %106 = vector.broadcast %cst_42 : f32 to vector<16x128xf32>
    %107 = arith.mulf %106, %105 : vector<16x128xf32>
    %108 = arith.mulf %95, %107 : vector<16x128xf32>
    %109 = arith.truncf %108 : vector<16x128xf32> to vector<16x128xbf16>
    %cst_43 = arith.constant dense<0.000000e+00> : vector<16x768xf32>
    %110 = tpu.matmul %109, %1, %cst_43 {dimension_numbers = #tpu.dot_dimension_numbers<[1], [0], [0], [1], [0, 0, 1, 1], [], []>} : vector<16x128xbf16>, vector<128x768xbf16>, vector<16x768xf32> -> vector<16x768xf32>
    %111 = vector.broadcast %2 : vector<1x768xf32> to vector<16x768xf32>
    %112 = arith.addf %110, %111 : vector<16x768xf32>
    %cst_44 = arith.constant 1.250000e-01 : f32
    %113 = vector.broadcast %cst_44 : f32 to vector<16x768xf32>
    %114 = arith.mulf %113, %112 : vector<16x768xf32>
    %115 = arith.addf %90, %114 : vector<16x768xf32>
    %cst_45 = arith.constant -1.000000e+00 : f32
    %cst_46 = arith.constant 1.000000e+00 : f32
    %116 = vector.broadcast %cst_45 : f32 to vector<16x768xf32>
    %117 = arith.maximumf %116, %115 : vector<16x768xf32>
    %118 = vector.broadcast %cst_46 : f32 to vector<16x768xf32>
    %119 = arith.minimumf %118, %117 : vector<16x768xf32>
    %c4 = arith.constant 4 : index
    %c0_47 = arith.constant 0 : index
    %120 = vector.load %arg3[%c4, %c0_47] : memref<8x128xf32, #tpu.memory_space<vmem>>, vector<1x128xf32>
    %121 = arith.truncf %119 : vector<16x768xf32> to vector<16x768xbf16>
    %cst_48 = arith.constant dense<0.000000e+00> : vector<16x128xf32>
    %122 = tpu.matmul %121, %0, %cst_48 {dimension_numbers = #tpu.dot_dimension_numbers<[1], [0], [0], [1], [0, 0, 1, 1], [], []>} : vector<16x768xbf16>, vector<768x128xbf16>, vector<16x128xf32> -> vector<16x128xf32>
    %123 = vector.broadcast %120 : vector<1x128xf32> to vector<16x128xf32>
    %124 = arith.addf %122, %123 : vector<16x128xf32>
    %125 = arith.mulf %124, %124 : vector<16x128xf32>
    %126 = arith.mulf %124, %125 : vector<16x128xf32>
    %cst_49 = arith.constant 4.471500e-02 : f32
    %127 = vector.broadcast %cst_49 : f32 to vector<16x128xf32>
    %128 = arith.mulf %127, %126 : vector<16x128xf32>
    %129 = arith.addf %124, %128 : vector<16x128xf32>
    %cst_50 = arith.constant 0.797884583 : f32
    %130 = vector.broadcast %cst_50 : f32 to vector<16x128xf32>
    %131 = arith.mulf %130, %129 : vector<16x128xf32>
    %132 = math.tanh %131 : vector<16x128xf32>
    %cst_51 = arith.constant 1.000000e+00 : f32
    %133 = vector.broadcast %cst_51 : f32 to vector<16x128xf32>
    %134 = arith.addf %133, %132 : vector<16x128xf32>
    %cst_52 = arith.constant 5.000000e-01 : f32
    %135 = vector.broadcast %cst_52 : f32 to vector<16x128xf32>
    %136 = arith.mulf %135, %134 : vector<16x128xf32>
    %137 = arith.mulf %124, %136 : vector<16x128xf32>
    %138 = arith.truncf %137 : vector<16x128xf32> to vector<16x128xbf16>
    %cst_53 = arith.constant dense<0.000000e+00> : vector<16x768xf32>
    %139 = tpu.matmul %138, %1, %cst_53 {dimension_numbers = #tpu.dot_dimension_numbers<[1], [0], [0], [1], [0, 0, 1, 1], [], []>} : vector<16x128xbf16>, vector<128x768xbf16>, vector<16x768xf32> -> vector<16x768xf32>
    %140 = vector.broadcast %2 : vector<1x768xf32> to vector<16x768xf32>
    %141 = arith.addf %139, %140 : vector<16x768xf32>
    %cst_54 = arith.constant 1.250000e-01 : f32
    %142 = vector.broadcast %cst_54 : f32 to vector<16x768xf32>
    %143 = arith.mulf %142, %141 : vector<16x768xf32>
    %144 = arith.addf %119, %143 : vector<16x768xf32>
    %cst_55 = arith.constant -1.000000e+00 : f32
    %cst_56 = arith.constant 1.000000e+00 : f32
    %145 = vector.broadcast %cst_55 : f32 to vector<16x768xf32>
    %146 = arith.maximumf %145, %144 : vector<16x768xf32>
    %147 = vector.broadcast %cst_56 : f32 to vector<16x768xf32>
    %148 = arith.minimumf %147, %146 : vector<16x768xf32>
    %c5 = arith.constant 5 : index
    %c0_57 = arith.constant 0 : index
    %149 = vector.load %arg3[%c5, %c0_57] : memref<8x128xf32, #tpu.memory_space<vmem>>, vector<1x128xf32>
    %150 = arith.truncf %148 : vector<16x768xf32> to vector<16x768xbf16>
    %cst_58 = arith.constant dense<0.000000e+00> : vector<16x128xf32>
    %151 = tpu.matmul %150, %0, %cst_58 {dimension_numbers = #tpu.dot_dimension_numbers<[1], [0], [0], [1], [0, 0, 1, 1], [], []>} : vector<16x768xbf16>, vector<768x128xbf16>, vector<16x128xf32> -> vector<16x128xf32>
    %152 = vector.broadcast %149 : vector<1x128xf32> to vector<16x128xf32>
    %153 = arith.addf %151, %152 : vector<16x128xf32>
    %154 = arith.mulf %153, %153 : vector<16x128xf32>
    %155 = arith.mulf %153, %154 : vector<16x128xf32>
    %cst_59 = arith.constant 4.471500e-02 : f32
    %156 = vector.broadcast %cst_59 : f32 to vector<16x128xf32>
    %157 = arith.mulf %156, %155 : vector<16x128xf32>
    %158 = arith.addf %153, %157 : vector<16x128xf32>
    %cst_60 = arith.constant 0.797884583 : f32
    %159 = vector.broadcast %cst_60 : f32 to vector<16x128xf32>
    %160 = arith.mulf %159, %158 : vector<16x128xf32>
    %161 = math.tanh %160 : vector<16x128xf32>
    %cst_61 = arith.constant 1.000000e+00 : f32
    %162 = vector.broadcast %cst_61 : f32 to vector<16x128xf32>
    %163 = arith.addf %162, %161 : vector<16x128xf32>
    %cst_62 = arith.constant 5.000000e-01 : f32
    %164 = vector.broadcast %cst_62 : f32 to vector<16x128xf32>
    %165 = arith.mulf %164, %163 : vector<16x128xf32>
    %166 = arith.mulf %153, %165 : vector<16x128xf32>
    %167 = arith.truncf %166 : vector<16x128xf32> to vector<16x128xbf16>
    %cst_63 = arith.constant dense<0.000000e+00> : vector<16x768xf32>
    %168 = tpu.matmul %167, %1, %cst_63 {dimension_numbers = #tpu.dot_dimension_numbers<[1], [0], [0], [1], [0, 0, 1, 1], [], []>} : vector<16x128xbf16>, vector<128x768xbf16>, vector<16x768xf32> -> vector<16x768xf32>
    %169 = vector.broadcast %2 : vector<1x768xf32> to vector<16x768xf32>
    %170 = arith.addf %168, %169 : vector<16x768xf32>
    %cst_64 = arith.constant 1.250000e-01 : f32
    %171 = vector.broadcast %cst_64 : f32 to vector<16x768xf32>
    %172 = arith.mulf %171, %170 : vector<16x768xf32>
    %173 = arith.addf %148, %172 : vector<16x768xf32>
    %cst_65 = arith.constant -1.000000e+00 : f32
    %cst_66 = arith.constant 1.000000e+00 : f32
    %174 = vector.broadcast %cst_65 : f32 to vector<16x768xf32>
    %175 = arith.maximumf %174, %173 : vector<16x768xf32>
    %176 = vector.broadcast %cst_66 : f32 to vector<16x768xf32>
    %177 = arith.minimumf %176, %175 : vector<16x768xf32>
    %c6 = arith.constant 6 : index
    %c0_67 = arith.constant 0 : index
    %178 = vector.load %arg3[%c6, %c0_67] : memref<8x128xf32, #tpu.memory_space<vmem>>, vector<1x128xf32>
    %179 = arith.truncf %177 : vector<16x768xf32> to vector<16x768xbf16>
    %cst_68 = arith.constant dense<0.000000e+00> : vector<16x128xf32>
    %180 = tpu.matmul %179, %0, %cst_68 {dimension_numbers = #tpu.dot_dimension_numbers<[1], [0], [0], [1], [0, 0, 1, 1], [], []>} : vector<16x768xbf16>, vector<768x128xbf16>, vector<16x128xf32> -> vector<16x128xf32>
    %181 = vector.broadcast %178 : vector<1x128xf32> to vector<16x128xf32>
    %182 = arith.addf %180, %181 : vector<16x128xf32>
    %183 = arith.mulf %182, %182 : vector<16x128xf32>
    %184 = arith.mulf %182, %183 : vector<16x128xf32>
    %cst_69 = arith.constant 4.471500e-02 : f32
    %185 = vector.broadcast %cst_69 : f32 to vector<16x128xf32>
    %186 = arith.mulf %185, %184 : vector<16x128xf32>
    %187 = arith.addf %182, %186 : vector<16x128xf32>
    %cst_70 = arith.constant 0.797884583 : f32
    %188 = vector.broadcast %cst_70 : f32 to vector<16x128xf32>
    %189 = arith.mulf %188, %187 : vector<16x128xf32>
    %190 = math.tanh %189 : vector<16x128xf32>
    %cst_71 = arith.constant 1.000000e+00 : f32
    %191 = vector.broadcast %cst_71 : f32 to vector<16x128xf32>
    %192 = arith.addf %191, %190 : vector<16x128xf32>
    %cst_72 = arith.constant 5.000000e-01 : f32
    %193 = vector.broadcast %cst_72 : f32 to vector<16x128xf32>
    %194 = arith.mulf %193, %192 : vector<16x128xf32>
    %195 = arith.mulf %182, %194 : vector<16x128xf32>
    %196 = arith.truncf %195 : vector<16x128xf32> to vector<16x128xbf16>
    %cst_73 = arith.constant dense<0.000000e+00> : vector<16x768xf32>
    %197 = tpu.matmul %196, %1, %cst_73 {dimension_numbers = #tpu.dot_dimension_numbers<[1], [0], [0], [1], [0, 0, 1, 1], [], []>} : vector<16x128xbf16>, vector<128x768xbf16>, vector<16x768xf32> -> vector<16x768xf32>
    %198 = vector.broadcast %2 : vector<1x768xf32> to vector<16x768xf32>
    %199 = arith.addf %197, %198 : vector<16x768xf32>
    %cst_74 = arith.constant 1.250000e-01 : f32
    %200 = vector.broadcast %cst_74 : f32 to vector<16x768xf32>
    %201 = arith.mulf %200, %199 : vector<16x768xf32>
    %202 = arith.addf %177, %201 : vector<16x768xf32>
    %cst_75 = arith.constant -1.000000e+00 : f32
    %cst_76 = arith.constant 1.000000e+00 : f32
    %203 = vector.broadcast %cst_75 : f32 to vector<16x768xf32>
    %204 = arith.maximumf %203, %202 : vector<16x768xf32>
    %205 = vector.broadcast %cst_76 : f32 to vector<16x768xf32>
    %206 = arith.minimumf %205, %204 : vector<16x768xf32>
    %c7 = arith.constant 7 : index
    %c0_77 = arith.constant 0 : index
    %207 = vector.load %arg3[%c7, %c0_77] : memref<8x128xf32, #tpu.memory_space<vmem>>, vector<1x128xf32>
    %208 = arith.truncf %206 : vector<16x768xf32> to vector<16x768xbf16>
    %cst_78 = arith.constant dense<0.000000e+00> : vector<16x128xf32>
    %209 = tpu.matmul %208, %0, %cst_78 {dimension_numbers = #tpu.dot_dimension_numbers<[1], [0], [0], [1], [0, 0, 1, 1], [], []>} : vector<16x768xbf16>, vector<768x128xbf16>, vector<16x128xf32> -> vector<16x128xf32>
    %210 = vector.broadcast %207 : vector<1x128xf32> to vector<16x128xf32>
    %211 = arith.addf %209, %210 : vector<16x128xf32>
    %212 = arith.mulf %211, %211 : vector<16x128xf32>
    %213 = arith.mulf %211, %212 : vector<16x128xf32>
    %cst_79 = arith.constant 4.471500e-02 : f32
    %214 = vector.broadcast %cst_79 : f32 to vector<16x128xf32>
    %215 = arith.mulf %214, %213 : vector<16x128xf32>
    %216 = arith.addf %211, %215 : vector<16x128xf32>
    %cst_80 = arith.constant 0.797884583 : f32
    %217 = vector.broadcast %cst_80 : f32 to vector<16x128xf32>
    %218 = arith.mulf %217, %216 : vector<16x128xf32>
    %219 = math.tanh %218 : vector<16x128xf32>
    %cst_81 = arith.constant 1.000000e+00 : f32
    %220 = vector.broadcast %cst_81 : f32 to vector<16x128xf32>
    %221 = arith.addf %220, %219 : vector<16x128xf32>
    %cst_82 = arith.constant 5.000000e-01 : f32
    %222 = vector.broadcast %cst_82 : f32 to vector<16x128xf32>
    %223 = arith.mulf %222, %221 : vector<16x128xf32>
    %224 = arith.mulf %211, %223 : vector<16x128xf32>
    %225 = arith.truncf %224 : vector<16x128xf32> to vector<16x128xbf16>
    %cst_83 = arith.constant dense<0.000000e+00> : vector<16x768xf32>
    %226 = tpu.matmul %225, %1, %cst_83 {dimension_numbers = #tpu.dot_dimension_numbers<[1], [0], [0], [1], [0, 0, 1, 1], [], []>} : vector<16x128xbf16>, vector<128x768xbf16>, vector<16x768xf32> -> vector<16x768xf32>
    %227 = vector.broadcast %2 : vector<1x768xf32> to vector<16x768xf32>
    %228 = arith.addf %226, %227 : vector<16x768xf32>
    %cst_84 = arith.constant 1.250000e-01 : f32
    %229 = vector.broadcast %cst_84 : f32 to vector<16x768xf32>
    %230 = arith.mulf %229, %228 : vector<16x768xf32>
    %231 = arith.addf %206, %230 : vector<16x768xf32>
    %cst_85 = arith.constant -1.000000e+00 : f32
    %cst_86 = arith.constant 1.000000e+00 : f32
    %232 = vector.broadcast %cst_85 : f32 to vector<16x768xf32>
    %233 = arith.maximumf %232, %231 : vector<16x768xf32>
    %234 = vector.broadcast %cst_86 : f32 to vector<16x768xf32>
    %235 = arith.minimumf %234, %233 : vector<16x768xf32>
    %cst_87 = arith.constant 1.000000e+00 : f32
    %236 = vector.broadcast %cst_87 : f32 to vector<16x768xf32>
    %237 = arith.addf %235, %236 : vector<16x768xf32>
    %cst_88 = arith.constant 5.000000e-01 : f32
    %238 = vector.broadcast %cst_88 : f32 to vector<16x768xf32>
    %239 = arith.mulf %237, %238 : vector<16x768xf32>
    %cst_89 = arith.constant 0.000000e+00 : f32
    %cst_90 = arith.constant 1.000000e+00 : f32
    %240 = vector.broadcast %cst_89 : f32 to vector<16x768xf32>
    %241 = arith.maximumf %240, %239 : vector<16x768xf32>
    %242 = vector.broadcast %cst_90 : f32 to vector<16x768xf32>
    %243 = arith.minimumf %242, %241 : vector<16x768xf32>
    %c0_91 = arith.constant 0 : index
    %c0_92 = arith.constant 0 : index
    %244 = vector.load %arg6[%c0_91, %c0_92] : memref<16x768xf32, #tpu.memory_space<vmem>>, vector<16x768xf32>
    tpu.vector_store %arg6[%c0_91, %c0_92], %243 {strides = array<i32>} : memref<16x768xf32, #tpu.memory_space<vmem>>, vector<16x768xf32>,
    return
  }
  func.func @transform_0(%arg0: i32) -> (i32, i32) {
    %c0_i32 = arith.constant 0 : i32
    %c0_i32_0 = arith.constant 0 : i32
    return %arg0, %c0_i32 : i32, i32
  }
  func.func @transform_1(%arg0: i32) -> (i32, i32) {
    %c0_i32 = arith.constant 0 : i32
    %c0_i32_0 = arith.constant 0 : i32
    %c0_i32_1 = arith.constant 0 : i32
    return %c0_i32, %c0_i32_0 : i32, i32
  }
  func.func @transform_2(%arg0: i32) -> (i32, i32) {
    %c0_i32 = arith.constant 0 : i32
    %c0_i32_0 = arith.constant 0 : i32
    %c0_i32_1 = arith.constant 0 : i32
    return %c0_i32, %c0_i32_0 : i32, i32
  }
  func.func @transform_3(%arg0: i32) -> (i32, i32) {
    %c0_i32 = arith.constant 0 : i32
    %c0_i32_0 = arith.constant 0 : i32
    %c0_i32_1 = arith.constant 0 : i32
    return %c0_i32, %c0_i32_0 : i32, i32
  }
  func.func @transform_4(%arg0: i32) -> (i32, i32) {
    %c0_i32 = arith.constant 0 : i32
    %c0_i32_0 = arith.constant 0 : i32
    %c0_i32_1 = arith.constant 0 : i32
    return %c0_i32, %c0_i32_0 : i32, i32
  }
  func.func @transform_5(%arg0: i32) -> (i32, i32) {
    %c0_i32 = arith.constant 0 : i32
    %c0_i32_0 = arith.constant 0 : i32
    return %arg0, %c0_i32 : i32, i32
  }
}

</mosaic_0001>

<bundles_post_ra>
// kernel: rectified_flow_sample.1
= control target key start
LH: loop header
LB: loop body
LE: loop exit
PB: predicated region body
PF: predicated region fallthrough
CT: control target
= control target key end

     0   :  { %10 = vsyncpa [#allocation3], 0  ;;  %s7678_s0 = inlined_call_operand.hbm [shape: f32[16,768], index: 0, kind: input, shape index: {}, may-alias: {0,5}]   ;;  %s7679_s1 = inlined_call_operand.vmem [shape: bf16[768,128], index: 1, kind: input, shape index: {}]   ;;  %s7680_s2 = inlined_call_operand.vmem [shape: f32[8,128], index: 2, kind: input, shape index: {}]   ;;  %s7681_s3 = inlined_call_operand.vmem [shape: bf16[128,768], index: 3, kind: input, shape index: {}]   ;;  %s7682_s4 = inlined_call_operand.vmem [shape: f32[1,768], index: 4, kind: input, shape index: {}]   ;;  %s7683_s5 = inlined_call_operand.hbm [shape: f32[16,768], index: 5, kind: output, shape index: {}, may-alias: {0,5}]  }
   0x1   :  { %11 = vsyncpa [#allocation4], 0  ;;  %s4594_s18 = smov [#allocation2]   ;;  %s4546_s22 = scalar_lea.hbm %s7678_s0, 1536 }
   0x2   :  { %s17_s19 = sshll.u32 %s4594_s18, 4  ;;  %p4547_p0 = scmp.ne.s32.totalorder %s7678_s0, %s4546_s22  ;;  %s18_s19 = int_to_ptr.vmem [resolvable:$true] %s17_s19 }
   0x3   :  { %p4550_p1 = scmp.lt.u32.totalorder %s4546_s22, %s7678_s0 }
   0x5   :  { %p4552_p2 = pnand %p4550_p1, %p4547_p0 }
   0x7   :  { %4555 = shalt.err (!%p4552_p2)
}
   0x8   :  { %s4556_s27 = scalar_lea.vmem %s18_s19, 1536  ;;  %p4561_p4 = scmp.lt.s32.totalorder %s18_s19, %s18_s19 }
   0x9   :  { %p4557_p3 = scmp.ne.s32.totalorder %s18_s19, %s4556_s27  ;;  %p4562_p5 = scmp.lt.s32.totalorder %s4556_s27, %s4556_s27 }
   0xb   :  { %p4563_p6 = por %p4562_p5, %p4561_p4 }
   0xd   :  { %p4564_p7 = pnand %p4563_p6, %p4557_p3 }
   0xf   :  { %4567 = shalt.err (!%p4564_p7)
}
  0x10   :  { %s4595_s28 = smov 768   ;;  %s4596_s29 = smov 48  }
  0x11   :  { %23 = dma.hbm_to_vmem [thread:$0]  %s7678_s0, 1536, %s18_s19, [#allocation3], %s4595_s28, %s4595_s28, %s4596_s29  }
  0x12   :  { %4590 = dma.done.wait [#allocation3], 1536  }
  0x13   :  { %4591 = vsyncadd [#allocation3], 4294965760  ;;  %v4647_v0 = vld [vmem:[%s7679_s1 + $0x40] sm:$0xff]   ;;  %v4670_v4 = vld [vmem:[%s7679_s1 + $0x48] sm:$0xff]  }
  0x14   :  { %v4652_v1 = vld [vmem:[%s7679_s1] sm:$0xff]   ;;  %3669 = vmatprep.subr.bf16.mxu0 %v4647_v0  ;;  %v4676_v5 = vld [vmem:[%s7679_s1 + $0x8] sm:$0xff]   ;;  %v4694_v8 = vld [vmem:[%s7679_s1 + $0x50] sm:$0xff]  }
  0x15   :  { %v4658_v2 = vld [vmem:[%s7679_s1 + $0xc0] sm:$0xff]   ;;  %3670 = vmatpush3.bf16.msra.mxu0 %v4652_v1  ;;  %v4682_v6 = vld [vmem:[%s7679_s1 + $0xc8] sm:$0xff]   ;;  %v4700_v9 = vld [vmem:[%s7679_s1 + $0x10] sm:$0xff]  }
  0x16   :  { %v4664_v3 = vld [vmem:[%s7679_s1 + $0x80] sm:$0xff]   ;;  %3691 = vmatprep.subr.bf16.mxu1 %v4658_v2  ;;  %3671 = vmatprep.subr.bf16.mxu0 %v4670_v4  ;;  %v4688_v7 = vld [vmem:[%s7679_s1 + $0x88] sm:$0xff]   ;;  %v4706_v10 = vld [vmem:[%s7679_s1 + $0xd0] sm:$0xff]  }
  0x17   :  { %3692 = vmatpush3.bf16.msra.mxu1 %v4664_v3  ;;  %v4712_v11 = vld [vmem:[%s7679_s1 + $0x90] sm:$0xff]   ;;  %v4718_v12 = vld [vmem:[%s7679_s1 + $0x58] sm:$0xff]   ;;  %v4742_v16 = vld [vmem:[%s7679_s1 + $0x60] sm:$0xff]  }
  0x18   :  { %3693 = vmatprep.subr.bf16.mxu1 %v4682_v6  ;;  %v4724_v13 = vld [vmem:[%s7679_s1 + $0x18] sm:$0xff]   ;;  %v4748_v17 = vld [vmem:[%s7679_s1 + $0x20] sm:$0xff]   ;;  %v4766_v20 = vld [vmem:[%s7679_s1 + $0x68] sm:$0xff]  }
  0x19   :  { %3672 = vmatpush3.bf16.msra.mxu0 %v4676_v5  ;;  %v4730_v14 = vld [vmem:[%s7679_s1 + $0xd8] sm:$0xff]   ;;  %v4754_v18 = vld [vmem:[%s7679_s1 + $0xe0] sm:$0xff]   ;;  %v4772_v21 = vld [vmem:[%s7679_s1 + $0x28] sm:$0xff]  }
  0x1a   :  { %3673 = vmatprep.subr.bf16.mxu0 %v4694_v8  ;;  %v4736_v15 = vld [vmem:[%s7679_s1 + $0x98] sm:$0xff]   ;;  %v4760_v19 = vld [vmem:[%s7679_s1 + $0xa0] sm:$0xff]   ;;  %v4778_v22 = vld [vmem:[%s7679_s1 + $0xe8] sm:$0xff]  }
  0x1b   :  { %3694 = vmatpush3.bf16.msra.mxu1 %v4688_v7  ;;  %v4784_v23 = vld [vmem:[%s7679_s1 + $0xa8] sm:$0xff]   ;;  %v4790_v24 = vld [vmem:[%s7679_s1 + $0x70] sm:$0xff]   ;;  %v4814_v28 = vld [vmem:[%s7679_s1 + $0x78] sm:$0xff]  }
  0x1c   :  { %3695 = vmatprep.subr.bf16.mxu1 %v4706_v10  ;;  %v4796_v25 = vld [vmem:[%s7679_s1 + $0x30] sm:$0xff]   ;;  %v4820_v29 = vld [vmem:[%s7679_s1 + $0x38] sm:$0xff]   ;;  %v4829_v31 = vld [vmem:[#allocation2 + $0x8] sm:$0xff] }
  0x1d   :  { %3674 = vmatpush3.bf16.msra.mxu0 %v4700_v9  ;;  %v4802_v26 = vld [vmem:[%s7679_s1 + $0xf0] sm:$0xff]   ;;  %v4826_v30 = vld [vmem:[%s7679_s1 + $0xf8] sm:$0xff]   ;;  %v4841_v35 = vld [vmem:[#allocation2] sm:$0xff] }
  0x1e   :  { %3675 = vmatprep.subr.bf16.mxu0 %v4718_v12  ;;  %v4808_v27 = vld [vmem:[%s7679_s1 + $0xb0] sm:$0xff]   ;;  %v4831_v32 = vld [vmem:[#allocation2 + $0x38] sm:$0xff]  ;;  %v4851_v38 = vld [vmem:[%s7679_s1 + $0x140] sm:$0xff]  }
  0x1f   :  { %3696 = vmatpush3.bf16.msra.mxu1 %v4712_v11  ;;  %8152 = vst [vmem:[#allocation8_spill] sm:$0xff] %v4831_v32  ;;  %v195_v33 = vpack.c.bf16 %v4831_v32, %v4829_v31  ;;  %v4839_v34 = vld [vmem:[%s7679_s1 + $0xb8] sm:$0xff]   ;;  %v4843_v36 = vld [vmem:[#allocation2 + $0x30] sm:$0xff]  ;;  %v4855_v40 = vld [vmem:[#allocation2 + $0x48] sm:$0xff] }
  0x20   :  { %3697 = vmatprep.subr.bf16.mxu1 %v4730_v14  ;;  %v194_v37 = vpack.c.bf16 %v4843_v36, %v4841_v35  ;;  %v4853_v39 = vld [vmem:[#allocation2 + $0x18] sm:$0xff]  ;;  %8153 = vst [vmem:[#allocation9_spill] sm:$0xff] %v4855_v40  ;;  %v4862_v42 = vld [vmem:[%s7679_s1 + $0x100] sm:$0xff]   ;;  %v4865_v43 = vld [vmem:[#allocation2 + $0x10] sm:$0xff] }
  0x21   :  { %3676 = vmatpush3.bf16.msra.mxu0 %v4724_v13  ;;  %524 = vmatprep.mubr.bf16.mxu0 %v195_v33  ;;  %v197_v41 = vpack.c.bf16 %v4855_v40, %v4853_v39  ;;  %8154 = vst [vmem:[#allocation10_spill] sm:$0xff] %v4862_v42  ;;  %v4867_v44 = vld [vmem:[#allocation2 + $0x40] sm:$0xff]  ;;  %v4875_v46 = vld [vmem:[%s7679_s1 + $0x148] sm:$0xff]   ;;  %v4886_v48 = vld [vmem:[%s7679_s1 + $0x150] sm:$0xff]  }
  0x22   :  { %3677 = vmatprep.subr.bf16.mxu0 %v4742_v16  ;;  %v196_v45 = vpack.c.bf16 %v4867_v44, %v4865_v43  ;;  %8155 = vst [vmem:[#allocation11_spill] sm:$0xff] %v4875_v46  ;;  %v4880_v47 = vld [vmem:[%s7679_s1 + $0x108] sm:$0xff]   ;;  %8157 = vst [vmem:[#allocation13_spill] sm:$0xff] %v4886_v48  ;;  %v4892_v49 = vld [vmem:[%s7679_s1 + $0x110] sm:$0xff]  }
  0x23   :  { %3698 = vmatpush3.bf16.msra.mxu1 %v4736_v15  ;;  %565 = vmatprep.mubr.bf16.mxu1 %v197_v41  ;;  %8156 = vst [vmem:[#allocation12_spill] sm:$0xff] %v4880_v47  ;;  %8158 = vst [vmem:[#allocation14_spill] sm:$0xff] %v4892_v49  ;;  %v4898_v50 = vld [vmem:[%s7679_s1 + $0x158] sm:$0xff]   ;;  %v4910_v52 = vld [vmem:[%s7679_s1 + $0x160] sm:$0xff]  }
  0x24   :  { %3699 = vmatprep.subr.bf16.mxu1 %v4754_v18  ;;  %8159 = vst [vmem:[#allocation15_spill] sm:$0xff] %v4898_v50  ;;  %v4904_v51 = vld [vmem:[%s7679_s1 + $0x118] sm:$0xff]   ;;  %8161 = vst [vmem:[#allocation17_spill] sm:$0xff] %v4910_v52  ;;  %v4916_v53 = vld [vmem:[%s7679_s1 + $0x120] sm:$0xff]  }
  0x25   :  { %3678 = vmatpush3.bf16.msra.mxu0 %v4748_v17  ;;  %8160 = vst [vmem:[#allocation16_spill] sm:$0xff] %v4904_v51  ;;  %8162 = vst [vmem:[#allocation18_spill] sm:$0xff] %v4916_v53  ;;  %v4922_v54 = vld [vmem:[%s7679_s1 + $0x168] sm:$0xff]   ;;  %v4931_v57 = vld [vmem:[#allocation2 + $0x58] sm:$0xff] }
  0x26   :  { %3679 = vmatprep.subr.bf16.mxu0 %v4766_v20  ;;  %8163 = vst [vmem:[#allocation19_spill] sm:$0xff] %v4922_v54  ;;  %v4924_v55 = vld [vmem:[#allocation2 + $0x28] sm:$0xff]  ;;  %8166 = vst [vmem:[#allocation22_spill] sm:$0xff] %v4931_v57  ;;  %v4936_v58 = vld [vmem:[%s7679_s1 + $0x170] sm:$0xff]  }
  0x27   :  { %3700 = vmatpush3.bf16.msra.mxu1 %v4760_v19  ;;  %8164 = vst [vmem:[#allocation20_spill] sm:$0xff] %v4924_v55  ;;  %v4929_v56 = vld [vmem:[%s7679_s1 + $0x128] sm:$0xff]   ;;  %8167 = vst [vmem:[#allocation23_spill] sm:$0xff] %v4936_v58  ;;  %v199_v59 = vpack.c.bf16 %v4931_v57, %v4924_v55  ;;  %v4945_v60 = vld [vmem:[%s7679_s1 + $0x130] sm:$0xff]  }
  0x28   :  { %3701 = vmatprep.subr.bf16.mxu1 %v4778_v22  ;;  %8165 = vst [vmem:[#allocation21_spill] sm:$0xff] %v4929_v56  ;;  %8168 = vst [vmem:[#allocation24_spill] sm:$0xff] %v4945_v60  ;;  %v4950_v61 = vld [vmem:[%s7679_s1 + $0x178] sm:$0xff]   ;;  %v4959_v63 = vld [vmem:[#allocation2 + $0x20] sm:$0xff] }
  0x29   :  { %3680 = vmatpush3.bf16.msra.mxu0 %v4772_v21  ;;  %8169 = vst [vmem:[#allocation25_spill] sm:$0xff] %v4950_v61  ;;  %v4957_v62 = vld [vmem:[%s7679_s1 + $0x138] sm:$0xff]   ;;  %8171 = vst [vmem:[#allocation27_spill] sm:$0xff] %v4959_v63  ;;  %v4961_v33 = vld [vmem:[#allocation2 + $0x50] sm:$0xff] }
  0x2a   :  { %3681 = vmatprep.subr.bf16.mxu0 %v4790_v24  ;;  %8170 = vst [vmem:[#allocation26_spill] sm:$0xff] %v4957_v62  ;;  %8172 = vst [vmem:[#allocation28_spill] sm:$0xff] %v4961_v33  ;;  %v4971_v41 = vld [vmem:[%s7681_s3 + $0x4] ss:$24 sps:$4 sm:$0xff]   ;;  %v5024_v57 = vld [vmem:[%s7681_s3 + $0x60] ss:$24 sps:$4 sm:$0xff]  }
  0x2b   :  { %3702 = vmatpush3.bf16.msra.mxu1 %v4784_v23  ;;  %8181 = vst [vmem:[#allocation37_spill] sm:$0xff] %v5024_v57  ;;  %v5053_v55 = vld [vmem:[%s7681_s3 + $0x9c] ss:$24 sps:$4 sm:$0xff]  }
  0x2c   :  { %3703 = vmatprep.subr.bf16.mxu1 %v4802_v26  ;;  %8186 = vst [vmem:[#allocation42_spill] sm:$0xff] %v5053_v55 }
  0x2d   :  { %3682 = vmatpush3.bf16.msra.mxu0 %v4796_v25 }
  0x2e   :  { %3683 = vmatprep.subr.bf16.mxu0 %v4814_v28 }
  0x2f   :  { %3704 = vmatpush3.bf16.msra.mxu1 %v4808_v27 }
  0x30   :  { %3705 = vmatprep.subr.bf16.mxu1 %v4826_v30 }
  0x31   :  { %3684 = vmatpush3.bf16.msra.mxu0 %v4820_v29 }
  0x32   :  { %3713 = vmatprep.subr.bf16.mxu0 %v4851_v38 }
  0x33   :  { %3706 = vmatpush3.bf16.msra.mxu1 %v4839_v34 }
  0x34   :  { %525 = vmatmul.mubr.bf16.vlgmr.msra.gmra.mrb[0].mxu0 %v194_v37  ;;  %v198_v37 = vpack.c.bf16 %v4961_v33, %v4959_v63  ;;  %905 = vmatprep.subr.bf16.mxu1 %v4971_v41  ;;  %v5029_v33 = vld [vmem:[%s7681_s3 + $0x6c] ss:$24 sps:$4 sm:$0xff]   ;;  %v5048_v63 = vld [vmem:[%s7681_s3 + $0x90] ss:$24 sps:$4 sm:$0xff]  }
  0x35   :  { %3714 = vmatpush3.bf16.msra.mxu0 %v4862_v42  ;;  %606 = vmatprep.mubr.bf16.mxu0 %v199_v59  ;;  %v4981_v59 = vld [vmem:[%s7681_s3 + $0xc] ss:$24 sps:$4 sm:$0xff]   ;;  %8182 = vst [vmem:[#allocation38_spill] sm:$0xff] %v5029_v33  ;;  %8185 = vst [vmem:[#allocation41_spill] sm:$0xff] %v5048_v63 }
  0x36   :  { %566 = vmatmul.mubr.bf16.vlgmr.msra.gmra.mrb[0].mxu1 %v196_v45  ;;  %3715 = vmatprep.subr.bf16.mxu0 %v4875_v46  ;;  %v4976_v45 = vld [vmem:[%s7681_s3] ss:$24 sps:$4 sm:$0xff]   ;;  %8174 = vst [vmem:[#allocation30_spill] sm:$0xff] %v4981_v59 }
  0x37   :  { %8173 = vst [vmem:[#allocation29_spill] sm:$0xff] %v4976_v45  ;;  %906 = vmatpush1.bf16.msra.mxu1 %v4976_v45 }
  0x39   :  { %3716 = vmatpush3.bf16.msra.mxu0 %v4880_v47 }
  0x3a   :  { %3717 = vmatprep.subr.bf16.mxu0 %v4886_v48 }
  0x3d   :  { %3718 = vmatpush3.bf16.msra.mxu0 %v4892_v49 }
  0x3e   :  { %3719 = vmatprep.subr.bf16.mxu0 %v4898_v50 }
  0x41   :  { %3720 = vmatpush3.bf16.msra.mxu0 %v4904_v51 }
  0x42   :  { %3721 = vmatprep.subr.bf16.mxu0 %v4910_v52 }
  0x45   :  { %3722 = vmatpush3.bf16.msra.mxu0 %v4916_v53  ;;  %v5094_v53 = vld [vmem:[%s7681_s3 + $0xfc] ss:$24 sps:$4 sm:$0xff]  }
  0x46   :  { %3723 = vmatprep.subr.bf16.mxu0 %v4922_v54  ;;  %v5087_v54 = vld [vmem:[%s7681_s3 + $0xf4] ss:$24 sps:$4 sm:$0xff]   ;;  %8193 = vst [vmem:[#allocation49_spill] sm:$0xff] %v5094_v53 }
  0x47   :  { %8192 = vst [vmem:[#allocation48_spill] sm:$0xff] %v5087_v54 }
  0x49   :  { %3724 = vmatpush3.bf16.msra.mxu0 %v4929_v56  ;;  %v5076_v56 = vld [vmem:[%s7681_s3 + $0xcc] ss:$24 sps:$4 sm:$0xff]  }
  0x4a   :  { %3725 = vmatprep.subr.bf16.mxu0 %v4936_v58  ;;  %v5071_v58 = vld [vmem:[%s7681_s3 + $0xc0] ss:$24 sps:$4 sm:$0xff]   ;;  %8190 = vst [vmem:[#allocation46_spill] sm:$0xff] %v5076_v56 }
  0x4b   :  { %8189 = vst [vmem:[#allocation45_spill] sm:$0xff] %v5071_v58 }
  0x4d   :  { %3726 = vmatpush3.bf16.msra.mxu0 %v4945_v60  ;;  %v5005_v60 = vld [vmem:[%s7681_s3 + $0x3c] ss:$24 sps:$4 sm:$0xff]  }
  0x4e   :  { %3727 = vmatprep.subr.bf16.mxu0 %v4950_v61  ;;  %v5000_v61 = vld [vmem:[%s7681_s3 + $0x30] ss:$24 sps:$4 sm:$0xff]   ;;  %8178 = vst [vmem:[#allocation34_spill] sm:$0xff] %v5005_v60 }
  0x4f   :  { %8177 = vst [vmem:[#allocation33_spill] sm:$0xff] %v5000_v61 }
  0x51   :  { %3728 = vmatpush3.bf16.msra.mxu0 %v4957_v62  ;;  %v4995_v62 = vld [vmem:[%s7681_s3 + $0x34] ss:$24 sps:$4 sm:$0xff]  }
  0x52   :  { %948 = vmatprep.subr.bf16.mxu0 %v4981_v59  ;;  %8176 = vst [vmem:[#allocation32_spill] sm:$0xff] %v4995_v62  ;;  %907 = vmatprep.subr.bf16.mxu1 %v4995_v62  ;;  %v5019_v59 = vld [vmem:[%s7681_s3 + $0x64] ss:$24 sps:$4 sm:$0xff]  }
  0x53   :  { %908 = vmatpush1.bf16.msra.mxu1 %v5000_v61  ;;  %8180 = vst [vmem:[#allocation36_spill] sm:$0xff] %v5019_v59 }
  0x54   :  { %607 = vmatmul.mubr.bf16.vlgmr.msra.gmra.mrb[4].mxu0 %v198_v37  ;;  %v4987_v37 = vld [vmem:[%s7681_s3 + $0x8] ss:$24 sps:$4 sm:$0xff]   ;;  %909 = vmatprep.subr.bf16.mxu1 %v5019_v59 }
  0x55   :  { %8175 = vst [vmem:[#allocation31_spill] sm:$0xff] %v4987_v37  ;;  %949 = vmatpush1.bf16.msra.mxu0 %v4987_v37  ;;  %v5011_v37 = vld [vmem:[%s7681_s3 + $0x38] ss:$24 sps:$4 sm:$0xff]  }
  0x56   :  { %8179 = vst [vmem:[#allocation35_spill] sm:$0xff] %v5011_v37  ;;  %950 = vmatprep.subr.bf16.mxu0 %v5005_v60  ;;  %v5043_v60 = vld [vmem:[%s7681_s3 + $0x94] ss:$24 sps:$4 sm:$0xff]  }
  0x57   :  { %910 = vmatpush1.bf16.msra.mxu1 %v5024_v57  ;;  %8184 = vst [vmem:[#allocation40_spill] sm:$0xff] %v5043_v60 }
  0x58   :  { %911 = vmatprep.subr.bf16.mxu1 %v5043_v60 }
  0x59   :  { %951 = vmatpush1.bf16.msra.mxu0 %v5011_v37  ;;  %v5035_v37 = vld [vmem:[%s7681_s3 + $0x68] ss:$24 sps:$4 sm:$0xff]  }
  0x5a   :  { %8183 = vst [vmem:[#allocation39_spill] sm:$0xff] %v5035_v37  ;;  %952 = vmatprep.subr.bf16.mxu0 %v5029_v33  ;;  %v5066_v33 = vld [vmem:[%s7681_s3 + $0xc4] ss:$24 sps:$4 sm:$0xff]  }
  0x5b   :  { %912 = vmatpush1.bf16.msra.mxu1 %v5048_v63  ;;  %8188 = vst [vmem:[#allocation44_spill] sm:$0xff] %v5066_v33 }
  0x5c   :  { %913 = vmatprep.subr.bf16.mxu1 %v5066_v33  ;;  %v5112_v33 = vld [vmem:[%s7681_s3 + $0x124] ss:$24 sps:$4 sm:$0xff]  }
  0x5d   :  { %953 = vmatpush1.bf16.msra.mxu0 %v5035_v37  ;;  %v5059_v37 = vld [vmem:[%s7681_s3 + $0x98] ss:$24 sps:$4 sm:$0xff]   ;;  %8196 = vst [vmem:[#allocation52_spill] sm:$0xff] %v5112_v33 }
  0x5e   :  { %8187 = vst [vmem:[#allocation43_spill] sm:$0xff] %v5059_v37  ;;  %954 = vmatprep.subr.bf16.mxu0 %v5053_v55  ;;  %v5082_v55 = vld [vmem:[%s7681_s3 + $0xc8] ss:$24 sps:$4 sm:$0xff]  }
  0x5f   :  { %8191 = vst [vmem:[#allocation47_spill] sm:$0xff] %v5082_v55  ;;  %914 = vmatpush1.bf16.msra.mxu1 %v5071_v58  ;;  %v5118_v58 = vld [vmem:[%s7681_s3 + $0x12c] ss:$24 sps:$4 sm:$0xff]  }
  0x60   :  { %915 = vmatprep.subr.bf16.mxu1 %v5087_v54  ;;  %8197 = vst [vmem:[#allocation53_spill] sm:$0xff] %v5118_v58  ;;  %v5126_v54 = vld [vmem:[%s7681_s3 + $0x120] ss:$24 sps:$4 sm:$0xff]  }
  0x61   :  { %955 = vmatpush1.bf16.msra.mxu0 %v5059_v37  ;;  %v5100_v37 = vld [vmem:[%s7681_s3 + $0xf0] ss:$24 sps:$4 sm:$0xff]   ;;  %8198 = vst [vmem:[#allocation54_spill] sm:$0xff] %v5126_v54 }
  0x62   :  { %956 = vmatprep.subr.bf16.mxu0 %v5076_v56  ;;  %8194 = vst [vmem:[#allocation50_spill] sm:$0xff] %v5100_v37  ;;  %v5107_v56 = vld [vmem:[%s7681_s3 + $0xf8] ss:$24 sps:$4 sm:$0xff]  }
  0x63   :  { %8195 = vst [vmem:[#allocation51_spill] sm:$0xff] %v5107_v56  ;;  %916 = vmatpush1.bf16.msra.mxu1 %v5100_v37  ;;  %v5144_v37 = vld [vmem:[%s7681_s3 + $0x15c] ss:$24 sps:$4 sm:$0xff]  }
  0x64   :  { %917 = vmatprep.subr.bf16.mxu1 %v5112_v33  ;;  %8201 = vst [vmem:[#allocation57_spill] sm:$0xff] %v5144_v37  ;;  %v5162_v33 = vld [vmem:[%s7681_s3 + $0x14] ss:$24 sps:$4 sm:$0xff]  }
  0x65   :  { %957 = vmatpush1.bf16.msra.mxu0 %v5082_v55  ;;  %v7719_v55 = vmov 0   ;;  %8204 = vst [vmem:[#allocation60_spill] sm:$0xff] %v5162_v33 }
  0x66   :  { %958 = vmatprep.subr.bf16.mxu0 %v5094_v53  ;;  %937 = vmatprep.mubr.bf16.mxu1 %v7719_v55  ;;  %v5133_v53 = vld [vmem:[%s7681_s3 + $0x128] ss:$24 sps:$4 sm:$0xff]  }
  0x67   :  { %980 = vmatprep.mubr.bf16.mxu0 %v7719_v55  ;;  %8199 = vst [vmem:[#allocation55_spill] sm:$0xff] %v5133_v53  ;;  %v5138_v55 = vld [vmem:[%s7681_s3 + $0x154] ss:$24 sps:$4 sm:$0xff]   ;;  %918 = vmatpush1.bf16.msra.mxu1 %v5126_v54 }
  0x68   :  { %8200 = vst [vmem:[#allocation56_spill] sm:$0xff] %v5138_v55  ;;  %919 = vmatprep.subr.bf16.mxu1 %v5138_v55  ;;  %v3469_v55 = vld [vmem:[%s7680_s2] ss:$0 sm:$0xff] }
  0x69   :  { %959 = vmatpush1.bf16.msra.mxu0 %v5107_v56  ;;  %v5150_v56 = vld [vmem:[%s7681_s3 + $0x150] ss:$24 sps:$4 sm:$0xff]  }
  0x6a   :  { %960 = vmatprep.subr.bf16.mxu0 %v5118_v58  ;;  %8202 = vst [vmem:[#allocation58_spill] sm:$0xff] %v5150_v56  ;;  %v5157_v58 = vld [vmem:[%s7681_s3 + $0x158] ss:$24 sps:$4 sm:$0xff]  }
  0x6b   :  { %8203 = vst [vmem:[#allocation59_spill] sm:$0xff] %v5157_v58  ;;  %920 = vmatpush1.bf16.msra.mxu1 %v5150_v56 }
  0x6c   :  { %991 = vmatprep.subr.bf16.mxu1 %v5162_v33 }
  0x6d   :  { %961 = vmatpush1.bf16.msra.mxu0 %v5133_v53 }
  0x6e   :  { %962 = vmatprep.subr.bf16.mxu0 %v5144_v37 }
  0x71   :  { %963 = vmatpush1.bf16.msra.mxu0 %v5157_v58 }
  0x72   :  { %3735 = vmatprep.subr.bf16.mxu0 %v4647_v0 }
 0x107   :  { %v3685_v53 = vpop.f32.mrb[0].mxu0 }
 0x108   :  { %v3686_v54 = vpop.f32.mrb[1].mxu0 }
 0x109   :  { %v3687_v52 = vadd.f32 %v3686_v54, %v3685_v53  ;;  %v3688_v63 = vpop.f32.mrb[2].mxu0  ;;  %v3707_v51 = vpop.f32.mrb[0].mxu1 }
 0x10a   :  { %v3689_v60 = vpop.f32.mrb[3].mxu0  ;;  %v3708_v57 = vpop.f32.mrb[1].mxu1 }
 0x10b   :  { %v527_v50 = vadd.f32 %v3687_v52, %v3469_v55  ;;  %v3690_v37 = vadd.f32 %v3689_v60, %v3688_v63  ;;  %v3709_v56 = vadd.f32 %v3708_v57, %v3707_v51  ;;  %v3710_v49 = vpop.f32.mrb[2].mxu1 }
 0x10c   :  { %v3711_v59 = vpop.f32.mrb[3].mxu1 }
 0x10d   :  { %v530_v58 = vadd.f32 %v3690_v37, %v3469_v55  ;;  %v568_v33 = vadd.f32 %v3709_v56, %v527_v50  ;;  %v3712_v48 = vadd.f32 %v3711_v59, %v3710_v49  ;;  %v5193_v59 = vld [vmem:[%s7681_s3 + $0x74] ss:$24 sps:$4 sm:$0xff]  }
 0x10f   :  { %v571_v0 = vadd.f32 %v3712_v48, %v530_v58 }
 0x127   :  { %v3729_v61 = vpop.f32.mrb[4].mxu0 }
 0x128   :  { %v3730_v47 = vpop.f32.mrb[5].mxu0 }
 0x129   :  { %v3731_v62 = vadd.f32 %v3730_v47, %v3729_v61  ;;  %v3732_v46 = vpop.f32.mrb[6].mxu0 }
 0x12a   :  { %v3733_v45 = vpop.f32.mrb[7].mxu0 }
 0x12b   :  { %v609_v42 = vadd.f32 %v3731_v62, %v568_v33  ;;  %v3734_v53 = vadd.f32 %v3733_v45, %v3732_v46  ;;  %v5180_v45 = vld [vmem:[%s7681_s3 + $0x44] ss:$24 sps:$4 sm:$0xff]  }
 0x12d   :  { %v615_v54 = vmul.f32 %v609_v42, %v609_v42  ;;  %v612_v40 = vadd.f32 %v3734_v53, %v571_v0  ;;  %v5201_v0 = vld [vmem:[%s7681_s3 + $0x70] ss:$24 sps:$4 sm:$0xff]   ;;  %v5207_v53 = vld [vmem:[%s7681_s3 + $0xa4] ss:$24 sps:$4 sm:$0xff]  }
 0x12f   :  { %v617_v32 = vmul.f32 %v615_v54, %v609_v42  ;;  %v616_v52 = vmul.f32 %v612_v40, %v612_v40 }
 0x131   :  { %v619_v60 = vmul.f32 0.044715, %v617_v32  ;;  %v618_v63 = vmul.f32 %v616_v52, %v612_v40  ;;  %v5175_v32 = vld [vmem:[%s7681_s3 + $0x10] ss:$24 sps:$4 sm:$0xff]  }
 0x133   :  { %v621_v51 = vadd.f32 %v619_v60, %v609_v42  ;;  %v620_v57 = vmul.f32 0.044715, %v618_v63 }
 0x135   :  { %v623_v55 = vmul.f32 0.7978846, %v621_v51  ;;  %v622_v37 = vadd.f32 %v620_v57, %v612_v40 }
 0x137   :  { %4322 = vtanh.f32 %v623_v55  ;;  %v624_v49 = vmul.f32 0.7978846, %v622_v37 }
 0x139   :  { %4324 = vtanh.f32 %v624_v49 }
 0x141   :  { %v4323_v48 = vpop.eup %4322 }
 0x142   :  { %v627_v50 = vadd.f32 1.0, %v4323_v48 }
 0x143   :  { %v4325_v47 = vpop.eup %4324 }
 0x144   :  { %v628_v56 = vadd.f32 1.0, %v4325_v47  ;;  %v629_v58 = vmul.f32 0.5, %v627_v50 }
 0x146   :  { %v630_v61 = vmul.f32 0.5, %v628_v56  ;;  %v631_v46 = vmul.f32 %v629_v58, %v609_v42  ;;  %v5186_v42 = vld [vmem:[%s7681_s3 + $0x40] ss:$24 sps:$4 sm:$0xff]  }
 0x148   :  { %v632_v62 = vmul.f32 %v630_v61, %v612_v40  ;;  %v8205_v40 = vmov 0  }
 0x14a   :  { %v633_v33 = vpack.c.bf16 %v632_v62, %v631_v46 }
 0x14c   :  { %938 = vmatmul.mubr.bf16.vlgmr.msra.gmra.mrb[4].mxu1 %v633_v33  ;;  %981 = vmatmul.mubr.bf16.vlgmr.msra.gmra.mrb[8].mxu0 %v633_v33 }
 0x14d   :  { %992 = vmatpush1.bf16.msra.mxu1 %v5175_v32  ;;  %1023 = vmatprep.mubr.bf16.mxu1 %v8205_v40 }
 0x14e   :  { %993 = vmatprep.subr.bf16.mxu1 %v5180_v45  ;;  %3736 = vmatpush3.bf16.msra.mxu0 %v4652_v1  ;;  %v5215_v1 = vld [vmem:[%s7681_s3 + $0xa0] ss:$24 sps:$4 sm:$0xff]  }
 0x14f   :  { %3737 = vmatprep.subr.bf16.mxu0 %v4670_v4  ;;  %v5221_v4 = vld [vmem:[%s7681_s3 + $0xd4] ss:$24 sps:$4 sm:$0xff]  }
 0x151   :  { %994 = vmatpush1.bf16.msra.mxu1 %v5186_v42 }
 0x152   :  { %995 = vmatprep.subr.bf16.mxu1 %v5193_v59  ;;  %3738 = vmatpush3.bf16.msra.mxu0 %v4676_v5  ;;  %v5229_v5 = vld [vmem:[%s7681_s3 + $0xd0] ss:$24 sps:$4 sm:$0xff]  }
 0x153   :  { %3739 = vmatprep.subr.bf16.mxu0 %v4694_v8  ;;  %v5235_v8 = vld [vmem:[%s7681_s3 + $0x104] ss:$24 sps:$4 sm:$0xff]  }
 0x155   :  { %996 = vmatpush1.bf16.msra.mxu1 %v5201_v0 }
 0x156   :  { %997 = vmatprep.subr.bf16.mxu1 %v5207_v53  ;;  %3740 = vmatpush3.bf16.msra.mxu0 %v4700_v9  ;;  %v5243_v9 = vld [vmem:[%s7681_s3 + $0x100] ss:$24 sps:$4 sm:$0xff]  }
 0x157   :  { %3741 = vmatprep.subr.bf16.mxu0 %v4718_v12  ;;  %v5249_v12 = vld [vmem:[%s7681_s3 + $0x134] ss:$24 sps:$4 sm:$0xff]  }
 0x159   :  { %998 = vmatpush1.bf16.msra.mxu1 %v5215_v1 }
 0x15a   :  { %999 = vmatprep.subr.bf16.mxu1 %v5221_v4  ;;  %3742 = vmatpush3.bf16.msra.mxu0 %v4724_v13  ;;  %v5257_v13 = vld [vmem:[%s7681_s3 + $0x130] ss:$24 sps:$4 sm:$0xff]  }
 0x15b   :  { %3743 = vmatprep.subr.bf16.mxu0 %v4742_v16  ;;  %8206 = vst [vmem:[#allocation61_spill] sm:$0xff] %v5257_v13  ;;  %v5263_v16 = vld [vmem:[%s7681_s3 + $0x164] ss:$24 sps:$4 sm:$0xff]  }
 0x15c   :  { %8207 = vst [vmem:[#allocation62_spill] sm:$0xff] %v5263_v16 }
 0x15d   :  { %1000 = vmatpush1.bf16.msra.mxu1 %v5229_v5 }
 0x15e   :  { %1001 = vmatprep.subr.bf16.mxu1 %v5235_v8  ;;  %3744 = vmatpush3.bf16.msra.mxu0 %v4748_v17  ;;  %v5271_v17 = vld [vmem:[%s7681_s3 + $0x160] ss:$24 sps:$4 sm:$0xff]  }
 0x15f   :  { %3745 = vmatprep.subr.bf16.mxu0 %v4766_v20  ;;  %8208 = vst [vmem:[#allocation63_spill] sm:$0xff] %v5271_v17 }
 0x161   :  { %1002 = vmatpush1.bf16.msra.mxu1 %v5243_v9 }
 0x162   :  { %1003 = vmatprep.subr.bf16.mxu1 %v5249_v12  ;;  %3746 = vmatpush3.bf16.msra.mxu0 %v4772_v21 }
 0x163   :  { %3747 = vmatprep.subr.bf16.mxu0 %v4790_v24 }
 0x165   :  { %1004 = vmatpush1.bf16.msra.mxu1 %v5257_v13 }
 0x166   :  { %1005 = vmatprep.subr.bf16.mxu1 %v5263_v16  ;;  %3748 = vmatpush3.bf16.msra.mxu0 %v4796_v25 }
 0x167   :  { %3749 = vmatprep.subr.bf16.mxu0 %v4814_v28 }
 0x169   :  { %1006 = vmatpush1.bf16.msra.mxu1 %v5271_v17 }
 0x16a   :  { %3757 = vmatprep.subr.bf16.mxu1 %v4658_v2  ;;  %3750 = vmatpush3.bf16.msra.mxu0 %v4820_v29  ;;  %v635_v2 = vlaneseq }
 0x16b   :  { %3779 = vmatprep.subr.bf16.mxu0 %v4851_v38 }
 0x16c   :  { %1024 = vmatmul.mubr.bf16.vlgmr.msra.gmra.mrb[8].mxu1 %v633_v33 }
 0x16d   :  { %3758 = vmatpush3.bf16.msra.mxu1 %v4664_v3  ;;  %v5296_v3 = vshrl.u32 %v635_v2, 7  ;;  %v8210_v2 = vld [vmem:[#allocation8_spill] sm:$0xff] }
 0x16e   :  { %3759 = vmatprep.subr.bf16.mxu1 %v4682_v6 }
 0x16f   :  { %v637_v6 = vsub.s32 0, %v5296_v3 }
 0x171   :  { %3760 = vmatpush3.bf16.msra.mxu1 %v4688_v7  ;;  %v645_v7 = vsub.s32 2, %v5296_v3 }
 0x172   :  { %3761 = vmatprep.subr.bf16.mxu1 %v4706_v10  ;;  %v5303_v10 = vld [vmem:[%s7682_s4] sm:$0x3f] }
 0x175   :  { %3762 = vmatpush3.bf16.msra.mxu1 %v4712_v11  ;;  %v641_v11 = vsub.s32 1, %v5296_v3 }
 0x176   :  { %3763 = vmatprep.subr.bf16.mxu1 %v4730_v14  ;;  %v649_v14 = vsub.s32 3, %v5296_v3 }
 0x178   :  { %v5317_v20 = vrot.slane %v5303_v10, %v649_v14 }
 0x179   :  { %3764 = vmatpush3.bf16.msra.mxu1 %v4736_v15  ;;  %v5308_v15 = vrot.slane %v5303_v10, %v637_v6  ;;  %v8211_v6 = vld [vmem:[#allocation9_spill] sm:$0xff] }
 0x17a   :  { %3765 = vmatprep.subr.bf16.mxu1 %v4754_v18  ;;  %v5311_v18 = vrot.slane %v5303_v10, %v645_v7 }
 0x17c   :  { %8209 = vst [vmem:[#allocation64_spill] sm:$0xff] %v5311_v18 }
 0x17d   :  { %3766 = vmatpush3.bf16.msra.mxu1 %v4760_v19  ;;  %v5314_v19 = vrot.slane %v5303_v10, %v641_v11 }
 0x17e   :  { %3767 = vmatprep.subr.bf16.mxu1 %v4778_v22 }
 0x181   :  { %3768 = vmatpush3.bf16.msra.mxu1 %v4784_v23 }
 0x182   :  { %3769 = vmatprep.subr.bf16.mxu1 %v4802_v26 }
 0x185   :  { %3770 = vmatpush3.bf16.msra.mxu1 %v4808_v27 }
 0x186   :  { %3771 = vmatprep.subr.bf16.mxu1 %v4826_v30 }
 0x189   :  { %3772 = vmatpush3.bf16.msra.mxu1 %v4839_v34 }
 0x18a   :  { %1235 = vmatprep.subr.bf16.mxu1 %v4971_v41 }
 0x21f   :  { %v939_v21 = vpop.f32.mrb[4].mxu1  ;;  %v982_v22 = vpop.f32.mrb[8].mxu0 }
 0x220   :  { %v940_v23 = vadd.f32 %v939_v21, %v5308_v15  ;;  %v983_v24 = vadd.f32 %v982_v22, %v5311_v18  ;;  %v941_v25 = vpop.f32.mrb[5].mxu1  ;;  %v984_v26 = vpop.f32.mrb[9].mxu0 }
 0x221   :  { %v942_v27 = vadd.f32 %v941_v25, %v5314_v19  ;;  %v985_v28 = vadd.f32 %v984_v26, %v5317_v20  ;;  %v943_v29 = vpop.f32.mrb[6].mxu1  ;;  %v986_v30 = vpop.f32.mrb[10].mxu0  ;;  %v8212_v26 = vld [vmem:[#allocation10_spill] sm:$0xff] }
 0x222   :  { %v1034_v34 = vmul.f32 0.125, %v940_v23  ;;  %v1036_v38 = vmul.f32 0.125, %v983_v24  ;;  %v944_v54 = vadd.f32 %v943_v29, %v5308_v15  ;;  %v987_v52 = vadd.f32 %v986_v30, %v5311_v18  ;;  %v945_v60 = vpop.f32.mrb[7].mxu1  ;;  %v988_v63 = vpop.f32.mrb[11].mxu0  ;;  %v8215_v29 = vld [vmem:[#allocation32_spill] sm:$0xff] }
 0x223   :  { %v1035_v51 = vmul.f32 0.125, %v942_v27  ;;  %v1037_v57 = vmul.f32 0.125, %v985_v28  ;;  %v946_v55 = vadd.f32 %v945_v60, %v5314_v19  ;;  %v989_v37 = vadd.f32 %v988_v63, %v5317_v20  ;;  %v8213_v27 = vld [vmem:[#allocation29_spill] sm:$0xff]  ;;  %v8214_v28 = vld [vmem:[#allocation11_spill] sm:$0xff]  ;;  %v8216_v30 = vld [vmem:[#allocation12_spill] sm:$0xff] }
 0x224   :  { %v1040_v49 = vmul.f32 0.125, %v944_v54  ;;  %v1042_v48 = vmul.f32 0.125, %v987_v52  ;;  %v5334_v61 = vadd.f32 %v1034_v34, %v4841_v35  ;;  %v5337_v46 = vadd.f32 %v1036_v38, %v4865_v43  ;;  %v8217_v34 = vld [vmem:[#allocation33_spill] sm:$0xff]  ;;  %v8219_v54 = vld [vmem:[#allocation36_spill] sm:$0xff]  ;;  %v8220_v52 = vld [vmem:[#allocation14_spill] sm:$0xff] }
 0x225   :  { %v5328_v50 = vadd.f32 %v1035_v51, %v4829_v31  ;;  %v5331_v47 = vadd.f32 %v1037_v57, %v4853_v39  ;;  %v1041_v56 = vmul.f32 0.125, %v946_v55  ;;  %v1043_v58 = vmul.f32 0.125, %v989_v37  ;;  %v8218_v38 = vld [vmem:[#allocation13_spill] sm:$0xff]  ;;  %v8222_v63 = vld [vmem:[#allocation15_spill] sm:$0xff]  ;;  %v8223_v57 = vld [vmem:[#allocation40_spill] sm:$0xff] }
 0x226   :  { %v5340_v62 = vadd.f32 %v1040_v49, %v4843_v36  ;;  %v5343_v33 = vadd.f32 %v1042_v48, %v4867_v44  ;;  %v7774_v44 = vclamps-f32 %v5334_v61, 1.0  ;;  %v7773_v21 = vclamps-f32 %v5337_v46, 1.0  ;;  %v8221_v60 = vld [vmem:[#allocation37_spill] sm:$0xff]  ;;  %v8224_v37 = vld [vmem:[#allocation16_spill] sm:$0xff] }
 0x227   :  { %v5346_v31 = vadd.f32 %v1041_v56, %v8210_v2  ;;  %v5349_v39 = vadd.f32 %v1043_v58, %v8211_v6  ;;  %v7778_v11 = vclamps-f32 %v5328_v50, 1.0  ;;  %v7777_v43 = vclamps-f32 %v5331_v47, 1.0  ;;  %v8225_v49 = vld [vmem:[#allocation41_spill] sm:$0xff]  ;;  %v8228_v58 = vld [vmem:[#allocation44_spill] sm:$0xff] }
 0x228   :  { %v7770_v7 = vclamps-f32 %v5340_v62, 1.0  ;;  %v7769_v35 = vclamps-f32 %v5343_v33, 1.0  ;;  %v653_v51 = vsub.s32 4, %v5296_v3  ;;  %v657_v55 = vsub.s32 5, %v5296_v3  ;;  %v8226_v48 = vld [vmem:[#allocation17_spill] sm:$0xff] }
 0x229   :  { %v7768_v36 = vclamps-f32 %v5346_v31, 1.0  ;;  %v7767_v14 = vclamps-f32 %v5349_v39, 1.0 }
 0x22a   :  { %v1083_v24 = vpack.c.bf16 %v7770_v7, %v7774_v44  ;;  %v1085_v25 = vpack.c.bf16 %v7769_v35, %v7773_v21  ;;  %v5394_v56 = vrot.slane %v5303_v10, %v653_v51  ;;  %v5398_v2 = vrot.slane %v5303_v10, %v657_v55  ;;  %v8234_v55 = vld [vmem:[#allocation21_spill] sm:$0xff]  ;;  %v8258_v21 = vld [vmem:[#allocation39_spill] sm:$0xff]  ;;  %v8259_v44 = vld [vmem:[#allocation42_spill] sm:$0xff] }
 0x22b   :  { %v1084_v22 = vpack.c.bf16 %v7768_v36, %v7778_v11  ;;  %v1086_v23 = vpack.c.bf16 %v7767_v14, %v7777_v43  ;;  %v8248_v7 = vld [vmem:[#allocation25_spill] sm:$0xff]  ;;  %v8268_v43 = vld [vmem:[#allocation59_spill] sm:$0xff]  ;;  %v5463_v11 = vld [vmem:[%s7679_s1 + $0x40] sm:$0xff]  }
 0x22c   :  { %8227 = vst [vmem:[#allocation8_spill] sm:$0xff] %v5394_v56  ;;  %8229 = vst [vmem:[#allocation9_spill] sm:$0xff] %v5398_v2 }
 0x22d   :  { %1125 = vmatprep.mubr.bf16.mxu0 %v1084_v22  ;;  %1166 = vmatprep.mubr.bf16.mxu1 %v1086_v23  ;;  %v8230_v22 = vld [vmem:[#allocation18_spill] sm:$0xff]  ;;  %v8231_v23 = vld [vmem:[#allocation45_spill] sm:$0xff]  ;;  %8269 = vst [vmem:[#allocation12_spill] sm:$0xff] %v5463_v11 }
 0x22e   :  { %1126 = vmatmul.mubr.bf16.vlgmr.msra.gmra.mrb[12].mxu0 %v1083_v24  ;;  %1167 = vmatmul.mubr.bf16.vlgmr.msra.gmra.mrb[12].mxu1 %v1085_v25  ;;  %v8232_v25 = vld [vmem:[#allocation19_spill] sm:$0xff] }
 0x22f   :  { %3780 = vmatpush3.bf16.msra.mxu0 %v8212_v26  ;;  %1236 = vmatpush1.bf16.msra.mxu1 %v8213_v27  ;;  %v8233_v26 = vld [vmem:[#allocation48_spill] sm:$0xff] }
 0x230   :  { %3781 = vmatprep.subr.bf16.mxu0 %v8214_v28  ;;  %1237 = vmatprep.subr.bf16.mxu1 %v8215_v29 }
 0x231   :  { %1267 = vmatprep.mubr.bf16.mxu1 %v8205_v40 }
 0x233   :  { %3782 = vmatpush3.bf16.msra.mxu0 %v8216_v30  ;;  %1238 = vmatpush1.bf16.msra.mxu1 %v8217_v34 }
 0x234   :  { %3783 = vmatprep.subr.bf16.mxu0 %v8218_v38  ;;  %1239 = vmatprep.subr.bf16.mxu1 %v8219_v54 }
 0x237   :  { %3784 = vmatpush3.bf16.msra.mxu0 %v8220_v52  ;;  %1240 = vmatpush1.bf16.msra.mxu1 %v8221_v60 }
 0x238   :  { %3785 = vmatprep.subr.bf16.mxu0 %v8222_v63  ;;  %1241 = vmatprep.subr.bf16.mxu1 %v8223_v57 }
 0x23b   :  { %3786 = vmatpush3.bf16.msra.mxu0 %v8224_v37  ;;  %1242 = vmatpush1.bf16.msra.mxu1 %v8225_v49  ;;  %v8235_v37 = vld [vmem:[#allocation50_spill] sm:$0xff] }
 0x23c   :  { %3787 = vmatprep.subr.bf16.mxu0 %v8226_v48  ;;  %1243 = vmatprep.subr.bf16.mxu1 %v8228_v58 }
 0x23f   :  { %v1025_v6 = vpop.f32.mrb[8].mxu1  ;;  %3788 = vmatpush3.bf16.msra.mxu0 %v8230_v22  ;;  %1244 = vmatpush1.bf16.msra.mxu1 %v8231_v23  ;;  %v8237_v22 = vld [vmem:[#allocation52_spill] sm:$0xff] }
 0x240   :  { %v1026_v3 = vadd.f32 %v1025_v6, %v5394_v56  ;;  %v1027_v24 = vpop.f32.mrb[9].mxu1  ;;  %3789 = vmatprep.subr.bf16.mxu0 %v8232_v25  ;;  %1245 = vmatprep.subr.bf16.mxu1 %v8233_v26  ;;  %v8236_v6 = vld [vmem:[#allocation23_spill] sm:$0xff]  ;;  %v8238_v25 = vld [vmem:[#allocation20_spill] sm:$0xff] }
 0x241   :  { %v1028_v28 = vadd.f32 %v1027_v24, %v5398_v2  ;;  %v1029_v30 = vpop.f32.mrb[10].mxu1 }
 0x242   :  { %v1038_v38 = vmul.f32 0.125, %v1026_v3  ;;  %v1030_v52 = vadd.f32 %v1029_v30, %v5394_v56  ;;  %v1031_v10 = vpop.f32.mrb[11].mxu1  ;;  %v8240_v3 = vld [vmem:[#allocation27_spill] sm:$0xff]  ;;  %v8242_v30 = vld [vmem:[#allocation28_spill] sm:$0xff] }
 0x243   :  { %v1039_v63 = vmul.f32 0.125, %v1028_v28  ;;  %v1032_v51 = vadd.f32 %v1031_v10, %v5398_v2  ;;  %3790 = vmatpush3.bf16.msra.mxu0 %v8234_v55  ;;  %1246 = vmatpush1.bf16.msra.mxu1 %v8235_v37  ;;  %v8244_v10 = vld [vmem:[#allocation22_spill] sm:$0xff]  ;;  %v8246_v55 = vld [vmem:[#allocation24_spill] sm:$0xff] }
 0x244   :  { %v1044_v48 = vmul.f32 0.125, %v1030_v52  ;;  %3791 = vmatprep.subr.bf16.mxu0 %v8236_v6  ;;  %1247 = vmatprep.subr.bf16.mxu1 %v8237_v22  ;;  %v5416_v36 = vadd.f32 %v1038_v38, %v8240_v3  ;;  %v8247_v52 = vld [vmem:[#allocation54_spill] sm:$0xff] }
 0x245   :  { %v5413_v14 = vadd.f32 %v1039_v63, %v8238_v25  ;;  %v1045_v24 = vmul.f32 0.125, %v1032_v51  ;;  %v8249_v63 = vld [vmem:[#allocation56_spill] sm:$0xff]  ;;  %v8250_v25 = vld [vmem:[#allocation26_spill] sm:$0xff] }
 0x246   :  { %8241 = vst [vmem:[#allocation29_spill] sm:$0xff] %v5416_v36  ;;  %v5419_v28 = vadd.f32 %v1044_v48, %v8242_v30  ;;  %v7776_v48 = vclamps-f32 %v5416_v36, 1.0  ;;  %v8251_v3 = vld [vmem:[#allocation58_spill] sm:$0xff] }
 0x247   :  { %8239 = vst [vmem:[#allocation10_spill] sm:$0xff] %v5413_v14  ;;  %v5422_v35 = vadd.f32 %v1045_v24, %v8244_v10  ;;  %3792 = vmatpush3.bf16.msra.mxu0 %v8246_v55  ;;  %1248 = vmatpush1.bf16.msra.mxu1 %v8247_v52  ;;  %v7772_v51 = vclamps-f32 %v5413_v14, 1.0  ;;  %v8252_v30 = vld [vmem:[#allocation30_spill] sm:$0xff]  ;;  %v8253_v10 = vld [vmem:[#allocation60_spill] sm:$0xff]  ;;  %v8254_v55 = vld [vmem:[#allocation31_spill] sm:$0xff] }
 0x248   :  { %8243 = vst [vmem:[#allocation11_spill] sm:$0xff] %v5419_v28  ;;  %v7775_v6 = vclamps-f32 %v5419_v28, 1.0  ;;  %3793 = vmatprep.subr.bf16.mxu0 %v8248_v7  ;;  %1249 = vmatprep.subr.bf16.mxu1 %v8249_v63 }
 0x249   :  { %8245 = vst [vmem:[#allocation32_spill] sm:$0xff] %v5422_v35  ;;  %v7771_v38 = vclamps-f32 %v5422_v35, 1.0 }
 0x24a   :  { %v1087_v7 = vpack.c.bf16 %v7775_v6, %v7776_v48  ;;  %v8260_v6 = vld [vmem:[#allocation43_spill] sm:$0xff]  ;;  %v8265_v48 = vld [vmem:[#allocation53_spill] sm:$0xff] }
 0x24b   :  { %3794 = vmatpush3.bf16.msra.mxu0 %v8250_v25  ;;  %v1088_v24 = vpack.c.bf16 %v7771_v38, %v7772_v51  ;;  %1250 = vmatpush1.bf16.msra.mxu1 %v8251_v3  ;;  %v8255_v25 = vld [vmem:[#allocation34_spill] sm:$0xff]  ;;  %v8256_v38 = vld [vmem:[#allocation35_spill] sm:$0xff] }
 0x24c   :  { %1278 = vmatprep.subr.bf16.mxu0 %v8252_v30  ;;  %1321 = vmatprep.subr.bf16.mxu1 %v8253_v10  ;;  %v8257_v51 = vld [vmem:[#allocation38_spill] sm:$0xff] }
 0x24d   :  { %1207 = vmatprep.mubr.bf16.mxu0 %v1088_v24  ;;  %v8261_v30 = vld [vmem:[#allocation46_spill] sm:$0xff]  ;;  %v8262_v24 = vld [vmem:[#allocation47_spill] sm:$0xff] }
 0x24e   :  { %1208 = vmatmul.mubr.bf16.vlgmr.msra.gmra.mrb[16].mxu0 %v1087_v7  ;;  %v8263_v7 = vld [vmem:[#allocation49_spill] sm:$0xff] }
 0x24f   :  { %1279 = vmatpush1.bf16.msra.mxu0 %v8254_v55  ;;  %1310 = vmatprep.mubr.bf16.mxu0 %v8205_v40  ;;  %v8264_v55 = vld [vmem:[#allocation51_spill] sm:$0xff] }
 0x250   :  { %1280 = vmatprep.subr.bf16.mxu0 %v8255_v25  ;;  %v8266_v25 = vld [vmem:[#allocation55_spill] sm:$0xff] }
 0x253   :  { %1281 = vmatpush1.bf16.msra.mxu0 %v8256_v38  ;;  %v8267_v38 = vld [vmem:[#allocation57_spill] sm:$0xff] }
 0x254   :  { %1282 = vmatprep.subr.bf16.mxu0 %v8257_v51 }
 0x257   :  { %1283 = vmatpush1.bf16.msra.mxu0 %v8258_v21 }
 0x258   :  { %1284 = vmatprep.subr.bf16.mxu0 %v8259_v44 }
 0x25b   :  { %1285 = vmatpush1.bf16.msra.mxu0 %v8260_v6 }
 0x25c   :  { %1286 = vmatprep.subr.bf16.mxu0 %v8261_v30 }
 0x25f   :  { %1287 = vmatpush1.bf16.msra.mxu0 %v8262_v24 }
 0x260   :  { %1288 = vmatprep.subr.bf16.mxu0 %v8263_v7 }
 0x263   :  { %1289 = vmatpush1.bf16.msra.mxu0 %v8264_v55  ;;  %v3578_v55 = vld [vmem:[%s7680_s2 + $0x1] ss:$0 sm:$0xff] }
 0x264   :  { %1290 = vmatprep.subr.bf16.mxu0 %v8265_v48 }
 0x267   :  { %1291 = vmatpush1.bf16.msra.mxu0 %v8266_v25 }
 0x268   :  { %1292 = vmatprep.subr.bf16.mxu0 %v8267_v38 }
 0x26b   :  { %1293 = vmatpush1.bf16.msra.mxu0 %v8268_v43 }
 0x26c   :  { %3801 = vmatprep.subr.bf16.mxu0 %v5463_v11 }
 0x301   :  { %v3751_v24 = vpop.f32.mrb[12].mxu0  ;;  %v3773_v30 = vpop.f32.mrb[12].mxu1 }
 0x302   :  { %v3752_v48 = vpop.f32.mrb[13].mxu0  ;;  %v3774_v7 = vpop.f32.mrb[13].mxu1 }
 0x303   :  { %v3753_v25 = vadd.f32 %v3752_v48, %v3751_v24  ;;  %v3775_v6 = vadd.f32 %v3774_v7, %v3773_v30  ;;  %v3754_v38 = vpop.f32.mrb[14].mxu0  ;;  %v3776_v44 = vpop.f32.mrb[14].mxu1 }
 0x304   :  { %v3755_v43 = vpop.f32.mrb[15].mxu0  ;;  %v3777_v21 = vpop.f32.mrb[15].mxu1 }
 0x305   :  { %v1128_v51 = vadd.f32 %v3753_v25, %v3578_v55  ;;  %v3756_v10 = vadd.f32 %v3755_v43, %v3754_v38  ;;  %v3778_v3 = vadd.f32 %v3777_v21, %v3776_v44  ;;  %v5537_v38 = vld [vmem:[%s7679_s1 + $0x68] sm:$0xff]  }
 0x307   :  { %v1169_v63 = vadd.f32 %v3775_v6, %v1128_v51  ;;  %v1131_v52 = vadd.f32 %v3756_v10, %v3578_v55  ;;  %v5523_v10 = vld [vmem:[%s7679_s1 + $0x60] sm:$0xff]  }
 0x308   :  { %v5531_v55 = vld [vmem:[%s7679_s1 + $0x20] sm:$0xff]  }
 0x309   :  { %v1172_v11 = vadd.f32 %v3778_v3, %v1131_v52  ;;  %v5517_v3 = vld [vmem:[%s7679_s1 + $0x18] sm:$0xff]  }
 0x321   :  { %v3795_v35 = vpop.f32.mrb[16].mxu0 }
 0x322   :  { %v3796_v28 = vpop.f32.mrb[17].mxu0 }
 0x323   :  { %v3797_v36 = vadd.f32 %v3796_v28, %v3795_v35  ;;  %v3798_v14 = vpop.f32.mrb[18].mxu0 }
 0x324   :  { %v3799_v22 = vpop.f32.mrb[19].mxu0 }
 0x325   :  { %v1210_v37 = vadd.f32 %v3797_v36, %v1169_v63  ;;  %v3800_v2 = vadd.f32 %v3799_v22, %v3798_v14  ;;  %v5509_v63 = vld [vmem:[%s7679_s1 + $0x58] sm:$0xff]  }
 0x327   :  { %v1216_v26 = vmul.f32 %v1210_v37, %v1210_v37  ;;  %v1213_v48 = vadd.f32 %v3800_v2, %v1172_v11  ;;  %v5481_v2 = vld [vmem:[%s7679_s1 + $0x48] sm:$0xff]  }
 0x329   :  { %v1218_v30 = vmul.f32 %v1216_v26, %v1210_v37  ;;  %v1217_v24 = vmul.f32 %v1213_v48, %v1213_v48  ;;  %v5495_v26 = vld [vmem:[%s7679_s1 + $0x50] sm:$0xff]  }
 0x32b   :  { %v1220_v7 = vmul.f32 0.044715, %v1218_v30  ;;  %v1219_v56 = vmul.f32 %v1217_v24, %v1213_v48  ;;  %v5551_v30 = vld [vmem:[%s7679_s1 + $0x70] sm:$0xff]  }
 0x32c   :  { %8270 = vst [vmem:[#allocation33_spill] sm:$0xff] %v5551_v30  ;;  %v5559_v24 = vld [vmem:[%s7679_s1 + $0x30] sm:$0xff]  }
 0x32d   :  { %v1222_v23 = vadd.f32 %v1220_v7, %v1210_v37  ;;  %v1221_v25 = vmul.f32 0.044715, %v1219_v56  ;;  %v5475_v56 = vld [vmem:[%s7679_s1] sm:$0xff]   ;;  %8271 = vst [vmem:[#allocation13_spill] sm:$0xff] %v5559_v24  ;;  %v5565_v7 = vld [vmem:[%s7679_s1 + $0x78] sm:$0xff]  }
 0x32e   :  { %8272 = vst [vmem:[#allocation36_spill] sm:$0xff] %v5565_v7 }
 0x32f   :  { %v1224_v43 = vmul.f32 0.7978846, %v1222_v23  ;;  %v1223_v44 = vadd.f32 %v1221_v25, %v1213_v48  ;;  %v5489_v23 = vld [vmem:[%s7679_s1 + $0x8] sm:$0xff]   ;;  %v5572_v25 = vld [vmem:[%s7679_s1 + $0xc0] sm:$0xff]  }
 0x330   :  { %8273 = vst [vmem:[#allocation14_spill] sm:$0xff] %v5572_v25 }
 0x331   :  { %4326 = vtanh.f32 %v1224_v43  ;;  %v1225_v21 = vmul.f32 0.7978846, %v1223_v44  ;;  %v5578_v43 = vld [vmem:[%s7679_s1 + $0x38] sm:$0xff]   ;;  %v5584_v44 = vld [vmem:[%s7679_s1 + $0x140] sm:$0xff]  }
 0x332   :  { %8274 = vst [vmem:[#allocation37_spill] sm:$0xff] %v5578_v43  ;;  %8275 = vst [vmem:[#allocation15_spill] sm:$0xff] %v5584_v44 }
 0x333   :  { %4328 = vtanh.f32 %v1225_v21  ;;  %v5590_v21 = vld [vmem:[%s7679_s1 + $0x80] sm:$0xff]  }
 0x334   :  { %8276 = vst [vmem:[#allocation40_spill] sm:$0xff] %v5590_v21 }
 0x33b   :  { %v4327_v52 = vpop.eup %4326 }
 0x33c   :  { %v1228_v6 = vadd.f32 1.0, %v4327_v52  ;;  %v5596_v52 = vld [vmem:[%s7679_s1 + $0xc8] sm:$0xff]  }
 0x33d   :  { %v4329_v35 = vpop.eup %4328  ;;  %8277 = vst [vmem:[#allocation16_spill] sm:$0xff] %v5596_v52 }
 0x33e   :  { %v1229_v28 = vadd.f32 1.0, %v4329_v35  ;;  %v1230_v51 = vmul.f32 0.5, %v1228_v6  ;;  %v5602_v6 = vld [vmem:[%s7679_s1 + $0x88] sm:$0xff]   ;;  %v5608_v35 = vld [vmem:[%s7679_s1 + $0xd0] sm:$0xff]  }
 0x33f   :  { %8278 = vst [vmem:[#allocation41_spill] sm:$0xff] %v5602_v6  ;;  %8279 = vst [vmem:[#allocation17_spill] sm:$0xff] %v5608_v35 }
 0x340   :  { %v1231_v36 = vmul.f32 0.5, %v1229_v28  ;;  %v1232_v14 = vmul.f32 %v1230_v51, %v1210_v37  ;;  %v5503_v37 = vld [vmem:[%s7679_s1 + $0x10] sm:$0xff]   ;;  %v5620_v51 = vld [vmem:[%s7679_s1 + $0xd8] sm:$0xff]  }
 0x341   :  { %v5614_v28 = vld [vmem:[%s7679_s1 + $0x90] sm:$0xff]   ;;  %8281 = vst [vmem:[#allocation18_spill] sm:$0xff] %v5620_v51 }
 0x342   :  { %v1233_v22 = vmul.f32 %v1231_v36, %v1213_v48  ;;  %v5545_v48 = vld [vmem:[%s7679_s1 + $0x28] sm:$0xff]   ;;  %8280 = vst [vmem:[#allocation44_spill] sm:$0xff] %v5614_v28  ;;  %v5626_v36 = vld [vmem:[%s7679_s1 + $0x98] sm:$0xff]  }
 0x343   :  { %8282 = vst [vmem:[#allocation19_spill] sm:$0xff] %v5626_v36 }
 0x344   :  { %v1234_v11 = vpack.c.bf16 %v1233_v22, %v1232_v14  ;;  %v5632_v14 = vld [vmem:[%s7679_s1 + $0xe0] sm:$0xff]  }
 0x345   :  { %8283 = vst [vmem:[#allocation21_spill] sm:$0xff] %v5632_v14  ;;  %v5638_v22 = vld [vmem:[%s7679_s1 + $0xa0] sm:$0xff]  }
 0x346   :  { %1268 = vmatmul.mubr.bf16.vlgmr.msra.gmra.mrb[16].mxu1 %v1234_v11  ;;  %1311 = vmatmul.mubr.bf16.vlgmr.msra.gmra.mrb[20].mxu0 %v1234_v11  ;;  %8284 = vst [vmem:[#allocation23_spill] sm:$0xff] %v5638_v22 }
 0x347   :  { %1322 = vmatpush1.bf16.msra.mxu1 %v5175_v32  ;;  %1353 = vmatprep.mubr.bf16.mxu1 %v8205_v40 }
 0x348   :  { %1323 = vmatprep.subr.bf16.mxu1 %v5180_v45  ;;  %3802 = vmatpush3.bf16.msra.mxu0 %v5475_v56 }
 0x349   :  { %3803 = vmatprep.subr.bf16.mxu0 %v5481_v2 }
 0x34b   :  { %1324 = vmatpush1.bf16.msra.mxu1 %v5186_v42 }
 0x34c   :  { %1325 = vmatprep.subr.bf16.mxu1 %v5193_v59  ;;  %3804 = vmatpush3.bf16.msra.mxu0 %v5489_v23 }
 0x34d   :  { %3805 = vmatprep.subr.bf16.mxu0 %v5495_v26 }
 0x34f   :  { %1326 = vmatpush1.bf16.msra.mxu1 %v5201_v0 }
 0x350   :  { %1327 = vmatprep.subr.bf16.mxu1 %v5207_v53  ;;  %3806 = vmatpush3.bf16.msra.mxu0 %v5503_v37 }
 0x351   :  { %3807 = vmatprep.subr.bf16.mxu0 %v5509_v63 }
 0x353   :  { %1328 = vmatpush1.bf16.msra.mxu1 %v5215_v1 }
 0x354   :  { %1329 = vmatprep.subr.bf16.mxu1 %v5221_v4  ;;  %3808 = vmatpush3.bf16.msra.mxu0 %v5517_v3 }
 0x355   :  { %3809 = vmatprep.subr.bf16.mxu0 %v5523_v10 }
 0x357   :  { %1330 = vmatpush1.bf16.msra.mxu1 %v5229_v5 }
 0x358   :  { %1331 = vmatprep.subr.bf16.mxu1 %v5235_v8  ;;  %3810 = vmatpush3.bf16.msra.mxu0 %v5531_v55 }
 0x359   :  { %3811 = vmatprep.subr.bf16.mxu0 %v5537_v38 }
 0x35b   :  { %1332 = vmatpush1.bf16.msra.mxu1 %v5243_v9 }
 0x35c   :  { %1333 = vmatprep.subr.bf16.mxu1 %v5249_v12  ;;  %3812 = vmatpush3.bf16.msra.mxu0 %v5545_v48 }
 0x35d   :  { %3813 = vmatprep.subr.bf16.mxu0 %v5551_v30 }
 0x35f   :  { %1334 = vmatpush1.bf16.msra.mxu1 %v5257_v13 }
 0x360   :  { %1335 = vmatprep.subr.bf16.mxu1 %v5263_v16  ;;  %3814 = vmatpush3.bf16.msra.mxu0 %v5559_v24 }
 0x361   :  { %3815 = vmatprep.subr.bf16.mxu0 %v5565_v7 }
 0x363   :  { %1336 = vmatpush1.bf16.msra.mxu1 %v5271_v17 }
 0x364   :  { %3823 = vmatprep.subr.bf16.mxu1 %v5572_v25  ;;  %3816 = vmatpush3.bf16.msra.mxu0 %v5578_v43 }
 0x365   :  { %3845 = vmatprep.subr.bf16.mxu0 %v5584_v44 }
 0x366   :  { %1354 = vmatmul.mubr.bf16.vlgmr.msra.gmra.mrb[20].mxu1 %v1234_v11  ;;  %v5644_v11 = vld [vmem:[%s7679_s1 + $0xe8] sm:$0xff]  }
 0x367   :  { %3824 = vmatpush3.bf16.msra.mxu1 %v5590_v21  ;;  %8285 = vst [vmem:[#allocation20_spill] sm:$0xff] %v5644_v11 }
 0x368   :  { %3825 = vmatprep.subr.bf16.mxu1 %v5596_v52 }
 0x36b   :  { %3826 = vmatpush3.bf16.msra.mxu1 %v5602_v6 }
 0x36c   :  { %3827 = vmatprep.subr.bf16.mxu1 %v5608_v35 }
 0x36f   :  { %3828 = vmatpush3.bf16.msra.mxu1 %v5614_v28 }
 0x370   :  { %3829 = vmatprep.subr.bf16.mxu1 %v5620_v51 }
 0x373   :  { %3830 = vmatpush3.bf16.msra.mxu1 %v5626_v36  ;;  %v5650_v36 = vld [vmem:[%s7679_s1 + $0xa8] sm:$0xff]  }
 0x374   :  { %3831 = vmatprep.subr.bf16.mxu1 %v5632_v14  ;;  %8286 = vst [vmem:[#allocation27_spill] sm:$0xff] %v5650_v36  ;;  %v5656_v14 = vld [vmem:[%s7679_s1 + $0xf0] sm:$0xff]  }
 0x375   :  { %8287 = vst [vmem:[#allocation28_spill] sm:$0xff] %v5656_v14 }
 0x377   :  { %3832 = vmatpush3.bf16.msra.mxu1 %v5638_v22  ;;  %v5662_v22 = vld [vmem:[%s7679_s1 + $0xb0] sm:$0xff]  }
 0x378   :  { %3833 = vmatprep.subr.bf16.mxu1 %v5644_v11  ;;  %8288 = vst [vmem:[#allocation22_spill] sm:$0xff] %v5662_v22  ;;  %v5668_v11 = vld [vmem:[%s7679_s1 + $0xf8] sm:$0xff]  }
 0x379   :  { %8289 = vst [vmem:[#allocation24_spill] sm:$0xff] %v5668_v11 }
 0x37b   :  { %3834 = vmatpush3.bf16.msra.mxu1 %v5650_v36  ;;  %v5674_v36 = vld [vmem:[%s7679_s1 + $0xb8] sm:$0xff]  }
 0x37c   :  { %3835 = vmatprep.subr.bf16.mxu1 %v5656_v14  ;;  %8290 = vst [vmem:[#allocation25_spill] sm:$0xff] %v5674_v36 }
 0x37f   :  { %3836 = vmatpush3.bf16.msra.mxu1 %v5662_v22 }
 0x380   :  { %3837 = vmatprep.subr.bf16.mxu1 %v5668_v11 }
 0x383   :  { %3838 = vmatpush3.bf16.msra.mxu1 %v5674_v36 }
 0x384   :  { %1565 = vmatprep.subr.bf16.mxu1 %v4971_v41 }
 0x419   :  { %v1269_v14 = vpop.f32.mrb[16].mxu1  ;;  %v1312_v51 = vpop.f32.mrb[20].mxu0 }
 0x41a   :  { %v1270_v22 = vadd.f32 %v1269_v14, %v5308_v15  ;;  %v1313_v28 = vadd.f32 %v1312_v51, %v5311_v18  ;;  %v1271_v35 = vpop.f32.mrb[17].mxu1  ;;  %v1314_v6 = vpop.f32.mrb[21].mxu0 }
 0x41b   :  { %v1272_v52 = vadd.f32 %v1271_v35, %v5314_v19  ;;  %v1315_v11 = vadd.f32 %v1314_v6, %v5317_v20  ;;  %v1273_v21 = vpop.f32.mrb[18].mxu1  ;;  %v1316_v44 = vpop.f32.mrb[22].mxu0  ;;  %v8291_v6 = vclamps-f32 %v5328_v50, 1.0  ;;  %v8296_v50 = vclamps-f32 %v5343_v33, 1.0 }
 0x41c   :  { %v1364_v43 = vmul.f32 0.125, %v1270_v22  ;;  %v1366_v25 = vmul.f32 0.125, %v1313_v28  ;;  %v1274_v36 = vadd.f32 %v1273_v21, %v5308_v15  ;;  %v1317_v41 = vadd.f32 %v1316_v44, %v5311_v18  ;;  %v1275_v17 = vpop.f32.mrb[19].mxu1  ;;  %v1318_v7 = vpop.f32.mrb[23].mxu0 }
 0x41d   :  { %v1365_v24 = vmul.f32 0.125, %v1272_v52  ;;  %v1367_v14 = vmul.f32 0.125, %v1315_v11  ;;  %v1276_v51 = vadd.f32 %v1275_v17, %v5314_v19  ;;  %v1319_v16 = vadd.f32 %v1318_v7, %v5317_v20 }
 0x41e   :  { %v1370_v13 = vmul.f32 0.125, %v1274_v36  ;;  %v1372_v35 = vmul.f32 0.125, %v1317_v41  ;;  %v8292_v28 = vclamps-f32 %v5331_v47, 1.0  ;;  %v8293_v18 = vclamps-f32 %v5334_v61, 1.0 }
 0x41f   :  { %v5688_v30 = vadd.f32 %v8291_v6, %v1365_v24  ;;  %v1371_v21 = vmul.f32 0.125, %v1276_v51  ;;  %v1373_v44 = vmul.f32 0.125, %v1319_v16  ;;  %v8294_v17 = vclamps-f32 %v5337_v46, 1.0  ;;  %v5745_v6 = vld [vmem:[%s7679_s1 + $0x100] sm:$0xff]  }
 0x420   :  { %v5692_v22 = vadd.f32 %v8292_v28, %v1367_v14  ;;  %v5696_v52 = vadd.f32 %v8293_v18, %v1364_v43  ;;  %v8295_v7 = vclamps-f32 %v5340_v62, 1.0  ;;  %v5708_v24 = vadd.f32 %v8296_v50, %v1372_v35  ;;  %8299 = vst [vmem:[#allocation26_spill] sm:$0xff] %v5745_v6  ;;  %v5752_v28 = vld [vmem:[%s7679_s1 + $0x148] sm:$0xff]  }
 0x421   :  { %v5700_v11 = vadd.f32 %v8294_v17, %v1366_v25  ;;  %v8297_v47 = vclamps-f32 %v5346_v31, 1.0  ;;  %v8298_v16 = vclamps-f32 %v5349_v39, 1.0  ;;  %v7843_v62 = vclamps-f32 %v5688_v30, 1.0  ;;  %8300 = vst [vmem:[#allocation30_spill] sm:$0xff] %v5752_v28  ;;  %v8308_v17 = vld [vmem:[#allocation45_spill] sm:$0xff] }
 0x422   :  { %v5704_v36 = vadd.f32 %v8295_v7, %v1370_v13  ;;  %v7838_v46 = vclamps-f32 %v5708_v24, 1.0  ;;  %v7842_v13 = vclamps-f32 %v5692_v22, 1.0  ;;  %v7841_v31 = vclamps-f32 %v5696_v52, 1.0 }
 0x423   :  { %v5712_v41 = vadd.f32 %v8297_v47, %v1371_v21  ;;  %v5716_v18 = vadd.f32 %v8298_v16, %v1373_v44  ;;  %v7840_v43 = vclamps-f32 %v5700_v11, 1.0  ;;  %v5760_v21 = vld [vmem:[%s7679_s1 + $0x108] sm:$0xff]  }
 0x424   :  { %v7839_v61 = vclamps-f32 %v5704_v36, 1.0  ;;  %8301 = vst [vmem:[#allocation31_spill] sm:$0xff] %v5760_v21  ;;  %v5810_v47 = vld [vmem:[%s7679_s1 + $0x168] sm:$0xff]  }
 0x425   :  { %v7837_v33 = vclamps-f32 %v5712_v41, 1.0  ;;  %v7836_v25 = vclamps-f32 %v5716_v18, 1.0  ;;  %v1415_v35 = vpack.c.bf16 %v7838_v46, %v7840_v43  ;;  %8310 = vst [vmem:[#allocation45_spill] sm:$0xff] %v5810_v47  ;;  %v8312_v16 = vld [vmem:[#allocation9_spill] sm:$0xff]  ;;  %v8314_v46 = vld [vmem:[#allocation50_spill] sm:$0xff] }
 0x426   :  { %v1413_v51 = vpack.c.bf16 %v7839_v61, %v7841_v31  ;;  %v8320_v43 = vld [vmem:[#allocation29_spill] sm:$0xff] }
 0x427   :  { %v1414_v39 = vpack.c.bf16 %v7837_v33, %v7843_v62  ;;  %v1416_v14 = vpack.c.bf16 %v7836_v25, %v7842_v13  ;;  %v5820_v33 = vld [vmem:[%s7679_s1 + $0x128] sm:$0xff]   ;;  %v8321_v31 = vclamps-f32 %v8320_v43, 1.0  ;;  %v5858_v43 = vld [vmem:[%s7679_s1 + $0x178] sm:$0xff]  }
 0x429   :  { %1455 = vmatprep.mubr.bf16.mxu0 %v1414_v39  ;;  %1496 = vmatprep.mubr.bf16.mxu1 %v1416_v14 }
 0x42a   :  { %1456 = vmatmul.mubr.bf16.vlgmr.msra.gmra.mrb[24].mxu0 %v1413_v51  ;;  %1497 = vmatmul.mubr.bf16.vlgmr.msra.gmra.mrb[24].mxu1 %v1415_v35 }
 0x42b   :  { %3846 = vmatpush3.bf16.msra.mxu0 %v5745_v6  ;;  %1566 = vmatpush1.bf16.msra.mxu1 %v8213_v27  ;;  %v5767_v27 = vld [vmem:[%s7679_s1 + $0x150] sm:$0xff]  }
 0x42c   :  { %3847 = vmatprep.subr.bf16.mxu0 %v5752_v28  ;;  %1567 = vmatprep.subr.bf16.mxu1 %v8215_v29  ;;  %8302 = vst [vmem:[#allocation34_spill] sm:$0xff] %v5767_v27  ;;  %v5774_v29 = vld [vmem:[%s7679_s1 + $0x110] sm:$0xff]  }
 0x42d   :  { %1597 = vmatprep.mubr.bf16.mxu1 %v8205_v40  ;;  %8303 = vst [vmem:[#allocation35_spill] sm:$0xff] %v5774_v29 }
 0x42f   :  { %3848 = vmatpush3.bf16.msra.mxu0 %v5760_v21  ;;  %1568 = vmatpush1.bf16.msra.mxu1 %v8217_v34  ;;  %v5781_v34 = vld [vmem:[%s7679_s1 + $0x158] sm:$0xff]  }
 0x430   :  { %3849 = vmatprep.subr.bf16.mxu0 %v5767_v27  ;;  %1569 = vmatprep.subr.bf16.mxu1 %v8219_v54  ;;  %8304 = vst [vmem:[#allocation65_spill] sm:$0xff] %v5781_v34  ;;  %v5788_v54 = vld [vmem:[%s7679_s1 + $0x118] sm:$0xff]  }
 0x431   :  { %8305 = vst [vmem:[#allocation66_spill] sm:$0xff] %v5788_v54 }
 0x433   :  { %3850 = vmatpush3.bf16.msra.mxu0 %v5774_v29  ;;  %1570 = vmatpush1.bf16.msra.mxu1 %v8221_v60  ;;  %v5795_v60 = vld [vmem:[%s7679_s1 + $0x160] sm:$0xff]  }
 0x434   :  { %3851 = vmatprep.subr.bf16.mxu0 %v5781_v34  ;;  %1571 = vmatprep.subr.bf16.mxu1 %v8223_v57  ;;  %8306 = vst [vmem:[#allocation67_spill] sm:$0xff] %v5795_v60  ;;  %v5802_v57 = vld [vmem:[%s7679_s1 + $0x120] sm:$0xff]  }
 0x435   :  { %8307 = vst [vmem:[#allocation68_spill] sm:$0xff] %v5802_v57 }
 0x437   :  { %3852 = vmatpush3.bf16.msra.mxu0 %v5788_v54  ;;  %1572 = vmatpush1.bf16.msra.mxu1 %v8225_v49  ;;  %v8309_v49 = vld [vmem:[#allocation8_spill] sm:$0xff] }
 0x438   :  { %3853 = vmatprep.subr.bf16.mxu0 %v5795_v60  ;;  %1573 = vmatprep.subr.bf16.mxu1 %v8228_v58  ;;  %v8311_v58 = vld [vmem:[#allocation48_spill] sm:$0xff] }
 0x439   :  { %v1355_v44 = vpop.f32.mrb[20].mxu1  ;;  %8313 = vst [vmem:[#allocation48_spill] sm:$0xff] %v5820_v33 }
 0x43a   :  { %v1356_v7 = vadd.f32 %v1355_v44, %v8309_v49  ;;  %v1357_v50 = vpop.f32.mrb[21].mxu1 }
 0x43b   :  { %3854 = vmatpush3.bf16.msra.mxu0 %v5802_v57  ;;  %1574 = vmatpush1.bf16.msra.mxu1 %v8308_v17  ;;  %v1358_v39 = vadd.f32 %v1357_v50, %v8312_v16  ;;  %v1359_v14 = vpop.f32.mrb[22].mxu1  ;;  %v8316_v50 = vld [vmem:[#allocation52_spill] sm:$0xff] }
 0x43c   :  { %3855 = vmatprep.subr.bf16.mxu0 %v5810_v47  ;;  %1575 = vmatprep.subr.bf16.mxu1 %v8311_v58  ;;  %v1368_v51 = vmul.f32 0.125, %v1356_v7  ;;  %v1360_v35 = vadd.f32 %v1359_v14, %v8309_v49  ;;  %v1361_v25 = vpop.f32.mrb[23].mxu1  ;;  %v5827_v7 = vld [vmem:[%s7679_s1 + $0x170] sm:$0xff]  }
 0x43d   :  { %v1369_v17 = vmul.f32 0.125, %v1358_v39  ;;  %v1362_v44 = vadd.f32 %v1361_v25, %v8312_v16  ;;  %8315 = vst [vmem:[#allocation50_spill] sm:$0xff] %v5827_v7  ;;  %v8317_v25 = vld [vmem:[#allocation10_spill] sm:$0xff] }
 0x43e   :  { %v1374_v58 = vmul.f32 0.125, %v1360_v35  ;;  %v8318_v39 = vclamps-f32 %v8317_v25, 1.0  ;;  %v5837_v13 = vadd.f32 %v8321_v31, %v1368_v51  ;;  %v8334_v25 = vld [vmem:[#allocation58_spill] sm:$0xff] }
 0x43f   :  { %3856 = vmatpush3.bf16.msra.mxu0 %v5820_v33  ;;  %1576 = vmatpush1.bf16.msra.mxu1 %v8314_v46  ;;  %v1375_v61 = vmul.f32 0.125, %v1362_v44  ;;  %v8323_v46 = vld [vmem:[#allocation11_spill] sm:$0xff]  ;;  %v8326_v33 = vld [vmem:[#allocation32_spill] sm:$0xff] }
 0x440   :  { %3857 = vmatprep.subr.bf16.mxu0 %v5827_v7  ;;  %1577 = vmatprep.subr.bf16.mxu1 %v8316_v50  ;;  %v5833_v14 = vadd.f32 %v8318_v39, %v1369_v17  ;;  %8322 = vst [vmem:[#allocation10_spill] sm:$0xff] %v5837_v13  ;;  %v8324_v35 = vclamps-f32 %v8323_v46, 1.0  ;;  %v8327_v16 = vclamps-f32 %v8326_v33, 1.0  ;;  %v5850_v50 = vld [vmem:[%s7679_s1 + $0x130] sm:$0xff]   ;;  %v7851_v51 = vclamps-f32 %v5837_v13, 1.0  ;;  %v5868_v44 = vld [vmem:[%s7679_s1 + $0x138] sm:$0xff]  }
 0x441   :  { %8329 = vst [vmem:[#allocation32_spill] sm:$0xff] %v5850_v50  ;;  %v8330_v17 = vld [vmem:[#allocation54_spill] sm:$0xff]  ;;  %v5883_v46 = vld [vmem:[%s7681_s3 + $0xc] ss:$24 sps:$4 sm:$0xff]  }
 0x442   :  { %8319 = vst [vmem:[#allocation52_spill] sm:$0xff] %v5833_v14  ;;  %v5841_v62 = vadd.f32 %v8324_v35, %v1374_v58  ;;  %v5845_v47 = vadd.f32 %v8327_v16, %v1375_v61  ;;  %8331 = vst [vmem:[#allocation54_spill] sm:$0xff] %v5858_v43  ;;  %v8332_v61 = vld [vmem:[#allocation56_spill] sm:$0xff]  ;;  %v7852_v33 = vclamps-f32 %v5833_v14, 1.0 }
 0x443   :  { %3858 = vmatpush3.bf16.msra.mxu0 %v5850_v50  ;;  %1578 = vmatpush1.bf16.msra.mxu1 %v8330_v17  ;;  %8333 = vst [vmem:[#allocation56_spill] sm:$0xff] %v5868_v44  ;;  %8335 = vst [vmem:[#allocation58_spill] sm:$0xff] %v5883_v46  ;;  %v8336_v35 = vld [vmem:[#allocation60_spill] sm:$0xff] }
 0x444   :  { %8325 = vst [vmem:[#allocation29_spill] sm:$0xff] %v5841_v62  ;;  %8328 = vst [vmem:[#allocation11_spill] sm:$0xff] %v5845_v47  ;;  %v7850_v31 = vclamps-f32 %v5841_v62, 1.0  ;;  %3859 = vmatprep.subr.bf16.mxu0 %v5858_v43  ;;  %1579 = vmatprep.subr.bf16.mxu1 %v8332_v61  ;;  %v7849_v16 = vclamps-f32 %v5845_v47, 1.0  ;;  %v5890_v17 = vld [vmem:[%s7681_s3 + $0x8] ss:$24 sps:$4 sm:$0xff]  }
 0x445   :  { %8337 = vst [vmem:[#allocation60_spill] sm:$0xff] %v5890_v17  ;;  %v5897_v61 = vld [vmem:[%s7681_s3 + $0x3c] ss:$24 sps:$4 sm:$0xff]  }
 0x446   :  { %v1418_v58 = vpack.c.bf16 %v7849_v16, %v7852_v33  ;;  %v1417_v39 = vpack.c.bf16 %v7850_v31, %v7851_v51  ;;  %8338 = vst [vmem:[#allocation69_spill] sm:$0xff] %v5897_v61  ;;  %v8343_v16 = vld [vmem:[#allocation43_spill] sm:$0xff]  ;;  %v8344_v31 = vld [vmem:[#allocation46_spill] sm:$0xff]  ;;  %v8346_v33 = vld [vmem:[#allocation49_spill] sm:$0xff] }
 0x447   :  { %3860 = vmatpush3.bf16.msra.mxu0 %v5868_v44  ;;  %1580 = vmatpush1.bf16.msra.mxu1 %v8334_v25  ;;  %v8340_v25 = vld [vmem:[#allocation38_spill] sm:$0xff]  ;;  %v8345_v51 = vld [vmem:[#allocation47_spill] sm:$0xff] }
 0x448   :  { %1608 = vmatprep.subr.bf16.mxu0 %v5883_v46  ;;  %1651 = vmatprep.subr.bf16.mxu1 %v8336_v35  ;;  %v8342_v35 = vld [vmem:[#allocation42_spill] sm:$0xff]  ;;  %v8349_v46 = vld [vmem:[#allocation55_spill] sm:$0xff] }
 0x449   :  { %1537 = vmatprep.mubr.bf16.mxu0 %v1418_v58  ;;  %v5903_v58 = vld [vmem:[%s7681_s3 + $0x38] ss:$24 sps:$4 sm:$0xff]  }
 0x44a   :  { %1538 = vmatmul.mubr.bf16.vlgmr.msra.gmra.mrb[28].mxu0 %v1417_v39  ;;  %8339 = vst [vmem:[#allocation70_spill] sm:$0xff] %v5903_v58  ;;  %v8341_v39 = vld [vmem:[#allocation39_spill] sm:$0xff] }
 0x44b   :  { %1609 = vmatpush1.bf16.msra.mxu0 %v5890_v17  ;;  %1640 = vmatprep.mubr.bf16.mxu0 %v8205_v40  ;;  %v8348_v17 = vld [vmem:[#allocation53_spill] sm:$0xff] }
 0x44c   :  { %1610 = vmatprep.subr.bf16.mxu0 %v5897_v61  ;;  %v8347_v61 = vld [vmem:[#allocation51_spill] sm:$0xff] }
 0x44f   :  { %1611 = vmatpush1.bf16.msra.mxu0 %v5903_v58  ;;  %v8350_v58 = vld [vmem:[#allocation57_spill] sm:$0xff] }
 0x450   :  { %1612 = vmatprep.subr.bf16.mxu0 %v8340_v25  ;;  %v8351_v25 = vld [vmem:[#allocation59_spill] sm:$0xff] }
 0x453   :  { %1613 = vmatpush1.bf16.msra.mxu0 %v8341_v39  ;;  %v8352_v39 = vld [vmem:[#allocation12_spill] sm:$0xff] }
 0x454   :  { %1614 = vmatprep.subr.bf16.mxu0 %v8342_v35 }
 0x457   :  { %1615 = vmatpush1.bf16.msra.mxu0 %v8343_v16 }
 0x458   :  { %1616 = vmatprep.subr.bf16.mxu0 %v8344_v31  ;;  %v3591_v31 = vld [vmem:[%s7680_s2 + $0x2] ss:$0 sm:$0xff] }
 0x45b   :  { %1617 = vmatpush1.bf16.msra.mxu0 %v8345_v51 }
 0x45c   :  { %1618 = vmatprep.subr.bf16.mxu0 %v8346_v33 }
 0x45f   :  { %1619 = vmatpush1.bf16.msra.mxu0 %v8347_v61 }
 0x460   :  { %1620 = vmatprep.subr.bf16.mxu0 %v8348_v17 }
 0x463   :  { %1621 = vmatpush1.bf16.msra.mxu0 %v8349_v46 }
 0x464   :  { %1622 = vmatprep.subr.bf16.mxu0 %v8350_v58 }
 0x467   :  { %1623 = vmatpush1.bf16.msra.mxu0 %v8351_v25 }
 0x468   :  { %3867 = vmatprep.subr.bf16.mxu0 %v8352_v39 }
 0x4fd   :  { %v3817_v35 = vpop.f32.mrb[24].mxu0  ;;  %v3839_v16 = vpop.f32.mrb[24].mxu1 }
 0x4fe   :  { %v3818_v51 = vpop.f32.mrb[25].mxu0  ;;  %v3840_v33 = vpop.f32.mrb[25].mxu1 }
 0x4ff   :  { %v3819_v44 = vadd.f32 %v3818_v51, %v3817_v35  ;;  %v3841_v61 = vadd.f32 %v3840_v33, %v3839_v16  ;;  %v3820_v43 = vpop.f32.mrb[26].mxu0  ;;  %v3842_v17 = vpop.f32.mrb[26].mxu1 }
 0x500   :  { %v3821_v50 = vpop.f32.mrb[27].mxu0  ;;  %v3843_v46 = vpop.f32.mrb[27].mxu1 }
 0x501   :  { %v1458_v47 = vadd.f32 %v3819_v44, %v3591_v31  ;;  %v3822_v58 = vadd.f32 %v3821_v50, %v3820_v43  ;;  %v3844_v62 = vadd.f32 %v3843_v46, %v3842_v17  ;;  %v8371_v17 = vld [vmem:[#allocation20_spill] sm:$0xff]  ;;  %v8372_v46 = vld [vmem:[#allocation27_spill] sm:$0xff] }
 0x503   :  { %v1499_v25 = vadd.f32 %v3841_v61, %v1458_v47  ;;  %v1461_v13 = vadd.f32 %v3822_v58, %v3591_v31  ;;  %v8370_v61 = vld [vmem:[#allocation23_spill] sm:$0xff]  ;;  %v8373_v58 = vld [vmem:[#allocation28_spill] sm:$0xff] }
 0x505   :  { %v1502_v39 = vadd.f32 %v3844_v62, %v1461_v13 }
 0x51d   :  { %v3861_v14 = vpop.f32.mrb[28].mxu0 }
 0x51e   :  { %v3862_v7 = vpop.f32.mrb[29].mxu0 }
 0x51f   :  { %v3863_v49 = vadd.f32 %v3862_v7, %v3861_v14  ;;  %v3864_v57 = vpop.f32.mrb[30].mxu0 }
 0x520   :  { %v3865_v60 = vpop.f32.mrb[31].mxu0 }
 0x521   :  { %v1540_v54 = vadd.f32 %v3863_v49, %v1499_v25  ;;  %v3866_v34 = vadd.f32 %v3865_v60, %v3864_v57  ;;  %v8374_v25 = vld [vmem:[#allocation22_spill] sm:$0xff] }
 0x523   :  { %v1546_v29 = vmul.f32 %v1540_v54, %v1540_v54  ;;  %v1543_v35 = vadd.f32 %v3866_v34, %v1502_v39  ;;  %v8369_v39 = vld [vmem:[#allocation21_spill] sm:$0xff] }
 0x525   :  { %v1548_v16 = vmul.f32 %v1546_v29, %v1540_v54  ;;  %v1547_v51 = vmul.f32 %v1543_v35, %v1543_v35  ;;  %v8367_v29 = vld [vmem:[#allocation18_spill] sm:$0xff] }
 0x527   :  { %v1550_v33 = vmul.f32 0.044715, %v1548_v16  ;;  %v1549_v27 = vmul.f32 %v1547_v51, %v1543_v35  ;;  %v8376_v16 = vld [vmem:[#allocation25_spill] sm:$0xff]  ;;  %v5973_v51 = vld [vmem:[%s7681_s3 + $0x4] ss:$24 sps:$4 sm:$0xff]  }
 0x528   :  { %8377 = vst [vmem:[#allocation38_spill] sm:$0xff] %v5973_v51 }
 0x529   :  { %v1552_v21 = vadd.f32 %v1550_v33, %v1540_v54  ;;  %v1551_v44 = vmul.f32 0.044715, %v1549_v27  ;;  %v8366_v27 = vld [vmem:[#allocation44_spill] sm:$0xff] }
 0x52b   :  { %v1554_v50 = vmul.f32 0.7978846, %v1552_v21  ;;  %v1553_v43 = vadd.f32 %v1551_v44, %v1543_v35  ;;  %v8365_v21 = vld [vmem:[#allocation17_spill] sm:$0xff] }
 0x52d   :  { %4330 = vtanh.f32 %v1554_v50  ;;  %v1555_v47 = vmul.f32 0.7978846, %v1553_v43  ;;  %v8378_v43 = vld [vmem:[#allocation64_spill] sm:$0xff] }
 0x52f   :  { %4332 = vtanh.f32 %v1555_v47 }
 0x537   :  { %v4331_v62 = vpop.eup %4330 }
 0x538   :  { %v1558_v13 = vadd.f32 1.0, %v4331_v62 }
 0x539   :  { %v4333_v7 = vpop.eup %4332 }
 0x53a   :  { %v1559_v14 = vadd.f32 1.0, %v4333_v7  ;;  %v1560_v31 = vmul.f32 0.5, %v1558_v13 }
 0x53c   :  { %v1561_v49 = vmul.f32 0.5, %v1559_v14  ;;  %v1562_v60 = vmul.f32 %v1560_v31, %v1540_v54  ;;  %v8368_v54 = vld [vmem:[#allocation19_spill] sm:$0xff] }
 0x53e   :  { %v1563_v57 = vmul.f32 %v1561_v49, %v1543_v35  ;;  %v8375_v35 = vld [vmem:[#allocation24_spill] sm:$0xff] }
 0x540   :  { %v1564_v34 = vpack.c.bf16 %v1563_v57, %v1562_v60 }
 0x542   :  { %1598 = vmatmul.mubr.bf16.vlgmr.msra.gmra.mrb[28].mxu1 %v1564_v34  ;;  %1641 = vmatmul.mubr.bf16.vlgmr.msra.gmra.mrb[32].mxu0 %v1564_v34 }
 0x543   :  { %1652 = vmatpush1.bf16.msra.mxu1 %v5175_v32  ;;  %1683 = vmatprep.mubr.bf16.mxu1 %v8205_v40  ;;  %v8353_v32 = vld [vmem:[#allocation33_spill] sm:$0xff] }
 0x544   :  { %1653 = vmatprep.subr.bf16.mxu1 %v5180_v45  ;;  %3868 = vmatpush3.bf16.msra.mxu0 %v5475_v56  ;;  %v8354_v45 = vld [vmem:[#allocation61_spill] sm:$0xff] }
 0x545   :  { %3869 = vmatprep.subr.bf16.mxu0 %v5481_v2 }
 0x547   :  { %1654 = vmatpush1.bf16.msra.mxu1 %v5186_v42  ;;  %v8355_v42 = vld [vmem:[#allocation62_spill] sm:$0xff] }
 0x548   :  { %1655 = vmatprep.subr.bf16.mxu1 %v5193_v59  ;;  %3870 = vmatpush3.bf16.msra.mxu0 %v5489_v23  ;;  %v8356_v59 = vld [vmem:[#allocation13_spill] sm:$0xff] }
 0x549   :  { %3871 = vmatprep.subr.bf16.mxu0 %v5495_v26 }
 0x54b   :  { %1656 = vmatpush1.bf16.msra.mxu1 %v5201_v0  ;;  %v8357_v0 = vld [vmem:[#allocation36_spill] sm:$0xff] }
 0x54c   :  { %1657 = vmatprep.subr.bf16.mxu1 %v5207_v53  ;;  %3872 = vmatpush3.bf16.msra.mxu0 %v5503_v37  ;;  %v8358_v53 = vld [vmem:[#allocation63_spill] sm:$0xff] }
 0x54d   :  { %3873 = vmatprep.subr.bf16.mxu0 %v5509_v63 }
 0x54f   :  { %1658 = vmatpush1.bf16.msra.mxu1 %v5215_v1  ;;  %v8359_v1 = vld [vmem:[#allocation14_spill] sm:$0xff] }
 0x550   :  { %1659 = vmatprep.subr.bf16.mxu1 %v5221_v4  ;;  %3874 = vmatpush3.bf16.msra.mxu0 %v5517_v3  ;;  %v8360_v4 = vld [vmem:[#allocation37_spill] sm:$0xff] }
 0x551   :  { %3875 = vmatprep.subr.bf16.mxu0 %v5523_v10 }
 0x553   :  { %1660 = vmatpush1.bf16.msra.mxu1 %v5229_v5  ;;  %v8361_v5 = vld [vmem:[#allocation15_spill] sm:$0xff] }
 0x554   :  { %1661 = vmatprep.subr.bf16.mxu1 %v5235_v8  ;;  %3876 = vmatpush3.bf16.msra.mxu0 %v5531_v55  ;;  %v8362_v8 = vld [vmem:[#allocation40_spill] sm:$0xff] }
 0x555   :  { %3877 = vmatprep.subr.bf16.mxu0 %v5537_v38 }
 0x557   :  { %1662 = vmatpush1.bf16.msra.mxu1 %v5243_v9  ;;  %v8363_v9 = vld [vmem:[#allocation16_spill] sm:$0xff] }
 0x558   :  { %1663 = vmatprep.subr.bf16.mxu1 %v5249_v12  ;;  %3878 = vmatpush3.bf16.msra.mxu0 %v5545_v48  ;;  %v8364_v12 = vld [vmem:[#allocation41_spill] sm:$0xff] }
 0x559   :  { %3879 = vmatprep.subr.bf16.mxu0 %v8353_v32 }
 0x55b   :  { %1664 = vmatpush1.bf16.msra.mxu1 %v8354_v45 }
 0x55c   :  { %1665 = vmatprep.subr.bf16.mxu1 %v8355_v42  ;;  %3880 = vmatpush3.bf16.msra.mxu0 %v8356_v59 }
 0x55d   :  { %3881 = vmatprep.subr.bf16.mxu0 %v8357_v0 }
 0x55f   :  { %1666 = vmatpush1.bf16.msra.mxu1 %v8358_v53 }
 0x560   :  { %3889 = vmatprep.subr.bf16.mxu1 %v8359_v1  ;;  %3882 = vmatpush3.bf16.msra.mxu0 %v8360_v4 }
 0x561   :  { %3911 = vmatprep.subr.bf16.mxu0 %v8361_v5 }
 0x562   :  { %1684 = vmatmul.mubr.bf16.vlgmr.msra.gmra.mrb[32].mxu1 %v1564_v34 }
 0x563   :  { %3890 = vmatpush3.bf16.msra.mxu1 %v8362_v8 }
 0x564   :  { %3891 = vmatprep.subr.bf16.mxu1 %v8363_v9 }
 0x567   :  { %3892 = vmatpush3.bf16.msra.mxu1 %v8364_v12 }
 0x568   :  { %3893 = vmatprep.subr.bf16.mxu1 %v8365_v21 }
 0x56b   :  { %3894 = vmatpush3.bf16.msra.mxu1 %v8366_v27 }
 0x56c   :  { %3895 = vmatprep.subr.bf16.mxu1 %v8367_v29 }
 0x56f   :  { %3896 = vmatpush3.bf16.msra.mxu1 %v8368_v54 }
 0x570   :  { %3897 = vmatprep.subr.bf16.mxu1 %v8369_v39 }
 0x573   :  { %3898 = vmatpush3.bf16.msra.mxu1 %v8370_v61 }
 0x574   :  { %3899 = vmatprep.subr.bf16.mxu1 %v8371_v17 }
 0x577   :  { %3900 = vmatpush3.bf16.msra.mxu1 %v8372_v46 }
 0x578   :  { %3901 = vmatprep.subr.bf16.mxu1 %v8373_v58 }
 0x57b   :  { %3902 = vmatpush3.bf16.msra.mxu1 %v8374_v25 }
 0x57c   :  { %3903 = vmatprep.subr.bf16.mxu1 %v8375_v35 }
 0x57f   :  { %3904 = vmatpush3.bf16.msra.mxu1 %v8376_v16 }
 0x580   :  { %1895 = vmatprep.subr.bf16.mxu1 %v5973_v51 }
 0x615   :  { %v1599_v33 = vpop.f32.mrb[28].mxu1  ;;  %v1642_v44 = vpop.f32.mrb[32].mxu0 }
 0x616   :  { %v1600_v50 = vadd.f32 %v1599_v33, %v5308_v15  ;;  %v1643_v47 = vadd.f32 %v1642_v44, %v8378_v43  ;;  %v1601_v62 = vpop.f32.mrb[29].mxu1  ;;  %v1644_v13 = vpop.f32.mrb[33].mxu0 }
 0x617   :  { %v1602_v7 = vadd.f32 %v1601_v62, %v5314_v19  ;;  %v1645_v14 = vadd.f32 %v1644_v13, %v5317_v20  ;;  %v1603_v31 = vpop.f32.mrb[30].mxu1  ;;  %v1646_v49 = vpop.f32.mrb[34].mxu0  ;;  %v8379_v13 = vclamps-f32 %v5688_v30, 1.0  ;;  %v8385_v30 = vclamps-f32 %v5708_v24, 1.0 }
 0x618   :  { %v1694_v60 = vmul.f32 0.125, %v1600_v50  ;;  %v1696_v57 = vmul.f32 0.125, %v1643_v47  ;;  %v1604_v34 = vadd.f32 %v1603_v31, %v5308_v15  ;;  %v1647_v45 = vadd.f32 %v1646_v49, %v8378_v43  ;;  %v1605_v42 = vpop.f32.mrb[31].mxu1  ;;  %v1648_v53 = vpop.f32.mrb[35].mxu0 }
 0x619   :  { %v1695_v51 = vmul.f32 0.125, %v1602_v7  ;;  %v1697_v33 = vmul.f32 0.125, %v1645_v14  ;;  %v1606_v44 = vadd.f32 %v1605_v42, %v5314_v19  ;;  %v1649_v16 = vadd.f32 %v1648_v53, %v5317_v20 }
 0x61a   :  { %v1700_v35 = vmul.f32 0.125, %v1604_v34  ;;  %v1702_v62 = vmul.f32 0.125, %v1647_v45  ;;  %v8380_v50 = vclamps-f32 %v5692_v22, 1.0  ;;  %v8381_v43 = vclamps-f32 %v5696_v52, 1.0 }
 0x61b   :  { %v5986_v25 = vadd.f32 %v8379_v13, %v1695_v51  ;;  %v1701_v31 = vmul.f32 0.125, %v1606_v44  ;;  %v1703_v49 = vmul.f32 0.125, %v1649_v16  ;;  %v8382_v14 = vclamps-f32 %v5700_v11, 1.0  ;;  %v6044_v13 = vld [vmem:[%s7681_s3] ss:$24 sps:$4 sm:$0xff]  }
 0x61c   :  { %v5990_v47 = vadd.f32 %v8380_v50, %v1697_v33  ;;  %v5994_v7 = vadd.f32 %v8381_v43, %v1694_v60  ;;  %v8383_v34 = vclamps-f32 %v5704_v36, 1.0  ;;  %v6006_v51 = vadd.f32 %v8385_v30, %v1702_v62  ;;  %8391 = vst [vmem:[#allocation47_spill] sm:$0xff] %v6044_v13  ;;  %v6051_v50 = vld [vmem:[%s7681_s3 + $0x34] ss:$24 sps:$4 sm:$0xff]   ;;  %v8397_v30 = vld [vmem:[#allocation35_spill] sm:$0xff] }
 0x61d   :  { %v5998_v42 = vadd.f32 %v8382_v14, %v1696_v57  ;;  %v8387_v22 = vclamps-f32 %v5712_v41, 1.0  ;;  %v8389_v52 = vclamps-f32 %v5716_v18, 1.0  ;;  %v7898_v36 = vclamps-f32 %v5986_v25, 1.0  ;;  %8392 = vst [vmem:[#allocation49_spill] sm:$0xff] %v6051_v50  ;;  %v8395_v14 = vld [vmem:[#allocation34_spill] sm:$0xff] }
 0x61e   :  { %v6002_v45 = vadd.f32 %v8383_v34, %v1700_v35  ;;  %8386 = vst [vmem:[#allocation42_spill] sm:$0xff] %v6006_v51  ;;  %v7893_v43 = vclamps-f32 %v6006_v51, 1.0  ;;  %v7897_v35 = vclamps-f32 %v5990_v47, 1.0  ;;  %v7896_v41 = vclamps-f32 %v5994_v7, 1.0  ;;  %v6066_v34 = vld [vmem:[%s7681_s3 + $0x64] ss:$24 sps:$4 sm:$0xff]  }
 0x61f   :  { %v6010_v53 = vadd.f32 %v8387_v22, %v1701_v31  ;;  %v6014_v16 = vadd.f32 %v8389_v52, %v1703_v49  ;;  %v7895_v57 = vclamps-f32 %v5998_v42, 1.0  ;;  %v8393_v31 = vld [vmem:[#allocation31_spill] sm:$0xff]  ;;  %v6059_v49 = vld [vmem:[%s7681_s3 + $0x30] ss:$24 sps:$4 sm:$0xff]   ;;  %8396 = vst [vmem:[#allocation53_spill] sm:$0xff] %v6066_v34 }
 0x620   :  { %8384 = vst [vmem:[#allocation39_spill] sm:$0xff] %v6002_v45  ;;  %v7894_v11 = vclamps-f32 %v6002_v45, 1.0  ;;  %8394 = vst [vmem:[#allocation51_spill] sm:$0xff] %v6059_v49  ;;  %v6073_v22 = vld [vmem:[%s7681_s3 + $0x60] ss:$24 sps:$4 sm:$0xff]   ;;  %v8399_v52 = vld [vmem:[#allocation65_spill] sm:$0xff] }
 0x621   :  { %8388 = vst [vmem:[#allocation43_spill] sm:$0xff] %v6010_v53  ;;  %8390 = vst [vmem:[#allocation46_spill] sm:$0xff] %v6014_v16  ;;  %v7892_v24 = vclamps-f32 %v6010_v53, 1.0  ;;  %v7891_v60 = vclamps-f32 %v6014_v16, 1.0  ;;  %v1745_v62 = vpack.c.bf16 %v7893_v43, %v7895_v57  ;;  %v8405_v43 = vld [vmem:[#allocation68_spill] sm:$0xff] }
 0x622   :  { %v1743_v44 = vpack.c.bf16 %v7894_v11, %v7896_v41  ;;  %8398 = vst [vmem:[#allocation55_spill] sm:$0xff] %v6073_v22  ;;  %v6101_v11 = vld [vmem:[%s7681_s3 + $0xc0] ss:$24 sps:$4 sm:$0xff]  }
 0x623   :  { %v1744_v18 = vpack.c.bf16 %v7892_v24, %v7898_v36  ;;  %v1746_v33 = vpack.c.bf16 %v7891_v60, %v7897_v35  ;;  %v6094_v60 = vld [vmem:[%s7681_s3 + $0xc4] ss:$24 sps:$4 sm:$0xff]   ;;  %8406 = vst [vmem:[#allocation61_spill] sm:$0xff] %v6101_v11  ;;  %v8408_v36 = vld [vmem:[#allocation45_spill] sm:$0xff] }
 0x624   :  { %8404 = vst [vmem:[#allocation33_spill] sm:$0xff] %v6094_v60  ;;  %v8407_v57 = vld [vmem:[#allocation8_spill] sm:$0xff] }
 0x625   :  { %1785 = vmatprep.mubr.bf16.mxu0 %v1744_v18  ;;  %1826 = vmatprep.mubr.bf16.mxu1 %v1746_v33  ;;  %v6080_v18 = vld [vmem:[%s7681_s3 + $0x94] ss:$24 sps:$4 sm:$0xff]  }
 0x626   :  { %1786 = vmatmul.mubr.bf16.vlgmr.msra.gmra.mrb[36].mxu0 %v1743_v44  ;;  %1827 = vmatmul.mubr.bf16.vlgmr.msra.gmra.mrb[36].mxu1 %v1745_v62  ;;  %8400 = vst [vmem:[#allocation57_spill] sm:$0xff] %v6080_v18  ;;  %v8401_v33 = vld [vmem:[#allocation66_spill] sm:$0xff]  ;;  %v8403_v62 = vld [vmem:[#allocation67_spill] sm:$0xff] }
 0x627   :  { %3912 = vmatpush3.bf16.msra.mxu0 %v5745_v6  ;;  %1896 = vmatpush1.bf16.msra.mxu1 %v6044_v13  ;;  %v6087_v44 = vld [vmem:[%s7681_s3 + $0x90] ss:$24 sps:$4 sm:$0xff]  }
 0x628   :  { %3913 = vmatprep.subr.bf16.mxu0 %v5752_v28  ;;  %1897 = vmatprep.subr.bf16.mxu1 %v6051_v50  ;;  %8402 = vst [vmem:[#allocation59_spill] sm:$0xff] %v6087_v44 }
 0x629   :  { %1927 = vmatprep.mubr.bf16.mxu1 %v8205_v40 }
 0x62b   :  { %3914 = vmatpush3.bf16.msra.mxu0 %v8393_v31  ;;  %1898 = vmatpush1.bf16.msra.mxu1 %v6059_v49  ;;  %v8427_v31 = vld [vmem:[#allocation32_spill] sm:$0xff] }
 0x62c   :  { %3915 = vmatprep.subr.bf16.mxu0 %v8395_v14  ;;  %1899 = vmatprep.subr.bf16.mxu1 %v6066_v34 }
 0x62f   :  { %3916 = vmatpush3.bf16.msra.mxu0 %v8397_v30  ;;  %1900 = vmatpush1.bf16.msra.mxu1 %v6073_v22  ;;  %v8411_v22 = vld [vmem:[#allocation48_spill] sm:$0xff]  ;;  %v8413_v30 = vld [vmem:[#allocation50_spill] sm:$0xff] }
 0x630   :  { %3917 = vmatprep.subr.bf16.mxu0 %v8399_v52  ;;  %1901 = vmatprep.subr.bf16.mxu1 %v6080_v18 }
 0x633   :  { %3918 = vmatpush3.bf16.msra.mxu0 %v8401_v33  ;;  %1902 = vmatpush1.bf16.msra.mxu1 %v6087_v44 }
 0x634   :  { %3919 = vmatprep.subr.bf16.mxu0 %v8403_v62  ;;  %1903 = vmatprep.subr.bf16.mxu1 %v6094_v60  ;;  %v6109_v62 = vld [vmem:[%s7681_s3 + $0xf4] ss:$24 sps:$4 sm:$0xff]  }
 0x635   :  { %v1685_v24 = vpop.f32.mrb[32].mxu1  ;;  %8409 = vst [vmem:[#allocation62_spill] sm:$0xff] %v6109_v62 }
 0x636   :  { %v1686_v41 = vadd.f32 %v1685_v24, %v8407_v57  ;;  %v1687_v35 = vpop.f32.mrb[33].mxu1 }
 0x637   :  { %3920 = vmatpush3.bf16.msra.mxu0 %v8405_v43  ;;  %1904 = vmatpush1.bf16.msra.mxu1 %v6101_v11  ;;  %v8410_v43 = vld [vmem:[#allocation9_spill] sm:$0xff]  ;;  %v1689_v44 = vpop.f32.mrb[34].mxu1 }
 0x638   :  { %3921 = vmatprep.subr.bf16.mxu0 %v8408_v36  ;;  %1905 = vmatprep.subr.bf16.mxu1 %v6109_v62  ;;  %v1688_v60 = vadd.f32 %v1687_v35, %v8410_v43  ;;  %v1698_v33 = vmul.f32 0.125, %v1686_v41  ;;  %v1690_v18 = vadd.f32 %v1689_v44, %v8407_v57  ;;  %v1691_v52 = vpop.f32.mrb[35].mxu1  ;;  %v6119_v36 = vld [vmem:[%s7681_s3 + $0xf0] ss:$24 sps:$4 sm:$0xff]   ;;  %v6126_v35 = vld [vmem:[%s7681_s3 + $0x124] ss:$24 sps:$4 sm:$0xff]  }
 0x639   :  { %v1692_v24 = vadd.f32 %v1691_v52, %v8410_v43  ;;  %8412 = vst [vmem:[#allocation13_spill] sm:$0xff] %v6119_v36  ;;  %8414 = vst [vmem:[#allocation36_spill] sm:$0xff] %v6126_v35 }
 0x63a   :  { %v1699_v11 = vmul.f32 0.125, %v1688_v60  ;;  %v1704_v62 = vmul.f32 0.125, %v1690_v18  ;;  %v8415_v60 = vld [vmem:[#allocation52_spill] sm:$0xff] }
 0x63b   :  { %3922 = vmatpush3.bf16.msra.mxu0 %v8411_v22  ;;  %1906 = vmatpush1.bf16.msra.mxu1 %v6119_v36  ;;  %v8416_v41 = vclamps-f32 %v8415_v60, 1.0  ;;  %v1705_v44 = vmul.f32 0.125, %v1692_v24  ;;  %v8418_v22 = vld [vmem:[#allocation10_spill] sm:$0xff]  ;;  %v8421_v36 = vld [vmem:[#allocation29_spill] sm:$0xff] }
 0x63c   :  { %3923 = vmatprep.subr.bf16.mxu0 %v8413_v30  ;;  %1907 = vmatprep.subr.bf16.mxu1 %v6126_v35  ;;  %v8419_v43 = vclamps-f32 %v8418_v22, 1.0  ;;  %v8422_v18 = vclamps-f32 %v8421_v36, 1.0  ;;  %v8424_v30 = vld [vmem:[#allocation11_spill] sm:$0xff]  ;;  %v8429_v22 = vld [vmem:[#allocation54_spill] sm:$0xff] }
 0x63d   :  { %v6131_v52 = vadd.f32 %v8416_v41, %v1699_v11  ;;  %v8425_v14 = vclamps-f32 %v8424_v30, 1.0  ;;  %v6149_v11 = vld [vmem:[%s7681_s3 + $0x120] ss:$24 sps:$4 sm:$0xff]   ;;  %v6157_v36 = vld [vmem:[%s7681_s3 + $0x154] ss:$24 sps:$4 sm:$0xff]  }
 0x63e   :  { %v6135_v57 = vadd.f32 %v8419_v43, %v1698_v33  ;;  %v6139_v34 = vadd.f32 %v8422_v18, %v1704_v62  ;;  %8428 = vst [vmem:[#allocation40_spill] sm:$0xff] %v6149_v11  ;;  %8430 = vst [vmem:[#allocation16_spill] sm:$0xff] %v6157_v36  ;;  %v8431_v62 = vld [vmem:[#allocation56_spill] sm:$0xff]  ;;  %v6171_v60 = vld [vmem:[%s7681_s3 + $0x150] ss:$24 sps:$4 sm:$0xff]  }
 0x63f   :  { %8417 = vst [vmem:[#allocation63_spill] sm:$0xff] %v6131_v52  ;;  %v6143_v49 = vadd.f32 %v8425_v14, %v1705_v44  ;;  %3924 = vmatpush3.bf16.msra.mxu0 %v8427_v31  ;;  %1908 = vmatpush1.bf16.msra.mxu1 %v6149_v11  ;;  %v7920_v14 = vclamps-f32 %v6131_v52, 1.0  ;;  %8432 = vst [vmem:[#allocation41_spill] sm:$0xff] %v6171_v60  ;;  %v8433_v44 = vld [vmem:[#allocation58_spill] sm:$0xff] }
 0x640   :  { %8420 = vst [vmem:[#allocation14_spill] sm:$0xff] %v6135_v57  ;;  %8423 = vst [vmem:[#allocation37_spill] sm:$0xff] %v6139_v34  ;;  %v7923_v43 = vclamps-f32 %v6139_v34, 1.0  ;;  %3925 = vmatprep.subr.bf16.mxu0 %v8429_v22  ;;  %1909 = vmatprep.subr.bf16.mxu1 %v6157_v36  ;;  %v7924_v33 = vclamps-f32 %v6135_v57, 1.0  ;;  %v6182_v18 = vld [vmem:[%s7681_s3 + $0x14] ss:$24 sps:$4 sm:$0xff]  }
 0x641   :  { %8426 = vst [vmem:[#allocation15_spill] sm:$0xff] %v6143_v49  ;;  %v7919_v30 = vclamps-f32 %v6143_v49, 1.0  ;;  %8434 = vst [vmem:[#allocation17_spill] sm:$0xff] %v6182_v18 }
 0x642   :  { %v1747_v41 = vpack.c.bf16 %v7923_v43, %v7924_v33  ;;  %v6192_v43 = vld [vmem:[%s7681_s3 + $0x6c] ss:$24 sps:$4 sm:$0xff]   ;;  %v6210_v33 = vld [vmem:[%s7681_s3 + $0x98] ss:$24 sps:$4 sm:$0xff]  }
 0x643   :  { %3926 = vmatpush3.bf16.msra.mxu0 %v8431_v62  ;;  %v1748_v24 = vpack.c.bf16 %v7919_v30, %v7920_v14  ;;  %1910 = vmatpush1.bf16.msra.mxu1 %v6171_v60  ;;  %v8435_v30 = vld [vmem:[#allocation60_spill] sm:$0xff]  ;;  %v8436_v14 = vld [vmem:[#allocation69_spill] sm:$0xff]  ;;  %v8437_v60 = vld [vmem:[#allocation70_spill] sm:$0xff]  ;;  %8438 = vst [vmem:[#allocation44_spill] sm:$0xff] %v6192_v43 }
 0x644   :  { %1938 = vmatprep.subr.bf16.mxu0 %v8433_v44  ;;  %1981 = vmatprep.subr.bf16.mxu1 %v6182_v18  ;;  %8441 = vst [vmem:[#allocation21_spill] sm:$0xff] %v6210_v33 }
 0x645   :  { %1867 = vmatprep.mubr.bf16.mxu0 %v1748_v24  ;;  %v6198_v24 = vld [vmem:[%s7681_s3 + $0x68] ss:$24 sps:$4 sm:$0xff]  }
 0x646   :  { %1868 = vmatmul.mubr.bf16.vlgmr.msra.gmra.mrb[40].mxu0 %v1747_v41  ;;  %8439 = vst [vmem:[#allocation18_spill] sm:$0xff] %v6198_v24  ;;  %v6204_v41 = vld [vmem:[%s7681_s3 + $0x9c] ss:$24 sps:$4 sm:$0xff]  }
 0x647   :  { %1939 = vmatpush1.bf16.msra.mxu0 %v8435_v30  ;;  %1970 = vmatprep.mubr.bf16.mxu0 %v8205_v40  ;;  %8440 = vst [vmem:[#allocation19_spill] sm:$0xff] %v6204_v41 }
 0x648   :  { %1940 = vmatprep.subr.bf16.mxu0 %v8436_v14 }
 0x64b   :  { %1941 = vmatpush1.bf16.msra.mxu0 %v8437_v60 }
 0x64c   :  { %1942 = vmatprep.subr.bf16.mxu0 %v6192_v43  ;;  %v6216_v43 = vld [vmem:[%s7681_s3 + $0xcc] ss:$24 sps:$4 sm:$0xff]  }
 0x64d   :  { %8442 = vst [vmem:[#allocation23_spill] sm:$0xff] %v6216_v43 }
 0x64f   :  { %1943 = vmatpush1.bf16.msra.mxu0 %v6198_v24  ;;  %v6222_v24 = vld [vmem:[%s7681_s3 + $0xc8] ss:$24 sps:$4 sm:$0xff]  }
 0x650   :  { %1944 = vmatprep.subr.bf16.mxu0 %v6204_v41  ;;  %8443 = vst [vmem:[#allocation20_spill] sm:$0xff] %v6222_v24  ;;  %v6228_v41 = vld [vmem:[%s7681_s3 + $0xfc] ss:$24 sps:$4 sm:$0xff]  }
 0x651   :  { %8444 = vst [vmem:[#allocation27_spill] sm:$0xff] %v6228_v41 }
 0x653   :  { %1945 = vmatpush1.bf16.msra.mxu0 %v6210_v33  ;;  %v6234_v33 = vld [vmem:[%s7681_s3 + $0xf8] ss:$24 sps:$4 sm:$0xff]  }
 0x654   :  { %1946 = vmatprep.subr.bf16.mxu0 %v6216_v43  ;;  %8445 = vst [vmem:[#allocation28_spill] sm:$0xff] %v6234_v33  ;;  %v6240_v43 = vld [vmem:[%s7681_s3 + $0x12c] ss:$24 sps:$4 sm:$0xff]  }
 0x655   :  { %8446 = vst [vmem:[#allocation52_spill] sm:$0xff] %v6240_v43 }
 0x657   :  { %1947 = vmatpush1.bf16.msra.mxu0 %v6222_v24  ;;  %v6246_v24 = vld [vmem:[%s7681_s3 + $0x128] ss:$24 sps:$4 sm:$0xff]  }
 0x658   :  { %1948 = vmatprep.subr.bf16.mxu0 %v6228_v41  ;;  %8447 = vst [vmem:[#allocation10_spill] sm:$0xff] %v6246_v24  ;;  %v6252_v41 = vld [vmem:[%s7681_s3 + $0x15c] ss:$24 sps:$4 sm:$0xff]  }
 0x659   :  { %8448 = vst [vmem:[#allocation29_spill] sm:$0xff] %v6252_v41 }
 0x65b   :  { %1949 = vmatpush1.bf16.msra.mxu0 %v6234_v33  ;;  %v6258_v33 = vld [vmem:[%s7681_s3 + $0x158] ss:$24 sps:$4 sm:$0xff]  }
 0x65c   :  { %1950 = vmatprep.subr.bf16.mxu0 %v6240_v43  ;;  %8449 = vst [vmem:[#allocation11_spill] sm:$0xff] %v6258_v33  ;;  %v8450_v43 = vld [vmem:[#allocation12_spill] sm:$0xff] }
 0x65f   :  { %1951 = vmatpush1.bf16.msra.mxu0 %v6246_v24  ;;  %v3604_v24 = vld [vmem:[%s7680_s2 + $0x3] ss:$0 sm:$0xff] }
 0x660   :  { %1952 = vmatprep.subr.bf16.mxu0 %v6252_v41 }
 0x663   :  { %1953 = vmatpush1.bf16.msra.mxu0 %v6258_v33 }
 0x664   :  { %3933 = vmatprep.subr.bf16.mxu0 %v8450_v43 }
 0x6f9   :  { %v3883_v60 = vpop.f32.mrb[36].mxu0  ;;  %v3905_v14 = vpop.f32.mrb[36].mxu1 }
 0x6fa   :  { %v3884_v30 = vpop.f32.mrb[37].mxu0  ;;  %v3906_v18 = vpop.f32.mrb[37].mxu1 }
 0x6fb   :  { %v3885_v44 = vadd.f32 %v3884_v30, %v3883_v60  ;;  %v3907_v62 = vadd.f32 %v3906_v18, %v3905_v14  ;;  %v3886_v41 = vpop.f32.mrb[38].mxu0  ;;  %v3908_v36 = vpop.f32.mrb[38].mxu1 }
 0x6fc   :  { %v3887_v22 = vpop.f32.mrb[39].mxu0  ;;  %v3909_v11 = vpop.f32.mrb[39].mxu1 }
 0x6fd   :  { %v1788_v31 = vadd.f32 %v3885_v44, %v3604_v24  ;;  %v3888_v49 = vadd.f32 %v3887_v22, %v3886_v41  ;;  %v3910_v34 = vadd.f32 %v3909_v11, %v3908_v36 }
 0x6ff   :  { %v1829_v33 = vadd.f32 %v3907_v62, %v1788_v31  ;;  %v1791_v57 = vadd.f32 %v3888_v49, %v3604_v24 }
 0x701   :  { %v1832_v43 = vadd.f32 %v3910_v34, %v1791_v57 }
 0x719   :  { %v3927_v52 = vpop.f32.mrb[40].mxu0 }
 0x71a   :  { %v3928_v35 = vpop.f32.mrb[41].mxu0 }
 0x71b   :  { %v3929_v50 = vadd.f32 %v3928_v35, %v3927_v52  ;;  %v3930_v28 = vpop.f32.mrb[42].mxu0 }
 0x71c   :  { %v3931_v13 = vpop.f32.mrb[43].mxu0 }
 0x71d   :  { %v1870_v6 = vadd.f32 %v3929_v50, %v1829_v33  ;;  %v3932_v16 = vadd.f32 %v3931_v13, %v3930_v28 }
 0x71f   :  { %v1876_v53 = vmul.f32 %v1870_v6, %v1870_v6  ;;  %v1873_v30 = vadd.f32 %v3932_v16, %v1832_v43 }
 0x721   :  { %v1878_v14 = vmul.f32 %v1876_v53, %v1870_v6  ;;  %v1877_v60 = vmul.f32 %v1873_v30, %v1873_v30  ;;  %v6289_v53 = vld [vmem:[%s7681_s3 + $0x74] ss:$24 sps:$4 sm:$0xff]  }
 0x723   :  { %v1880_v18 = vmul.f32 0.044715, %v1878_v14  ;;  %v1879_v51 = vmul.f32 %v1877_v60, %v1873_v30 }
 0x725   :  { %v1882_v45 = vadd.f32 %v1880_v18, %v1870_v6  ;;  %v1881_v44 = vmul.f32 0.044715, %v1879_v51  ;;  %v6268_v51 = vld [vmem:[%s7681_s3 + $0x10] ss:$24 sps:$4 sm:$0xff]   ;;  %v8459_v18 = vclamps-f32 %v5986_v25, 1.0 }
 0x726   :  { %v8465_v25 = vld [vmem:[#allocation42_spill] sm:$0xff] }
 0x727   :  { %v1884_v22 = vmul.f32 0.7978846, %v1882_v45  ;;  %v1883_v11 = vadd.f32 %v1881_v44, %v1873_v30  ;;  %v6275_v45 = vld [vmem:[%s7681_s3 + $0x44] ss:$24 sps:$4 sm:$0xff]  }
 0x729   :  { %4334 = vtanh.f32 %v1884_v22  ;;  %v1885_v31 = vmul.f32 0.7978846, %v1883_v11  ;;  %v8460_v22 = vclamps-f32 %v5990_v47, 1.0  ;;  %v8467_v47 = vld [vmem:[#allocation43_spill] sm:$0xff] }
 0x72b   :  { %4336 = vtanh.f32 %v1885_v31 }
 0x733   :  { %v4335_v57 = vpop.eup %4334 }
 0x734   :  { %v1888_v49 = vadd.f32 1.0, %v4335_v57 }
 0x735   :  { %v4337_v34 = vpop.eup %4336 }
 0x736   :  { %v1889_v35 = vadd.f32 1.0, %v4337_v34  ;;  %v1890_v52 = vmul.f32 0.5, %v1888_v49  ;;  %v8461_v49 = vclamps-f32 %v5994_v7, 1.0 }
 0x738   :  { %v1891_v50 = vmul.f32 0.5, %v1889_v35  ;;  %v1892_v28 = vmul.f32 %v1890_v52, %v1870_v6  ;;  %v6283_v6 = vld [vmem:[%s7681_s3 + $0x40] ss:$24 sps:$4 sm:$0xff]   ;;  %v8462_v35 = vclamps-f32 %v5998_v42, 1.0 }
 0x73a   :  { %v1893_v13 = vmul.f32 %v1891_v50, %v1873_v30  ;;  %v8463_v50 = vld [vmem:[#allocation39_spill] sm:$0xff] }
 0x73c   :  { %v1894_v16 = vpack.c.bf16 %v1893_v13, %v1892_v28  ;;  %v8464_v28 = vclamps-f32 %v8463_v50, 1.0  ;;  %v8486_v50 = vld [vmem:[#allocation33_spill] sm:$0xff] }
 0x73e   :  { %1928 = vmatmul.mubr.bf16.vlgmr.msra.gmra.mrb[40].mxu1 %v1894_v16  ;;  %1971 = vmatmul.mubr.bf16.vlgmr.msra.gmra.mrb[44].mxu0 %v1894_v16 }
 0x73f   :  { %1982 = vmatpush1.bf16.msra.mxu1 %v6268_v51  ;;  %2013 = vmatprep.mubr.bf16.mxu1 %v8205_v40 }
 0x740   :  { %1983 = vmatprep.subr.bf16.mxu1 %v6275_v45  ;;  %3934 = vmatpush3.bf16.msra.mxu0 %v5475_v56  ;;  %v6297_v56 = vld [vmem:[%s7681_s3 + $0x70] ss:$24 sps:$4 sm:$0xff]  }
 0x741   :  { %3935 = vmatprep.subr.bf16.mxu0 %v5481_v2  ;;  %v6303_v2 = vld [vmem:[%s7681_s3 + $0xa4] ss:$24 sps:$4 sm:$0xff]  }
 0x743   :  { %1984 = vmatpush1.bf16.msra.mxu1 %v6283_v6 }
 0x744   :  { %1985 = vmatprep.subr.bf16.mxu1 %v6289_v53  ;;  %3936 = vmatpush3.bf16.msra.mxu0 %v5489_v23  ;;  %v6311_v23 = vld [vmem:[%s7681_s3 + $0xa0] ss:$24 sps:$4 sm:$0xff]  }
 0x745   :  { %3937 = vmatprep.subr.bf16.mxu0 %v5495_v26  ;;  %v6317_v26 = vld [vmem:[%s7681_s3 + $0xd4] ss:$24 sps:$4 sm:$0xff]  }
 0x747   :  { %1986 = vmatpush1.bf16.msra.mxu1 %v6297_v56 }
 0x748   :  { %1987 = vmatprep.subr.bf16.mxu1 %v6303_v2  ;;  %3938 = vmatpush3.bf16.msra.mxu0 %v5503_v37  ;;  %v6325_v37 = vld [vmem:[%s7681_s3 + $0xd0] ss:$24 sps:$4 sm:$0xff]  }
 0x749   :  { %3939 = vmatprep.subr.bf16.mxu0 %v5509_v63  ;;  %v6331_v63 = vld [vmem:[%s7681_s3 + $0x104] ss:$24 sps:$4 sm:$0xff]  }
 0x74b   :  { %1988 = vmatpush1.bf16.msra.mxu1 %v6311_v23 }
 0x74c   :  { %1989 = vmatprep.subr.bf16.mxu1 %v6317_v26  ;;  %3940 = vmatpush3.bf16.msra.mxu0 %v5517_v3  ;;  %v6339_v3 = vld [vmem:[%s7681_s3 + $0x100] ss:$24 sps:$4 sm:$0xff]  }
 0x74d   :  { %3941 = vmatprep.subr.bf16.mxu0 %v5523_v10  ;;  %v6345_v10 = vld [vmem:[%s7681_s3 + $0x134] ss:$24 sps:$4 sm:$0xff]  }
 0x74f   :  { %1990 = vmatpush1.bf16.msra.mxu1 %v6325_v37 }
 0x750   :  { %1991 = vmatprep.subr.bf16.mxu1 %v6331_v63  ;;  %3942 = vmatpush3.bf16.msra.mxu0 %v5531_v55  ;;  %v6353_v55 = vld [vmem:[%s7681_s3 + $0x130] ss:$24 sps:$4 sm:$0xff]  }
 0x751   :  { %3943 = vmatprep.subr.bf16.mxu0 %v5537_v38  ;;  %8451 = vst [vmem:[#allocation12_spill] sm:$0xff] %v6353_v55  ;;  %v6359_v38 = vld [vmem:[%s7681_s3 + $0x164] ss:$24 sps:$4 sm:$0xff]  }
 0x752   :  { %8452 = vst [vmem:[#allocation71_spill] sm:$0xff] %v6359_v38 }
 0x753   :  { %1992 = vmatpush1.bf16.msra.mxu1 %v6339_v3 }
 0x754   :  { %1993 = vmatprep.subr.bf16.mxu1 %v6345_v10  ;;  %3944 = vmatpush3.bf16.msra.mxu0 %v5545_v48  ;;  %v6367_v48 = vld [vmem:[%s7681_s3 + $0x160] ss:$24 sps:$4 sm:$0xff]  }
 0x755   :  { %3945 = vmatprep.subr.bf16.mxu0 %v8353_v32  ;;  %8453 = vst [vmem:[#allocation72_spill] sm:$0xff] %v6367_v48  ;;  %v8454_v32 = vld [vmem:[#allocation22_spill] sm:$0xff] }
 0x757   :  { %1994 = vmatpush1.bf16.msra.mxu1 %v6353_v55 }
 0x758   :  { %1995 = vmatprep.subr.bf16.mxu1 %v6359_v38  ;;  %3946 = vmatpush3.bf16.msra.mxu0 %v8356_v59  ;;  %v8455_v59 = vld [vmem:[#allocation24_spill] sm:$0xff] }
 0x759   :  { %3947 = vmatprep.subr.bf16.mxu0 %v8357_v0  ;;  %v8456_v0 = vld [vmem:[#allocation25_spill] sm:$0xff] }
 0x75b   :  { %1996 = vmatpush1.bf16.msra.mxu1 %v6367_v48 }
 0x75c   :  { %3955 = vmatprep.subr.bf16.mxu1 %v8359_v1  ;;  %3948 = vmatpush3.bf16.msra.mxu0 %v8360_v4  ;;  %v8457_v1 = vld [vmem:[#allocation38_spill] sm:$0xff] }
 0x75d   :  { %3977 = vmatprep.subr.bf16.mxu0 %v8361_v5 }
 0x75e   :  { %2014 = vmatmul.mubr.bf16.vlgmr.msra.gmra.mrb[44].mxu1 %v1894_v16  ;;  %v8466_v16 = vclamps-f32 %v8465_v25, 1.0  ;;  %v8487_v25 = vld [vmem:[#allocation68_spill] sm:$0xff] }
 0x75f   :  { %3956 = vmatpush3.bf16.msra.mxu1 %v8362_v8 }
 0x760   :  { %3957 = vmatprep.subr.bf16.mxu1 %v8363_v9  ;;  %v8458_v9 = vld [vmem:[#allocation64_spill] sm:$0xff] }
 0x763   :  { %3958 = vmatpush3.bf16.msra.mxu1 %v8364_v12 }
 0x764   :  { %3959 = vmatprep.subr.bf16.mxu1 %v8365_v21 }
 0x767   :  { %3960 = vmatpush3.bf16.msra.mxu1 %v8366_v27 }
 0x768   :  { %3961 = vmatprep.subr.bf16.mxu1 %v8367_v29 }
 0x76b   :  { %3962 = vmatpush3.bf16.msra.mxu1 %v8368_v54 }
 0x76c   :  { %3963 = vmatprep.subr.bf16.mxu1 %v8369_v39 }
 0x76f   :  { %3964 = vmatpush3.bf16.msra.mxu1 %v8370_v61 }
 0x770   :  { %3965 = vmatprep.subr.bf16.mxu1 %v8371_v17 }
 0x773   :  { %3966 = vmatpush3.bf16.msra.mxu1 %v8372_v46 }
 0x774   :  { %3967 = vmatprep.subr.bf16.mxu1 %v8373_v58 }
 0x777   :  { %3968 = vmatpush3.bf16.msra.mxu1 %v8454_v32 }
 0x778   :  { %3969 = vmatprep.subr.bf16.mxu1 %v8455_v59  ;;  %v8468_v59 = vclamps-f32 %v8467_v47, 1.0  ;;  %v8489_v47 = vld [vmem:[#allocation8_spill] sm:$0xff] }
 0x77b   :  { %3970 = vmatpush3.bf16.msra.mxu1 %v8456_v0 }
 0x77c   :  { %2225 = vmatprep.subr.bf16.mxu1 %v8457_v1 }
 0x811   :  { %v1929_v4 = vpop.f32.mrb[40].mxu1  ;;  %v1972_v5 = vpop.f32.mrb[44].mxu0 }
 0x812   :  { %v1930_v8 = vadd.f32 %v1929_v4, %v5308_v15  ;;  %v1973_v12 = vadd.f32 %v1972_v5, %v8458_v9  ;;  %v1931_v21 = vpop.f32.mrb[41].mxu1  ;;  %v1974_v27 = vpop.f32.mrb[45].mxu0  ;;  %v8469_v4 = vld [vmem:[#allocation46_spill] sm:$0xff] }
 0x813   :  { %v1932_v29 = vadd.f32 %v1931_v21, %v5314_v19  ;;  %v1975_v54 = vadd.f32 %v1974_v27, %v5317_v20  ;;  %v1933_v39 = vpop.f32.mrb[42].mxu1  ;;  %v1976_v61 = vpop.f32.mrb[46].mxu0  ;;  %v8470_v7 = vclamps-f32 %v8469_v4, 1.0 }
 0x814   :  { %v2024_v17 = vmul.f32 0.125, %v1930_v8  ;;  %v2026_v46 = vmul.f32 0.125, %v1973_v12  ;;  %v1934_v58 = vadd.f32 %v1933_v39, %v5308_v15  ;;  %v1977_v36 = vadd.f32 %v1976_v61, %v8458_v9  ;;  %v1935_v33 = vpop.f32.mrb[43].mxu1  ;;  %v1978_v62 = vpop.f32.mrb[47].mxu0 }
 0x815   :  { %v2025_v24 = vmul.f32 0.125, %v1932_v29  ;;  %v2027_v41 = vmul.f32 0.125, %v1975_v54  ;;  %v1936_v43 = vadd.f32 %v1935_v33, %v5314_v19  ;;  %v1979_v30 = vadd.f32 %v1978_v62, %v5317_v20  ;;  %v8472_v33 = vld [vmem:[#allocation47_spill] sm:$0xff]  ;;  %v8473_v62 = vld [vmem:[#allocation30_spill] sm:$0xff] }
 0x816   :  { %v2030_v14 = vmul.f32 0.125, %v1934_v58  ;;  %v2032_v60 = vmul.f32 0.125, %v1977_v36  ;;  %v6407_v34 = vadd.f32 %v8461_v49, %v2024_v17  ;;  %v6411_v52 = vadd.f32 %v8462_v35, %v2026_v46  ;;  %v8471_v36 = vld [vmem:[#allocation26_spill] sm:$0xff]  ;;  %v8484_v49 = vld [vmem:[#allocation59_spill] sm:$0xff] }
 0x817   :  { %v6399_v44 = vadd.f32 %v8459_v18, %v2025_v24  ;;  %v6403_v11 = vadd.f32 %v8460_v22, %v2027_v41  ;;  %v2031_v31 = vmul.f32 0.125, %v1936_v43  ;;  %v2033_v57 = vmul.f32 0.125, %v1979_v30  ;;  %v8474_v24 = vld [vmem:[#allocation49_spill] sm:$0xff]  ;;  %v8475_v41 = vld [vmem:[#allocation31_spill] sm:$0xff]  ;;  %v8477_v30 = vld [vmem:[#allocation34_spill] sm:$0xff] }
 0x818   :  { %v6415_v13 = vadd.f32 %v8464_v28, %v2030_v14  ;;  %v6419_v32 = vadd.f32 %v8466_v16, %v2032_v60  ;;  %v7976_v54 = vclamps-f32 %v6407_v34, 1.0  ;;  %v7975_v39 = vclamps-f32 %v6411_v52, 1.0  ;;  %v8476_v43 = vld [vmem:[#allocation51_spill] sm:$0xff]  ;;  %v8478_v14 = vld [vmem:[#allocation53_spill] sm:$0xff] }
 0x819   :  { %v6423_v0 = vadd.f32 %v8468_v59, %v2031_v31  ;;  %v6427_v5 = vadd.f32 %v8470_v7, %v2033_v57  ;;  %v7982_v12 = vclamps-f32 %v6399_v44, 1.0  ;;  %v7981_v21 = vclamps-f32 %v6403_v11, 1.0  ;;  %v8479_v60 = vld [vmem:[#allocation35_spill] sm:$0xff]  ;;  %v8481_v22 = vld [vmem:[#allocation65_spill] sm:$0xff]  ;;  %v8483_v57 = vld [vmem:[#allocation66_spill] sm:$0xff] }
 0x81a   :  { %v7974_v42 = vclamps-f32 %v6415_v13, 1.0  ;;  %v7973_v8 = vclamps-f32 %v6419_v32, 1.0  ;;  %v8480_v18 = vld [vmem:[#allocation55_spill] sm:$0xff]  ;;  %v8482_v31 = vld [vmem:[#allocation57_spill] sm:$0xff] }
 0x81b   :  { %v7972_v27 = vclamps-f32 %v6423_v0, 1.0  ;;  %v7971_v29 = vclamps-f32 %v6427_v5, 1.0  ;;  %v8485_v35 = vld [vmem:[#allocation67_spill] sm:$0xff]  ;;  %v8488_v16 = vld [vmem:[#allocation61_spill] sm:$0xff] }
 0x81c   :  { %v2073_v46 = vpack.c.bf16 %v7974_v42, %v7976_v54  ;;  %v2075_v58 = vpack.c.bf16 %v7973_v8, %v7975_v39  ;;  %v8490_v7 = vld [vmem:[#allocation45_spill] sm:$0xff]  ;;  %v8510_v54 = vld [vmem:[#allocation40_spill] sm:$0xff] }
 0x81d   :  { %v2074_v61 = vpack.c.bf16 %v7972_v27, %v7982_v12  ;;  %v2076_v17 = vpack.c.bf16 %v7971_v29, %v7981_v21  ;;  %v8500_v27 = vld [vmem:[#allocation14_spill] sm:$0xff]  ;;  %v8531_v21 = vld [vmem:[#allocation11_spill] sm:$0xff]  ;;  %v6537_v12 = vld [vmem:[%s7679_s1 + $0x40] sm:$0xff]  }
 0x81e   :  { %8532 = vst [vmem:[#allocation39_spill] sm:$0xff] %v6537_v12 }
 0x81f   :  { %2115 = vmatprep.mubr.bf16.mxu0 %v2074_v61  ;;  %2156 = vmatprep.mubr.bf16.mxu1 %v2076_v17  ;;  %v8491_v61 = vld [vmem:[#allocation62_spill] sm:$0xff]  ;;  %v8492_v17 = vld [vmem:[#allocation9_spill] sm:$0xff] }
 0x820   :  { %2116 = vmatmul.mubr.bf16.vlgmr.msra.gmra.mrb[48].mxu0 %v2073_v46  ;;  %2157 = vmatmul.mubr.bf16.vlgmr.msra.gmra.mrb[48].mxu1 %v2075_v58 }
 0x821   :  { %3978 = vmatpush3.bf16.msra.mxu0 %v8471_v36  ;;  %2226 = vmatpush1.bf16.msra.mxu1 %v8472_v33 }
 0x822   :  { %3979 = vmatprep.subr.bf16.mxu0 %v8473_v62  ;;  %2227 = vmatprep.subr.bf16.mxu1 %v8474_v24 }
 0x823   :  { %2257 = vmatprep.mubr.bf16.mxu1 %v8205_v40 }
 0x825   :  { %3980 = vmatpush3.bf16.msra.mxu0 %v8475_v41  ;;  %2228 = vmatpush1.bf16.msra.mxu1 %v8476_v43 }
 0x826   :  { %3981 = vmatprep.subr.bf16.mxu0 %v8477_v30  ;;  %2229 = vmatprep.subr.bf16.mxu1 %v8478_v14 }
 0x829   :  { %3982 = vmatpush3.bf16.msra.mxu0 %v8479_v60  ;;  %2230 = vmatpush1.bf16.msra.mxu1 %v8480_v18 }
 0x82a   :  { %3983 = vmatprep.subr.bf16.mxu0 %v8481_v22  ;;  %2231 = vmatprep.subr.bf16.mxu1 %v8482_v31  ;;  %v8493_v22 = vld [vmem:[#allocation48_spill] sm:$0xff] }
 0x82d   :  { %3984 = vmatpush3.bf16.msra.mxu0 %v8483_v57  ;;  %2232 = vmatpush1.bf16.msra.mxu1 %v8484_v49  ;;  %v8494_v57 = vld [vmem:[#allocation13_spill] sm:$0xff] }
 0x82e   :  { %3985 = vmatprep.subr.bf16.mxu0 %v8485_v35  ;;  %2233 = vmatprep.subr.bf16.mxu1 %v8486_v50 }
 0x831   :  { %v2015_v28 = vpop.f32.mrb[44].mxu1  ;;  %3986 = vmatpush3.bf16.msra.mxu0 %v8487_v25  ;;  %2234 = vmatpush1.bf16.msra.mxu1 %v8488_v16  ;;  %v8496_v25 = vld [vmem:[#allocation36_spill] sm:$0xff] }
 0x832   :  { %v2016_v59 = vadd.f32 %v2015_v28, %v8489_v47  ;;  %v2017_v4 = vpop.f32.mrb[45].mxu1  ;;  %3987 = vmatprep.subr.bf16.mxu0 %v8490_v7  ;;  %2235 = vmatprep.subr.bf16.mxu1 %v8491_v61  ;;  %v8495_v28 = vld [vmem:[#allocation50_spill] sm:$0xff]  ;;  %v8497_v7 = vld [vmem:[#allocation63_spill] sm:$0xff] }
 0x833   :  { %v2018_v46 = vadd.f32 %v2017_v4, %v8492_v17  ;;  %v2019_v58 = vpop.f32.mrb[46].mxu1  ;;  %v8498_v29 = vclamps-f32 %v8497_v7, 1.0  ;;  %v8513_v7 = vld [vmem:[#allocation56_spill] sm:$0xff] }
 0x834   :  { %v2028_v36 = vmul.f32 0.125, %v2016_v59  ;;  %v2020_v62 = vadd.f32 %v2019_v58, %v8489_v47  ;;  %v2021_v41 = vpop.f32.mrb[47].mxu1  ;;  %v8501_v58 = vclamps-f32 %v8500_v27, 1.0 }
 0x835   :  { %v2029_v30 = vmul.f32 0.125, %v2018_v46  ;;  %v2022_v60 = vadd.f32 %v2021_v41, %v8492_v17  ;;  %3988 = vmatpush3.bf16.msra.mxu0 %v8493_v22  ;;  %2236 = vmatpush1.bf16.msra.mxu1 %v8494_v57  ;;  %v8503_v46 = vld [vmem:[#allocation37_spill] sm:$0xff]  ;;  %v8506_v22 = vld [vmem:[#allocation15_spill] sm:$0xff] }
 0x836   :  { %v2034_v35 = vmul.f32 0.125, %v2020_v62  ;;  %3989 = vmatprep.subr.bf16.mxu0 %v8495_v28  ;;  %2237 = vmatprep.subr.bf16.mxu1 %v8496_v25  ;;  %v6488_v8 = vadd.f32 %v8501_v58, %v2028_v36  ;;  %v8504_v41 = vclamps-f32 %v8503_v46, 1.0  ;;  %v8507_v39 = vclamps-f32 %v8506_v22, 1.0  ;;  %v8509_v28 = vld [vmem:[#allocation32_spill] sm:$0xff]  ;;  %v8515_v46 = vld [vmem:[#allocation58_spill] sm:$0xff] }
 0x837   :  { %v6484_v4 = vadd.f32 %v8498_v29, %v2029_v30  ;;  %v2035_v59 = vmul.f32 0.125, %v2022_v60  ;;  %v8511_v30 = vld [vmem:[#allocation54_spill] sm:$0xff]  ;;  %v8512_v60 = vld [vmem:[#allocation16_spill] sm:$0xff] }
 0x838   :  { %8502 = vst [vmem:[#allocation24_spill] sm:$0xff] %v6488_v8  ;;  %v6492_v42 = vadd.f32 %v8504_v41, %v2034_v35  ;;  %v7980_v35 = vclamps-f32 %v6488_v8, 1.0  ;;  %v8516_v41 = vld [vmem:[#allocation17_spill] sm:$0xff]  ;;  %v8517_v22 = vld [vmem:[#allocation60_spill] sm:$0xff] }
 0x839   :  { %8499 = vst [vmem:[#allocation22_spill] sm:$0xff] %v6484_v4  ;;  %v6496_v62 = vadd.f32 %v8507_v39, %v2035_v59  ;;  %3990 = vmatpush3.bf16.msra.mxu0 %v8509_v28  ;;  %2238 = vmatpush1.bf16.msra.mxu1 %v8510_v54  ;;  %v7978_v27 = vclamps-f32 %v6484_v4, 1.0  ;;  %v8514_v59 = vld [vmem:[#allocation41_spill] sm:$0xff] }
 0x83a   :  { %8505 = vst [vmem:[#allocation25_spill] sm:$0xff] %v6492_v42  ;;  %v7979_v29 = vclamps-f32 %v6492_v42, 1.0  ;;  %3991 = vmatprep.subr.bf16.mxu0 %v8511_v30  ;;  %2239 = vmatprep.subr.bf16.mxu1 %v8512_v60  ;;  %v8518_v28 = vld [vmem:[#allocation69_spill] sm:$0xff]  ;;  %v8519_v30 = vld [vmem:[#allocation70_spill] sm:$0xff] }
 0x83b   :  { %8508 = vst [vmem:[#allocation38_spill] sm:$0xff] %v6496_v62  ;;  %v7977_v36 = vclamps-f32 %v6496_v62, 1.0 }
 0x83c   :  { %v2077_v58 = vpack.c.bf16 %v7979_v29, %v7980_v35  ;;  %v8523_v29 = vld [vmem:[#allocation21_spill] sm:$0xff]  ;;  %v8528_v35 = vld [vmem:[#allocation52_spill] sm:$0xff] }
 0x83d   :  { %3992 = vmatpush3.bf16.msra.mxu0 %v8513_v7  ;;  %v2078_v39 = vpack.c.bf16 %v7977_v36, %v7978_v27  ;;  %2240 = vmatpush1.bf16.msra.mxu1 %v8514_v59  ;;  %v8520_v7 = vld [vmem:[#allocation44_spill] sm:$0xff]  ;;  %v8521_v36 = vld [vmem:[#allocation18_spill] sm:$0xff]  ;;  %v8522_v27 = vld [vmem:[#allocation19_spill] sm:$0xff] }
 0x83e   :  { %2268 = vmatprep.subr.bf16.mxu0 %v8515_v46  ;;  %2311 = vmatprep.subr.bf16.mxu1 %v8516_v41  ;;  %v8524_v46 = vld [vmem:[#allocation23_spill] sm:$0xff] }
 0x83f   :  { %2197 = vmatprep.mubr.bf16.mxu0 %v2078_v39  ;;  %v8525_v39 = vld [vmem:[#allocation20_spill] sm:$0xff] }
 0x840   :  { %2198 = vmatmul.mubr.bf16.vlgmr.msra.gmra.mrb[52].mxu0 %v2077_v58  ;;  %v8526_v58 = vld [vmem:[#allocation27_spill] sm:$0xff] }
 0x841   :  { %2269 = vmatpush1.bf16.msra.mxu0 %v8517_v22  ;;  %2300 = vmatprep.mubr.bf16.mxu0 %v8205_v40  ;;  %v8527_v22 = vld [vmem:[#allocation28_spill] sm:$0xff] }
 0x842   :  { %2270 = vmatprep.subr.bf16.mxu0 %v8518_v28  ;;  %v8529_v28 = vld [vmem:[#allocation10_spill] sm:$0xff] }
 0x845   :  { %2271 = vmatpush1.bf16.msra.mxu0 %v8519_v30  ;;  %v8530_v30 = vld [vmem:[#allocation29_spill] sm:$0xff] }
 0x846   :  { %2272 = vmatprep.subr.bf16.mxu0 %v8520_v7 }
 0x849   :  { %2273 = vmatpush1.bf16.msra.mxu0 %v8521_v36 }
 0x84a   :  { %2274 = vmatprep.subr.bf16.mxu0 %v8522_v27 }
 0x84d   :  { %2275 = vmatpush1.bf16.msra.mxu0 %v8523_v29 }
 0x84e   :  { %2276 = vmatprep.subr.bf16.mxu0 %v8524_v46 }
 0x851   :  { %2277 = vmatpush1.bf16.msra.mxu0 %v8525_v39 }
 0x852   :  { %2278 = vmatprep.subr.bf16.mxu0 %v8526_v58 }
 0x855   :  { %2279 = vmatpush1.bf16.msra.mxu0 %v8527_v22  ;;  %v3617_v22 = vld [vmem:[%s7680_s2 + $0x4] ss:$0 sm:$0xff] }
 0x856   :  { %2280 = vmatprep.subr.bf16.mxu0 %v8528_v35 }
 0x859   :  { %2281 = vmatpush1.bf16.msra.mxu0 %v8529_v28 }
 0x85a   :  { %2282 = vmatprep.subr.bf16.mxu0 %v8530_v30 }
 0x85d   :  { %2283 = vmatpush1.bf16.msra.mxu0 %v8531_v21 }
 0x85e   :  { %3999 = vmatprep.subr.bf16.mxu0 %v6537_v12 }
 0x8f3   :  { %v3949_v39 = vpop.f32.mrb[48].mxu0  ;;  %v3971_v46 = vpop.f32.mrb[48].mxu1 }
 0x8f4   :  { %v3950_v35 = vpop.f32.mrb[49].mxu0  ;;  %v3972_v58 = vpop.f32.mrb[49].mxu1 }
 0x8f5   :  { %v3951_v28 = vadd.f32 %v3950_v35, %v3949_v39  ;;  %v3973_v29 = vadd.f32 %v3972_v58, %v3971_v46  ;;  %v3952_v30 = vpop.f32.mrb[50].mxu0  ;;  %v3974_v27 = vpop.f32.mrb[50].mxu1 }
 0x8f6   :  { %v3953_v21 = vpop.f32.mrb[51].mxu0  ;;  %v3975_v36 = vpop.f32.mrb[51].mxu1 }
 0x8f7   :  { %v2118_v7 = vadd.f32 %v3951_v28, %v3617_v22  ;;  %v3954_v41 = vadd.f32 %v3953_v21, %v3952_v30  ;;  %v3976_v59 = vadd.f32 %v3975_v36, %v3974_v27  ;;  %v6611_v30 = vld [vmem:[%s7679_s1 + $0x68] sm:$0xff]  }
 0x8f9   :  { %v2159_v60 = vadd.f32 %v3973_v29, %v2118_v7  ;;  %v2121_v54 = vadd.f32 %v3954_v41, %v3617_v22  ;;  %v6591_v41 = vld [vmem:[%s7679_s1 + $0x18] sm:$0xff]   ;;  %v6597_v7 = vld [vmem:[%s7679_s1 + $0x60] sm:$0xff]  }
 0x8fa   :  { %v6605_v22 = vld [vmem:[%s7679_s1 + $0x20] sm:$0xff]  }
 0x8fb   :  { %v2162_v12 = vadd.f32 %v3976_v59, %v2121_v54 }
 0x913   :  { %v3993_v62 = vpop.f32.mrb[52].mxu0 }
 0x914   :  { %v3994_v42 = vpop.f32.mrb[53].mxu0 }
 0x915   :  { %v3995_v8 = vadd.f32 %v3994_v42, %v3993_v62  ;;  %v3996_v4 = vpop.f32.mrb[54].mxu0 }
 0x916   :  { %v3997_v25 = vpop.f32.mrb[55].mxu0 }
 0x917   :  { %v2200_v57 = vadd.f32 %v3995_v8, %v2159_v60  ;;  %v3998_v17 = vadd.f32 %v3997_v25, %v3996_v4  ;;  %v6583_v60 = vld [vmem:[%s7679_s1 + $0x58] sm:$0xff]  }
 0x919   :  { %v2206_v61 = vmul.f32 %v2200_v57, %v2200_v57  ;;  %v2203_v35 = vadd.f32 %v3998_v17, %v2162_v12  ;;  %v6569_v17 = vld [vmem:[%s7679_s1 + $0x50] sm:$0xff]  }
 0x91b   :  { %v2208_v46 = vmul.f32 %v2206_v61, %v2200_v57  ;;  %v2207_v39 = vmul.f32 %v2203_v35, %v2203_v35  ;;  %v6563_v61 = vld [vmem:[%s7679_s1 + $0x8] sm:$0xff]  }
 0x91d   :  { %v2210_v58 = vmul.f32 0.044715, %v2208_v46  ;;  %v2209_v47 = vmul.f32 %v2207_v39, %v2203_v35  ;;  %v6625_v46 = vld [vmem:[%s7679_s1 + $0x70] sm:$0xff]  }
 0x91e   :  { %8533 = vst [vmem:[#allocation42_spill] sm:$0xff] %v6625_v46  ;;  %v6633_v39 = vld [vmem:[%s7679_s1 + $0x30] sm:$0xff]  }
 0x91f   :  { %v2212_v16 = vadd.f32 %v2210_v58, %v2200_v57  ;;  %v2211_v28 = vmul.f32 0.044715, %v2209_v47  ;;  %v6555_v47 = vld [vmem:[%s7679_s1 + $0x48] sm:$0xff]   ;;  %8534 = vst [vmem:[#allocation43_spill] sm:$0xff] %v6633_v39  ;;  %v6639_v58 = vld [vmem:[%s7679_s1 + $0x78] sm:$0xff]  }
 0x920   :  { %8535 = vst [vmem:[#allocation46_spill] sm:$0xff] %v6639_v58 }
 0x921   :  { %v2214_v21 = vmul.f32 0.7978846, %v2212_v16  ;;  %v2213_v27 = vadd.f32 %v2211_v28, %v2203_v35  ;;  %v6549_v16 = vld [vmem:[%s7679_s1] sm:$0xff]  }
 0x922   :  { %v6646_v28 = vld [vmem:[%s7679_s1 + $0xc0] sm:$0xff]  }
 0x923   :  { %4338 = vtanh.f32 %v2214_v21  ;;  %v2215_v29 = vmul.f32 0.7978846, %v2213_v27  ;;  %8536 = vst [vmem:[#allocation26_spill] sm:$0xff] %v6646_v28  ;;  %v6652_v21 = vld [vmem:[%s7679_s1 + $0x38] sm:$0xff]   ;;  %v6658_v27 = vld [vmem:[%s7679_s1 + $0x140] sm:$0xff]  }
 0x924   :  { %8537 = vst [vmem:[#allocation47_spill] sm:$0xff] %v6652_v21  ;;  %8538 = vst [vmem:[#allocation30_spill] sm:$0xff] %v6658_v27 }
 0x925   :  { %4340 = vtanh.f32 %v2215_v29  ;;  %v6664_v29 = vld [vmem:[%s7679_s1 + $0x80] sm:$0xff]  }
 0x926   :  { %8539 = vst [vmem:[#allocation49_spill] sm:$0xff] %v6664_v29 }
 0x92d   :  { %v4339_v54 = vpop.eup %4338 }
 0x92e   :  { %v2218_v36 = vadd.f32 1.0, %v4339_v54  ;;  %v6670_v54 = vld [vmem:[%s7679_s1 + $0xc8] sm:$0xff]  }
 0x92f   :  { %v4341_v42 = vpop.eup %4340  ;;  %8540 = vst [vmem:[#allocation31_spill] sm:$0xff] %v6670_v54 }
 0x930   :  { %v2219_v62 = vadd.f32 1.0, %v4341_v42  ;;  %v2220_v59 = vmul.f32 0.5, %v2218_v36  ;;  %v6676_v36 = vld [vmem:[%s7679_s1 + $0x88] sm:$0xff]   ;;  %v6682_v42 = vld [vmem:[%s7679_s1 + $0xd0] sm:$0xff]  }
 0x931   :  { %8541 = vst [vmem:[#allocation51_spill] sm:$0xff] %v6676_v36  ;;  %8542 = vst [vmem:[#allocation34_spill] sm:$0xff] %v6682_v42 }
 0x932   :  { %v2221_v8 = vmul.f32 0.5, %v2219_v62  ;;  %v2222_v25 = vmul.f32 %v2220_v59, %v2200_v57  ;;  %v6577_v57 = vld [vmem:[%s7679_s1 + $0x10] sm:$0xff]   ;;  %v6694_v59 = vld [vmem:[%s7679_s1 + $0xd8] sm:$0xff]  }
 0x933   :  { %v6688_v62 = vld [vmem:[%s7679_s1 + $0x90] sm:$0xff]   ;;  %8544 = vst [vmem:[#allocation35_spill] sm:$0xff] %v6694_v59 }
 0x934   :  { %v2223_v4 = vmul.f32 %v2221_v8, %v2203_v35  ;;  %v6619_v35 = vld [vmem:[%s7679_s1 + $0x28] sm:$0xff]   ;;  %8543 = vst [vmem:[#allocation53_spill] sm:$0xff] %v6688_v62  ;;  %v6700_v8 = vld [vmem:[%s7679_s1 + $0x98] sm:$0xff]  }
 0x935   :  { %8545 = vst [vmem:[#allocation55_spill] sm:$0xff] %v6700_v8 }
 0x936   :  { %v2224_v12 = vpack.c.bf16 %v2223_v4, %v2222_v25  ;;  %v6706_v25 = vld [vmem:[%s7679_s1 + $0xe0] sm:$0xff]  }
 0x937   :  { %8546 = vst [vmem:[#allocation65_spill] sm:$0xff] %v6706_v25  ;;  %v6712_v4 = vld [vmem:[%s7679_s1 + $0xa0] sm:$0xff]  }
 0x938   :  { %2258 = vmatmul.mubr.bf16.vlgmr.msra.gmra.mrb[52].mxu1 %v2224_v12  ;;  %2301 = vmatmul.mubr.bf16.vlgmr.msra.gmra.mrb[56].mxu0 %v2224_v12  ;;  %8547 = vst [vmem:[#allocation57_spill] sm:$0xff] %v6712_v4 }
 0x939   :  { %2312 = vmatpush1.bf16.msra.mxu1 %v6268_v51  ;;  %2343 = vmatprep.mubr.bf16.mxu1 %v8205_v40 }
 0x93a   :  { %2313 = vmatprep.subr.bf16.mxu1 %v6275_v45  ;;  %4000 = vmatpush3.bf16.msra.mxu0 %v6549_v16 }
 0x93b   :  { %4001 = vmatprep.subr.bf16.mxu0 %v6555_v47 }
 0x93d   :  { %2314 = vmatpush1.bf16.msra.mxu1 %v6283_v6 }
 0x93e   :  { %2315 = vmatprep.subr.bf16.mxu1 %v6289_v53  ;;  %4002 = vmatpush3.bf16.msra.mxu0 %v6563_v61 }
 0x93f   :  { %4003 = vmatprep.subr.bf16.mxu0 %v6569_v17 }
 0x941   :  { %2316 = vmatpush1.bf16.msra.mxu1 %v6297_v56 }
 0x942   :  { %2317 = vmatprep.subr.bf16.mxu1 %v6303_v2  ;;  %4004 = vmatpush3.bf16.msra.mxu0 %v6577_v57 }
 0x943   :  { %4005 = vmatprep.subr.bf16.mxu0 %v6583_v60 }
 0x945   :  { %2318 = vmatpush1.bf16.msra.mxu1 %v6311_v23 }
 0x946   :  { %2319 = vmatprep.subr.bf16.mxu1 %v6317_v26  ;;  %4006 = vmatpush3.bf16.msra.mxu0 %v6591_v41 }
 0x947   :  { %4007 = vmatprep.subr.bf16.mxu0 %v6597_v7 }
 0x949   :  { %2320 = vmatpush1.bf16.msra.mxu1 %v6325_v37 }
 0x94a   :  { %2321 = vmatprep.subr.bf16.mxu1 %v6331_v63  ;;  %4008 = vmatpush3.bf16.msra.mxu0 %v6605_v22 }
 0x94b   :  { %4009 = vmatprep.subr.bf16.mxu0 %v6611_v30 }
 0x94d   :  { %2322 = vmatpush1.bf16.msra.mxu1 %v6339_v3 }
 0x94e   :  { %2323 = vmatprep.subr.bf16.mxu1 %v6345_v10  ;;  %4010 = vmatpush3.bf16.msra.mxu0 %v6619_v35 }
 0x94f   :  { %4011 = vmatprep.subr.bf16.mxu0 %v6625_v46 }
 0x951   :  { %2324 = vmatpush1.bf16.msra.mxu1 %v6353_v55 }
 0x952   :  { %2325 = vmatprep.subr.bf16.mxu1 %v6359_v38  ;;  %4012 = vmatpush3.bf16.msra.mxu0 %v6633_v39 }
 0x953   :  { %4013 = vmatprep.subr.bf16.mxu0 %v6639_v58 }
 0x955   :  { %2326 = vmatpush1.bf16.msra.mxu1 %v6367_v48 }
 0x956   :  { %4021 = vmatprep.subr.bf16.mxu1 %v6646_v28  ;;  %4014 = vmatpush3.bf16.msra.mxu0 %v6652_v21 }
 0x957   :  { %4043 = vmatprep.subr.bf16.mxu0 %v6658_v27 }
 0x958   :  { %2344 = vmatmul.mubr.bf16.vlgmr.msra.gmra.mrb[56].mxu1 %v2224_v12  ;;  %v6718_v12 = vld [vmem:[%s7679_s1 + $0xe8] sm:$0xff]  }
 0x959   :  { %4022 = vmatpush3.bf16.msra.mxu1 %v6664_v29  ;;  %8548 = vst [vmem:[#allocation66_spill] sm:$0xff] %v6718_v12 }
 0x95a   :  { %4023 = vmatprep.subr.bf16.mxu1 %v6670_v54 }
 0x95d   :  { %4024 = vmatpush3.bf16.msra.mxu1 %v6676_v36 }
 0x95e   :  { %4025 = vmatprep.subr.bf16.mxu1 %v6682_v42 }
 0x961   :  { %4026 = vmatpush3.bf16.msra.mxu1 %v6688_v62 }
 0x962   :  { %4027 = vmatprep.subr.bf16.mxu1 %v6694_v59 }
 0x965   :  { %4028 = vmatpush3.bf16.msra.mxu1 %v6700_v8  ;;  %v6724_v8 = vld [vmem:[%s7679_s1 + $0xa8] sm:$0xff]  }
 0x966   :  { %4029 = vmatprep.subr.bf16.mxu1 %v6706_v25  ;;  %8549 = vst [vmem:[#allocation59_spill] sm:$0xff] %v6724_v8  ;;  %v6730_v25 = vld [vmem:[%s7679_s1 + $0xf0] sm:$0xff]  }
 0x967   :  { %8550 = vst [vmem:[#allocation67_spill] sm:$0xff] %v6730_v25 }
 0x969   :  { %4030 = vmatpush3.bf16.msra.mxu1 %v6712_v4  ;;  %v6736_v4 = vld [vmem:[%s7679_s1 + $0xb0] sm:$0xff]  }
 0x96a   :  { %4031 = vmatprep.subr.bf16.mxu1 %v6718_v12  ;;  %8551 = vst [vmem:[#allocation33_spill] sm:$0xff] %v6736_v4  ;;  %v6742_v12 = vld [vmem:[%s7679_s1 + $0xf8] sm:$0xff]  }
 0x96b   :  { %8552 = vst [vmem:[#allocation68_spill] sm:$0xff] %v6742_v12 }
 0x96d   :  { %4032 = vmatpush3.bf16.msra.mxu1 %v6724_v8  ;;  %v6748_v8 = vld [vmem:[%s7679_s1 + $0xb8] sm:$0xff]  }
 0x96e   :  { %4033 = vmatprep.subr.bf16.mxu1 %v6730_v25  ;;  %8553 = vst [vmem:[#allocation45_spill] sm:$0xff] %v6748_v8 }
 0x971   :  { %4034 = vmatpush3.bf16.msra.mxu1 %v6736_v4 }
 0x972   :  { %4035 = vmatprep.subr.bf16.mxu1 %v6742_v12 }
 0x975   :  { %4036 = vmatpush3.bf16.msra.mxu1 %v6748_v8 }
 0x976   :  { %2555 = vmatprep.subr.bf16.mxu1 %v8457_v1 }
 0xa0b   :  { %v2259_v25 = vpop.f32.mrb[52].mxu1  ;;  %v2302_v59 = vpop.f32.mrb[56].mxu0 }
 0xa0c   :  { %v2260_v4 = vadd.f32 %v2259_v25, %v5308_v15  ;;  %v2303_v62 = vadd.f32 %v2302_v59, %v8458_v9  ;;  %v2261_v42 = vpop.f32.mrb[53].mxu1  ;;  %v2304_v36 = vpop.f32.mrb[57].mxu0 }
 0xa0d   :  { %v2262_v54 = vadd.f32 %v2261_v42, %v5314_v19  ;;  %v2305_v12 = vadd.f32 %v2304_v36, %v5317_v20  ;;  %v2263_v29 = vpop.f32.mrb[54].mxu1  ;;  %v2306_v27 = vpop.f32.mrb[58].mxu0  ;;  %v8554_v36 = vclamps-f32 %v6399_v44, 1.0  ;;  %v8559_v44 = vclamps-f32 %v6419_v32, 1.0 }
 0xa0e   :  { %v2354_v21 = vmul.f32 0.125, %v2260_v4  ;;  %v2356_v28 = vmul.f32 0.125, %v2303_v62  ;;  %v2264_v8 = vadd.f32 %v2263_v29, %v5308_v15  ;;  %v2307_v1 = vadd.f32 %v2306_v27, %v8458_v9  ;;  %v2265_v48 = vpop.f32.mrb[55].mxu1  ;;  %v2308_v58 = vpop.f32.mrb[59].mxu0 }
 0xa0f   :  { %v2355_v39 = vmul.f32 0.125, %v2262_v54  ;;  %v2357_v25 = vmul.f32 0.125, %v2305_v12  ;;  %v2266_v59 = vadd.f32 %v2265_v48, %v5314_v19  ;;  %v2309_v38 = vadd.f32 %v2308_v58, %v5317_v20 }
 0xa10   :  { %v2360_v55 = vmul.f32 0.125, %v2264_v8  ;;  %v2362_v42 = vmul.f32 0.125, %v2307_v1  ;;  %v8555_v62 = vclamps-f32 %v6403_v11, 1.0  ;;  %v8556_v9 = vclamps-f32 %v6407_v34, 1.0 }
 0xa11   :  { %v6762_v46 = vadd.f32 %v8554_v36, %v2355_v39  ;;  %v2361_v29 = vmul.f32 0.125, %v2266_v59  ;;  %v2363_v27 = vmul.f32 0.125, %v2309_v38  ;;  %v8557_v48 = vclamps-f32 %v6411_v52, 1.0  ;;  %v6819_v36 = vld [vmem:[%s7679_s1 + $0x100] sm:$0xff]  }
 0xa12   :  { %v6766_v4 = vadd.f32 %v8555_v62, %v2357_v25  ;;  %v6770_v54 = vadd.f32 %v8556_v9, %v2354_v21  ;;  %v8558_v58 = vclamps-f32 %v6415_v13, 1.0  ;;  %v6782_v39 = vadd.f32 %v8559_v44, %v2362_v42  ;;  %8562 = vst [vmem:[#allocation48_spill] sm:$0xff] %v6819_v36  ;;  %v6826_v62 = vld [vmem:[%s7679_s1 + $0x148] sm:$0xff]  }
 0xa13   :  { %v6774_v12 = vadd.f32 %v8557_v48, %v2356_v28  ;;  %v8560_v11 = vclamps-f32 %v6423_v0, 1.0  ;;  %v8561_v38 = vclamps-f32 %v6427_v5, 1.0  ;;  %v8044_v13 = vclamps-f32 %v6762_v46, 1.0  ;;  %8563 = vst [vmem:[#allocation50_spill] sm:$0xff] %v6826_v62  ;;  %v8571_v48 = vld [vmem:[#allocation61_spill] sm:$0xff] }
 0xa14   :  { %v6778_v8 = vadd.f32 %v8558_v58, %v2360_v55  ;;  %v8039_v52 = vclamps-f32 %v6782_v39, 1.0  ;;  %v8043_v55 = vclamps-f32 %v6766_v4, 1.0  ;;  %v8042_v0 = vclamps-f32 %v6770_v54, 1.0 }
 0xa15   :  { %v6786_v1 = vadd.f32 %v8560_v11, %v2361_v29  ;;  %v6790_v9 = vadd.f32 %v8561_v38, %v2363_v27  ;;  %v8041_v21 = vclamps-f32 %v6774_v12, 1.0  ;;  %v6834_v29 = vld [vmem:[%s7679_s1 + $0x108] sm:$0xff]  }
 0xa16   :  { %v8040_v34 = vclamps-f32 %v6778_v8, 1.0  ;;  %8564 = vst [vmem:[#allocation63_spill] sm:$0xff] %v6834_v29  ;;  %v6884_v11 = vld [vmem:[%s7679_s1 + $0x168] sm:$0xff]  }
 0xa17   :  { %v8038_v32 = vclamps-f32 %v6786_v1, 1.0  ;;  %v8037_v28 = vclamps-f32 %v6790_v9, 1.0  ;;  %v2405_v42 = vpack.c.bf16 %v8039_v52, %v8041_v21  ;;  %8573 = vst [vmem:[#allocation58_spill] sm:$0xff] %v6884_v11  ;;  %v8575_v38 = vld [vmem:[#allocation9_spill] sm:$0xff]  ;;  %v8583_v21 = vld [vmem:[#allocation24_spill] sm:$0xff] }
 0xa18   :  { %v2403_v59 = vpack.c.bf16 %v8040_v34, %v8042_v0  ;;  %v8577_v52 = vld [vmem:[#allocation13_spill] sm:$0xff]  ;;  %v8584_v0 = vclamps-f32 %v8583_v21, 1.0  ;;  %v6932_v21 = vld [vmem:[%s7679_s1 + $0x178] sm:$0xff]  }
 0xa19   :  { %v2404_v5 = vpack.c.bf16 %v8038_v32, %v8044_v13  ;;  %v2406_v25 = vpack.c.bf16 %v8037_v28, %v8043_v55  ;;  %v6894_v32 = vld [vmem:[%s7679_s1 + $0x128] sm:$0xff]  }
 0xa1a   :  { %8576 = vst [vmem:[#allocation60_spill] sm:$0xff] %v6894_v32 }
 0xa1b   :  { %2445 = vmatprep.mubr.bf16.mxu0 %v2404_v5  ;;  %2486 = vmatprep.mubr.bf16.mxu1 %v2406_v25 }
 0xa1c   :  { %2446 = vmatmul.mubr.bf16.vlgmr.msra.gmra.mrb[60].mxu0 %v2403_v59  ;;  %2487 = vmatmul.mubr.bf16.vlgmr.msra.gmra.mrb[60].mxu1 %v2405_v42 }
 0xa1d   :  { %4044 = vmatpush3.bf16.msra.mxu0 %v6819_v36  ;;  %2556 = vmatpush1.bf16.msra.mxu1 %v8472_v33  ;;  %v6841_v33 = vld [vmem:[%s7679_s1 + $0x150] sm:$0xff]  }
 0xa1e   :  { %4045 = vmatprep.subr.bf16.mxu0 %v6826_v62  ;;  %2557 = vmatprep.subr.bf16.mxu1 %v8474_v24  ;;  %8565 = vst [vmem:[#allocation14_spill] sm:$0xff] %v6841_v33  ;;  %v6848_v24 = vld [vmem:[%s7679_s1 + $0x110] sm:$0xff]  }
 0xa1f   :  { %2587 = vmatprep.mubr.bf16.mxu1 %v8205_v40  ;;  %8566 = vst [vmem:[#allocation37_spill] sm:$0xff] %v6848_v24 }
 0xa21   :  { %4046 = vmatpush3.bf16.msra.mxu0 %v6834_v29  ;;  %2558 = vmatpush1.bf16.msra.mxu1 %v8476_v43  ;;  %v6855_v43 = vld [vmem:[%s7679_s1 + $0x158] sm:$0xff]  }
 0xa22   :  { %4047 = vmatprep.subr.bf16.mxu0 %v6841_v33  ;;  %2559 = vmatprep.subr.bf16.mxu1 %v8478_v14  ;;  %8567 = vst [vmem:[#allocation15_spill] sm:$0xff] %v6855_v43  ;;  %v6862_v14 = vld [vmem:[%s7679_s1 + $0x118] sm:$0xff]  }
 0xa23   :  { %8568 = vst [vmem:[#allocation32_spill] sm:$0xff] %v6862_v14 }
 0xa25   :  { %4048 = vmatpush3.bf16.msra.mxu0 %v6848_v24  ;;  %2560 = vmatpush1.bf16.msra.mxu1 %v8480_v18  ;;  %v6869_v18 = vld [vmem:[%s7679_s1 + $0x160] sm:$0xff]  }
 0xa26   :  { %4049 = vmatprep.subr.bf16.mxu0 %v6855_v43  ;;  %2561 = vmatprep.subr.bf16.mxu1 %v8482_v31  ;;  %8569 = vst [vmem:[#allocation54_spill] sm:$0xff] %v6869_v18  ;;  %v6876_v31 = vld [vmem:[%s7679_s1 + $0x120] sm:$0xff]  }
 0xa27   :  { %8570 = vst [vmem:[#allocation56_spill] sm:$0xff] %v6876_v31 }
 0xa29   :  { %4050 = vmatpush3.bf16.msra.mxu0 %v6862_v14  ;;  %2562 = vmatpush1.bf16.msra.mxu1 %v8484_v49  ;;  %v8572_v49 = vld [vmem:[#allocation8_spill] sm:$0xff] }
 0xa2a   :  { %4051 = vmatprep.subr.bf16.mxu0 %v6869_v18  ;;  %2563 = vmatprep.subr.bf16.mxu1 %v8486_v50  ;;  %v8574_v50 = vld [vmem:[#allocation62_spill] sm:$0xff] }
 0xa2b   :  { %v2345_v27 = vpop.f32.mrb[56].mxu1 }
 0xa2c   :  { %v2346_v58 = vadd.f32 %v2345_v27, %v8572_v49  ;;  %v2347_v44 = vpop.f32.mrb[57].mxu1 }
 0xa2d   :  { %4052 = vmatpush3.bf16.msra.mxu0 %v6876_v31  ;;  %2564 = vmatpush1.bf16.msra.mxu1 %v8571_v48  ;;  %v2348_v5 = vadd.f32 %v2347_v44, %v8575_v38  ;;  %v2349_v25 = vpop.f32.mrb[58].mxu1  ;;  %v8579_v44 = vld [vmem:[#allocation36_spill] sm:$0xff] }
 0xa2e   :  { %4053 = vmatprep.subr.bf16.mxu0 %v6884_v11  ;;  %2565 = vmatprep.subr.bf16.mxu1 %v8574_v50  ;;  %v2358_v59 = vmul.f32 0.125, %v2346_v58  ;;  %v2350_v42 = vadd.f32 %v2349_v25, %v8572_v49  ;;  %v2351_v28 = vpop.f32.mrb[59].mxu1  ;;  %v6901_v58 = vld [vmem:[%s7679_s1 + $0x170] sm:$0xff]  }
 0xa2f   :  { %v2359_v48 = vmul.f32 0.125, %v2348_v5  ;;  %v2352_v27 = vadd.f32 %v2351_v28, %v8575_v38  ;;  %8578 = vst [vmem:[#allocation69_spill] sm:$0xff] %v6901_v58  ;;  %v8580_v28 = vld [vmem:[#allocation22_spill] sm:$0xff] }
 0xa30   :  { %v2364_v50 = vmul.f32 0.125, %v2350_v42  ;;  %v8581_v5 = vclamps-f32 %v8580_v28, 1.0  ;;  %v6911_v55 = vadd.f32 %v8584_v0, %v2358_v59  ;;  %8594 = vst [vmem:[#allocation22_spill] sm:$0xff] %v6932_v21  ;;  %v8597_v28 = vld [vmem:[#allocation41_spill] sm:$0xff] }
 0xa31   :  { %4054 = vmatpush3.bf16.msra.mxu0 %v6894_v32  ;;  %2566 = vmatpush1.bf16.msra.mxu1 %v8577_v52  ;;  %v2365_v34 = vmul.f32 0.125, %v2352_v27  ;;  %v8586_v52 = vld [vmem:[#allocation25_spill] sm:$0xff]  ;;  %v8589_v32 = vld [vmem:[#allocation38_spill] sm:$0xff]  ;;  %v6942_v27 = vld [vmem:[%s7679_s1 + $0x138] sm:$0xff]  }
 0xa32   :  { %4055 = vmatprep.subr.bf16.mxu0 %v6901_v58  ;;  %2567 = vmatprep.subr.bf16.mxu1 %v8579_v44  ;;  %v6907_v25 = vadd.f32 %v8581_v5, %v2359_v48  ;;  %8585 = vst [vmem:[#allocation61_spill] sm:$0xff] %v6911_v55  ;;  %v8587_v42 = vclamps-f32 %v8586_v52, 1.0  ;;  %v8590_v38 = vclamps-f32 %v8589_v32, 1.0  ;;  %v6924_v44 = vld [vmem:[%s7679_s1 + $0x130] sm:$0xff]   ;;  %v8593_v48 = vld [vmem:[#allocation40_spill] sm:$0xff]  ;;  %v8052_v59 = vclamps-f32 %v6911_v55, 1.0 }
 0xa33   :  { %8592 = vst [vmem:[#allocation36_spill] sm:$0xff] %v6924_v44  ;;  %8596 = vst [vmem:[#allocation24_spill] sm:$0xff] %v6942_v27  ;;  %v6957_v52 = vld [vmem:[%s7681_s3 + $0xc] ss:$24 sps:$4 sm:$0xff]  }
 0xa34   :  { %8582 = vst [vmem:[#allocation70_spill] sm:$0xff] %v6907_v25  ;;  %v6915_v13 = vadd.f32 %v8587_v42, %v2364_v50  ;;  %v6919_v11 = vadd.f32 %v8590_v38, %v2365_v34  ;;  %v8595_v34 = vld [vmem:[#allocation16_spill] sm:$0xff]  ;;  %v8053_v32 = vclamps-f32 %v6907_v25, 1.0  ;;  %8598 = vst [vmem:[#allocation25_spill] sm:$0xff] %v6957_v52  ;;  %v8599_v42 = vld [vmem:[#allocation17_spill] sm:$0xff] }
 0xa35   :  { %4056 = vmatpush3.bf16.msra.mxu0 %v6924_v44  ;;  %2568 = vmatpush1.bf16.msra.mxu1 %v8593_v48  ;;  %v6964_v48 = vld [vmem:[%s7681_s3 + $0x8] ss:$24 sps:$4 sm:$0xff]  }
 0xa36   :  { %8588 = vst [vmem:[#allocation62_spill] sm:$0xff] %v6915_v13  ;;  %8591 = vst [vmem:[#allocation13_spill] sm:$0xff] %v6919_v11  ;;  %v8051_v0 = vclamps-f32 %v6915_v13, 1.0  ;;  %4057 = vmatprep.subr.bf16.mxu0 %v6932_v21  ;;  %2569 = vmatprep.subr.bf16.mxu1 %v8595_v34  ;;  %v8050_v38 = vclamps-f32 %v6919_v11, 1.0  ;;  %v6971_v34 = vld [vmem:[%s7681_s3 + $0x3c] ss:$24 sps:$4 sm:$0xff]  }
 0xa37   :  { %8600 = vst [vmem:[#allocation38_spill] sm:$0xff] %v6964_v48  ;;  %8601 = vst [vmem:[#allocation40_spill] sm:$0xff] %v6971_v34 }
 0xa38   :  { %v2408_v50 = vpack.c.bf16 %v8050_v38, %v8053_v32  ;;  %v2407_v5 = vpack.c.bf16 %v8051_v0, %v8052_v59  ;;  %v8606_v38 = vld [vmem:[#allocation21_spill] sm:$0xff]  ;;  %v8607_v0 = vld [vmem:[#allocation23_spill] sm:$0xff]  ;;  %v8608_v59 = vld [vmem:[#allocation20_spill] sm:$0xff] }
 0xa39   :  { %4058 = vmatpush3.bf16.msra.mxu0 %v6942_v27  ;;  %2570 = vmatpush1.bf16.msra.mxu1 %v8597_v28  ;;  %v8603_v28 = vld [vmem:[#allocation44_spill] sm:$0xff]  ;;  %v8609_v32 = vld [vmem:[#allocation27_spill] sm:$0xff] }
 0xa3a   :  { %2598 = vmatprep.subr.bf16.mxu0 %v6957_v52  ;;  %2641 = vmatprep.subr.bf16.mxu1 %v8599_v42  ;;  %v8605_v42 = vld [vmem:[#allocation19_spill] sm:$0xff]  ;;  %v8612_v52 = vld [vmem:[#allocation10_spill] sm:$0xff] }
 0xa3b   :  { %2527 = vmatprep.mubr.bf16.mxu0 %v2408_v50  ;;  %v6977_v50 = vld [vmem:[%s7681_s3 + $0x38] ss:$24 sps:$4 sm:$0xff]  }
 0xa3c   :  { %2528 = vmatmul.mubr.bf16.vlgmr.msra.gmra.mrb[64].mxu0 %v2407_v5  ;;  %8602 = vst [vmem:[#allocation16_spill] sm:$0xff] %v6977_v50  ;;  %v8604_v5 = vld [vmem:[#allocation18_spill] sm:$0xff] }
 0xa3d   :  { %2599 = vmatpush1.bf16.msra.mxu0 %v6964_v48  ;;  %2630 = vmatprep.mubr.bf16.mxu0 %v8205_v40  ;;  %v8611_v48 = vld [vmem:[#allocation52_spill] sm:$0xff] }
 0xa3e   :  { %2600 = vmatprep.subr.bf16.mxu0 %v6971_v34  ;;  %v8610_v34 = vld [vmem:[#allocation28_spill] sm:$0xff] }
 0xa41   :  { %2601 = vmatpush1.bf16.msra.mxu0 %v6977_v50  ;;  %v8613_v50 = vld [vmem:[#allocation29_spill] sm:$0xff] }
 0xa42   :  { %2602 = vmatprep.subr.bf16.mxu0 %v8603_v28  ;;  %v8614_v28 = vld [vmem:[#allocation11_spill] sm:$0xff] }
 0xa45   :  { %2603 = vmatpush1.bf16.msra.mxu0 %v8604_v5  ;;  %v8615_v5 = vld [vmem:[#allocation39_spill] sm:$0xff] }
 0xa46   :  { %2604 = vmatprep.subr.bf16.mxu0 %v8605_v42 }
 0xa49   :  { %2605 = vmatpush1.bf16.msra.mxu0 %v8606_v38 }
 0xa4a   :  { %2606 = vmatprep.subr.bf16.mxu0 %v8607_v0  ;;  %v3630_v0 = vld [vmem:[%s7680_s2 + $0x5] ss:$0 sm:$0xff] }
 0xa4d   :  { %2607 = vmatpush1.bf16.msra.mxu0 %v8608_v59 }
 0xa4e   :  { %2608 = vmatprep.subr.bf16.mxu0 %v8609_v32 }
 0xa51   :  { %2609 = vmatpush1.bf16.msra.mxu0 %v8610_v34 }
 0xa52   :  { %2610 = vmatprep.subr.bf16.mxu0 %v8611_v48 }
 0xa55   :  { %2611 = vmatpush1.bf16.msra.mxu0 %v8612_v52 }
 0xa56   :  { %2612 = vmatprep.subr.bf16.mxu0 %v8613_v50 }
 0xa59   :  { %2613 = vmatpush1.bf16.msra.mxu0 %v8614_v28 }
 0xa5a   :  { %4065 = vmatprep.subr.bf16.mxu0 %v8615_v5 }
 0xaef   :  { %v4015_v42 = vpop.f32.mrb[60].mxu0  ;;  %v4037_v38 = vpop.f32.mrb[60].mxu1 }
 0xaf0   :  { %v4016_v59 = vpop.f32.mrb[61].mxu0  ;;  %v4038_v32 = vpop.f32.mrb[61].mxu1 }
 0xaf1   :  { %v4017_v27 = vadd.f32 %v4016_v59, %v4015_v42  ;;  %v4039_v34 = vadd.f32 %v4038_v32, %v4037_v38  ;;  %v4018_v21 = vpop.f32.mrb[62].mxu0  ;;  %v4040_v48 = vpop.f32.mrb[62].mxu1 }
 0xaf2   :  { %v4019_v44 = vpop.f32.mrb[63].mxu0  ;;  %v4041_v52 = vpop.f32.mrb[63].mxu1 }
 0xaf3   :  { %v2448_v11 = vadd.f32 %v4017_v27, %v3630_v0  ;;  %v4020_v50 = vadd.f32 %v4019_v44, %v4018_v21  ;;  %v4042_v13 = vadd.f32 %v4041_v52, %v4040_v48  ;;  %v8634_v48 = vld [vmem:[#allocation66_spill] sm:$0xff]  ;;  %v8635_v52 = vld [vmem:[#allocation59_spill] sm:$0xff] }
 0xaf5   :  { %v2489_v28 = vadd.f32 %v4039_v34, %v2448_v11  ;;  %v2451_v55 = vadd.f32 %v4020_v50, %v3630_v0  ;;  %v8633_v34 = vld [vmem:[#allocation57_spill] sm:$0xff]  ;;  %v8636_v50 = vld [vmem:[#allocation67_spill] sm:$0xff] }
 0xaf7   :  { %v2492_v5 = vadd.f32 %v4042_v13, %v2451_v55 }
 0xb0f   :  { %v4059_v25 = vpop.f32.mrb[64].mxu0 }
 0xb10   :  { %v4060_v58 = vpop.f32.mrb[65].mxu0 }
 0xb11   :  { %v4061_v49 = vadd.f32 %v4060_v58, %v4059_v25  ;;  %v4062_v31 = vpop.f32.mrb[66].mxu0 }
 0xb12   :  { %v4063_v18 = vpop.f32.mrb[67].mxu0 }
 0xb13   :  { %v2530_v14 = vadd.f32 %v4061_v49, %v2489_v28  ;;  %v4064_v43 = vadd.f32 %v4063_v18, %v4062_v31  ;;  %v8637_v28 = vld [vmem:[#allocation33_spill] sm:$0xff] }
 0xb15   :  { %v2536_v24 = vmul.f32 %v2530_v14, %v2530_v14  ;;  %v2533_v42 = vadd.f32 %v4064_v43, %v2492_v5  ;;  %v8632_v5 = vld [vmem:[#allocation65_spill] sm:$0xff] }
 0xb17   :  { %v2538_v38 = vmul.f32 %v2536_v24, %v2530_v14  ;;  %v2537_v59 = vmul.f32 %v2533_v42, %v2533_v42  ;;  %v8630_v24 = vld [vmem:[#allocation35_spill] sm:$0xff] }
 0xb19   :  { %v2540_v32 = vmul.f32 0.044715, %v2538_v38  ;;  %v2539_v33 = vmul.f32 %v2537_v59, %v2533_v42  ;;  %v8639_v38 = vld [vmem:[#allocation45_spill] sm:$0xff]  ;;  %v7047_v59 = vld [vmem:[%s7681_s3 + $0x4] ss:$24 sps:$4 sm:$0xff]  }
 0xb1a   :  { %8640 = vst [vmem:[#allocation41_spill] sm:$0xff] %v7047_v59 }
 0xb1b   :  { %v2542_v29 = vadd.f32 %v2540_v32, %v2530_v14  ;;  %v2541_v27 = vmul.f32 0.044715, %v2539_v33  ;;  %v8629_v33 = vld [vmem:[#allocation53_spill] sm:$0xff] }
 0xb1d   :  { %v2544_v44 = vmul.f32 0.7978846, %v2542_v29  ;;  %v2543_v21 = vadd.f32 %v2541_v27, %v2533_v42  ;;  %v8628_v29 = vld [vmem:[#allocation34_spill] sm:$0xff] }
 0xb1f   :  { %4342 = vtanh.f32 %v2544_v44  ;;  %v2545_v11 = vmul.f32 0.7978846, %v2543_v21  ;;  %v8641_v21 = vld [vmem:[#allocation64_spill] sm:$0xff] }
 0xb21   :  { %4344 = vtanh.f32 %v2545_v11 }
 0xb29   :  { %v4343_v13 = vpop.eup %4342 }
 0xb2a   :  { %v2548_v55 = vadd.f32 1.0, %v4343_v13 }
 0xb2b   :  { %v4345_v58 = vpop.eup %4344 }
 0xb2c   :  { %v2549_v25 = vadd.f32 1.0, %v4345_v58  ;;  %v2550_v0 = vmul.f32 0.5, %v2548_v55 }
 0xb2e   :  { %v2551_v49 = vmul.f32 0.5, %v2549_v25  ;;  %v2552_v18 = vmul.f32 %v2550_v0, %v2530_v14  ;;  %v8631_v14 = vld [vmem:[#allocation55_spill] sm:$0xff] }
 0xb30   :  { %v2553_v31 = vmul.f32 %v2551_v49, %v2533_v42  ;;  %v8638_v42 = vld [vmem:[#allocation68_spill] sm:$0xff] }
 0xb32   :  { %v2554_v43 = vpack.c.bf16 %v2553_v31, %v2552_v18 }
 0xb34   :  { %2588 = vmatmul.mubr.bf16.vlgmr.msra.gmra.mrb[64].mxu1 %v2554_v43  ;;  %2631 = vmatmul.mubr.bf16.vlgmr.msra.gmra.mrb[68].mxu0 %v2554_v43 }
 0xb35   :  { %2642 = vmatpush1.bf16.msra.mxu1 %v6268_v51  ;;  %2673 = vmatprep.mubr.bf16.mxu1 %v8205_v40  ;;  %v8616_v51 = vld [vmem:[#allocation42_spill] sm:$0xff] }
 0xb36   :  { %2643 = vmatprep.subr.bf16.mxu1 %v6275_v45  ;;  %4066 = vmatpush3.bf16.msra.mxu0 %v6549_v16  ;;  %v8617_v45 = vld [vmem:[#allocation12_spill] sm:$0xff] }
 0xb37   :  { %4067 = vmatprep.subr.bf16.mxu0 %v6555_v47 }
 0xb39   :  { %2644 = vmatpush1.bf16.msra.mxu1 %v6283_v6  ;;  %v8618_v6 = vld [vmem:[#allocation71_spill] sm:$0xff] }
 0xb3a   :  { %2645 = vmatprep.subr.bf16.mxu1 %v6289_v53  ;;  %4068 = vmatpush3.bf16.msra.mxu0 %v6563_v61  ;;  %v8619_v53 = vld [vmem:[#allocation43_spill] sm:$0xff] }
 0xb3b   :  { %4069 = vmatprep.subr.bf16.mxu0 %v6569_v17 }
 0xb3d   :  { %2646 = vmatpush1.bf16.msra.mxu1 %v6297_v56  ;;  %v8620_v56 = vld [vmem:[#allocation46_spill] sm:$0xff] }
 0xb3e   :  { %2647 = vmatprep.subr.bf16.mxu1 %v6303_v2  ;;  %4070 = vmatpush3.bf16.msra.mxu0 %v6577_v57  ;;  %v8621_v2 = vld [vmem:[#allocation72_spill] sm:$0xff] }
 0xb3f   :  { %4071 = vmatprep.subr.bf16.mxu0 %v6583_v60 }
 0xb41   :  { %2648 = vmatpush1.bf16.msra.mxu1 %v6311_v23  ;;  %v8622_v23 = vld [vmem:[#allocation26_spill] sm:$0xff] }
 0xb42   :  { %2649 = vmatprep.subr.bf16.mxu1 %v6317_v26  ;;  %4072 = vmatpush3.bf16.msra.mxu0 %v6591_v41  ;;  %v8623_v26 = vld [vmem:[#allocation47_spill] sm:$0xff] }
 0xb43   :  { %4073 = vmatprep.subr.bf16.mxu0 %v6597_v7 }
 0xb45   :  { %2650 = vmatpush1.bf16.msra.mxu1 %v6325_v37  ;;  %v8624_v37 = vld [vmem:[#allocation30_spill] sm:$0xff] }
 0xb46   :  { %2651 = vmatprep.subr.bf16.mxu1 %v6331_v63  ;;  %4074 = vmatpush3.bf16.msra.mxu0 %v6605_v22  ;;  %v8625_v63 = vld [vmem:[#allocation49_spill] sm:$0xff] }
 0xb47   :  { %4075 = vmatprep.subr.bf16.mxu0 %v6611_v30 }
 0xb49   :  { %2652 = vmatpush1.bf16.msra.mxu1 %v6339_v3  ;;  %v8626_v3 = vld [vmem:[#allocation31_spill] sm:$0xff] }
 0xb4a   :  { %2653 = vmatprep.subr.bf16.mxu1 %v6345_v10  ;;  %4076 = vmatpush3.bf16.msra.mxu0 %v6619_v35  ;;  %v8627_v10 = vld [vmem:[#allocation51_spill] sm:$0xff] }
 0xb4b   :  { %4077 = vmatprep.subr.bf16.mxu0 %v8616_v51 }
 0xb4d   :  { %2654 = vmatpush1.bf16.msra.mxu1 %v8617_v45 }
 0xb4e   :  { %2655 = vmatprep.subr.bf16.mxu1 %v8618_v6  ;;  %4078 = vmatpush3.bf16.msra.mxu0 %v8619_v53 }
 0xb4f   :  { %4079 = vmatprep.subr.bf16.mxu0 %v8620_v56 }
 0xb51   :  { %2656 = vmatpush1.bf16.msra.mxu1 %v8621_v2 }
 0xb52   :  { %4087 = vmatprep.subr.bf16.mxu1 %v8622_v23  ;;  %4080 = vmatpush3.bf16.msra.mxu0 %v8623_v26 }
 0xb53   :  { %4109 = vmatprep.subr.bf16.mxu0 %v8624_v37 }
 0xb54   :  { %2674 = vmatmul.mubr.bf16.vlgmr.msra.gmra.mrb[68].mxu1 %v2554_v43 }
 0xb55   :  { %4088 = vmatpush3.bf16.msra.mxu1 %v8625_v63 }
 0xb56   :  { %4089 = vmatprep.subr.bf16.mxu1 %v8626_v3 }
 0xb59   :  { %4090 = vmatpush3.bf16.msra.mxu1 %v8627_v10 }
 0xb5a   :  { %4091 = vmatprep.subr.bf16.mxu1 %v8628_v29 }
 0xb5d   :  { %4092 = vmatpush3.bf16.msra.mxu1 %v8629_v33 }
 0xb5e   :  { %4093 = vmatprep.subr.bf16.mxu1 %v8630_v24 }
 0xb61   :  { %4094 = vmatpush3.bf16.msra.mxu1 %v8631_v14 }
 0xb62   :  { %4095 = vmatprep.subr.bf16.mxu1 %v8632_v5 }
 0xb65   :  { %4096 = vmatpush3.bf16.msra.mxu1 %v8633_v34 }
 0xb66   :  { %4097 = vmatprep.subr.bf16.mxu1 %v8634_v48 }
 0xb69   :  { %4098 = vmatpush3.bf16.msra.mxu1 %v8635_v52 }
 0xb6a   :  { %4099 = vmatprep.subr.bf16.mxu1 %v8636_v50 }
 0xb6d   :  { %4100 = vmatpush3.bf16.msra.mxu1 %v8637_v28 }
 0xb6e   :  { %4101 = vmatprep.subr.bf16.mxu1 %v8638_v42 }
 0xb71   :  { %4102 = vmatpush3.bf16.msra.mxu1 %v8639_v38 }
 0xb72   :  { %2885 = vmatprep.subr.bf16.mxu1 %v7047_v59 }
 0xc07   :  { %v2589_v32 = vpop.f32.mrb[64].mxu1  ;;  %v2632_v27 = vpop.f32.mrb[68].mxu0 }
 0xc08   :  { %v2590_v44 = vadd.f32 %v2589_v32, %v5308_v15  ;;  %v2633_v11 = vadd.f32 %v2632_v27, %v8641_v21  ;;  %v2591_v13 = vpop.f32.mrb[65].mxu1  ;;  %v2634_v55 = vpop.f32.mrb[69].mxu0 }
 0xc09   :  { %v2592_v58 = vadd.f32 %v2591_v13, %v5314_v19  ;;  %v2635_v25 = vadd.f32 %v2634_v55, %v5317_v20  ;;  %v2593_v0 = vpop.f32.mrb[66].mxu1  ;;  %v2636_v49 = vpop.f32.mrb[70].mxu0  ;;  %v8642_v55 = vclamps-f32 %v6762_v46, 1.0  ;;  %v8648_v46 = vclamps-f32 %v6782_v39, 1.0 }
 0xc0a   :  { %v2684_v18 = vmul.f32 0.125, %v2590_v44  ;;  %v2686_v31 = vmul.f32 0.125, %v2633_v11  ;;  %v2594_v43 = vadd.f32 %v2593_v0, %v5308_v15  ;;  %v2637_v45 = vadd.f32 %v2636_v49, %v8641_v21  ;;  %v2595_v6 = vpop.f32.mrb[67].mxu1  ;;  %v2638_v2 = vpop.f32.mrb[71].mxu0 }
 0xc0b   :  { %v2685_v59 = vmul.f32 0.125, %v2592_v58  ;;  %v2687_v32 = vmul.f32 0.125, %v2635_v25  ;;  %v2596_v27 = vadd.f32 %v2595_v6, %v5314_v19  ;;  %v2639_v38 = vadd.f32 %v2638_v2, %v5317_v20 }
 0xc0c   :  { %v2690_v42 = vmul.f32 0.125, %v2594_v43  ;;  %v2692_v13 = vmul.f32 0.125, %v2637_v45  ;;  %v8643_v44 = vclamps-f32 %v6766_v4, 1.0  ;;  %v8644_v21 = vclamps-f32 %v6770_v54, 1.0 }
 0xc0d   :  { %v7060_v28 = vadd.f32 %v8642_v55, %v2685_v59  ;;  %v2691_v0 = vmul.f32 0.125, %v2596_v27  ;;  %v2693_v49 = vmul.f32 0.125, %v2639_v38  ;;  %v8645_v25 = vclamps-f32 %v6774_v12, 1.0  ;;  %v7118_v55 = vld [vmem:[%s7681_s3] ss:$24 sps:$4 sm:$0xff]  }
 0xc0e   :  { %v7064_v11 = vadd.f32 %v8643_v44, %v2687_v32  ;;  %v7068_v58 = vadd.f32 %v8644_v21, %v2684_v18  ;;  %v8646_v43 = vclamps-f32 %v6778_v8, 1.0  ;;  %v7080_v59 = vadd.f32 %v8648_v46, %v2692_v13  ;;  %8654 = vst [vmem:[#allocation21_spill] sm:$0xff] %v7118_v55  ;;  %v7125_v44 = vld [vmem:[%s7681_s3 + $0x34] ss:$24 sps:$4 sm:$0xff]  }
 0xc0f   :  { %v7072_v6 = vadd.f32 %v8645_v25, %v2686_v31  ;;  %v8650_v4 = vclamps-f32 %v6786_v1, 1.0  ;;  %v8652_v54 = vclamps-f32 %v6790_v9, 1.0  ;;  %v8098_v8 = vclamps-f32 %v7060_v28, 1.0  ;;  %8655 = vst [vmem:[#allocation23_spill] sm:$0xff] %v7125_v44  ;;  %v8658_v25 = vld [vmem:[#allocation14_spill] sm:$0xff]  ;;  %v8660_v46 = vld [vmem:[#allocation37_spill] sm:$0xff] }
 0xc10   :  { %v7076_v45 = vadd.f32 %v8646_v43, %v2690_v42  ;;  %8649 = vst [vmem:[#allocation44_spill] sm:$0xff] %v7080_v59  ;;  %v8093_v21 = vclamps-f32 %v7080_v59, 1.0  ;;  %v8097_v42 = vclamps-f32 %v7064_v11, 1.0  ;;  %v8096_v1 = vclamps-f32 %v7068_v58, 1.0  ;;  %v7140_v43 = vld [vmem:[%s7681_s3 + $0x64] ss:$24 sps:$4 sm:$0xff]  }
 0xc11   :  { %v7084_v2 = vadd.f32 %v8650_v4, %v2691_v0  ;;  %v7088_v38 = vadd.f32 %v8652_v54, %v2693_v49  ;;  %v8095_v31 = vclamps-f32 %v7072_v6, 1.0  ;;  %v8656_v0 = vld [vmem:[#allocation63_spill] sm:$0xff]  ;;  %v7133_v49 = vld [vmem:[%s7681_s3 + $0x30] ss:$24 sps:$4 sm:$0xff]   ;;  %8659 = vst [vmem:[#allocation27_spill] sm:$0xff] %v7140_v43 }
 0xc12   :  { %8647 = vst [vmem:[#allocation17_spill] sm:$0xff] %v7076_v45  ;;  %v8094_v12 = vclamps-f32 %v7076_v45, 1.0  ;;  %8657 = vst [vmem:[#allocation20_spill] sm:$0xff] %v7133_v49  ;;  %v7147_v4 = vld [vmem:[%s7681_s3 + $0x60] ss:$24 sps:$4 sm:$0xff]  }
 0xc13   :  { %8651 = vst [vmem:[#allocation18_spill] sm:$0xff] %v7084_v2  ;;  %8653 = vst [vmem:[#allocation19_spill] sm:$0xff] %v7088_v38  ;;  %v8092_v39 = vclamps-f32 %v7084_v2, 1.0  ;;  %v8091_v18 = vclamps-f32 %v7088_v38, 1.0  ;;  %v2735_v13 = vpack.c.bf16 %v8093_v21, %v8095_v31  ;;  %v8662_v54 = vld [vmem:[#allocation15_spill] sm:$0xff]  ;;  %v8668_v21 = vld [vmem:[#allocation56_spill] sm:$0xff] }
 0xc14   :  { %v2733_v27 = vpack.c.bf16 %v8094_v12, %v8096_v1  ;;  %8661 = vst [vmem:[#allocation28_spill] sm:$0xff] %v7147_v4  ;;  %v7175_v12 = vld [vmem:[%s7681_s3 + $0xc0] ss:$24 sps:$4 sm:$0xff]  }
 0xc15   :  { %v2734_v9 = vpack.c.bf16 %v8092_v39, %v8098_v8  ;;  %v2736_v32 = vpack.c.bf16 %v8091_v18, %v8097_v42  ;;  %v7168_v18 = vld [vmem:[%s7681_s3 + $0xc4] ss:$24 sps:$4 sm:$0xff]   ;;  %8669 = vst [vmem:[#allocation11_spill] sm:$0xff] %v7175_v12  ;;  %v8671_v8 = vld [vmem:[#allocation58_spill] sm:$0xff] }
 0xc16   :  { %8667 = vst [vmem:[#allocation29_spill] sm:$0xff] %v7168_v18  ;;  %v8670_v31 = vld [vmem:[#allocation8_spill] sm:$0xff] }
 0xc17   :  { %2775 = vmatprep.mubr.bf16.mxu0 %v2734_v9  ;;  %2816 = vmatprep.mubr.bf16.mxu1 %v2736_v32  ;;  %v7154_v9 = vld [vmem:[%s7681_s3 + $0x94] ss:$24 sps:$4 sm:$0xff]   ;;  %v8664_v32 = vld [vmem:[#allocation32_spill] sm:$0xff] }
 0xc18   :  { %2776 = vmatmul.mubr.bf16.vlgmr.msra.gmra.mrb[72].mxu0 %v2733_v27  ;;  %2817 = vmatmul.mubr.bf16.vlgmr.msra.gmra.mrb[72].mxu1 %v2735_v13  ;;  %8663 = vst [vmem:[#allocation52_spill] sm:$0xff] %v7154_v9  ;;  %v7161_v27 = vld [vmem:[%s7681_s3 + $0x90] ss:$24 sps:$4 sm:$0xff]  }
 0xc19   :  { %4110 = vmatpush3.bf16.msra.mxu0 %v6819_v36  ;;  %2886 = vmatpush1.bf16.msra.mxu1 %v7118_v55  ;;  %8665 = vst [vmem:[#allocation10_spill] sm:$0xff] %v7161_v27  ;;  %v8666_v13 = vld [vmem:[#allocation54_spill] sm:$0xff] }
 0xc1a   :  { %4111 = vmatprep.subr.bf16.mxu0 %v6826_v62  ;;  %2887 = vmatprep.subr.bf16.mxu1 %v7125_v44 }
 0xc1b   :  { %2917 = vmatprep.mubr.bf16.mxu1 %v8205_v40 }
 0xc1d   :  { %4112 = vmatpush3.bf16.msra.mxu0 %v8656_v0  ;;  %2888 = vmatpush1.bf16.msra.mxu1 %v7133_v49  ;;  %v8690_v0 = vld [vmem:[#allocation36_spill] sm:$0xff] }
 0xc1e   :  { %4113 = vmatprep.subr.bf16.mxu0 %v8658_v25  ;;  %2889 = vmatprep.subr.bf16.mxu1 %v7140_v43 }
 0xc21   :  { %4114 = vmatpush3.bf16.msra.mxu0 %v8660_v46  ;;  %2890 = vmatpush1.bf16.msra.mxu1 %v7147_v4  ;;  %v8674_v4 = vld [vmem:[#allocation60_spill] sm:$0xff]  ;;  %v8676_v46 = vld [vmem:[#allocation69_spill] sm:$0xff] }
 0xc22   :  { %4115 = vmatprep.subr.bf16.mxu0 %v8662_v54  ;;  %2891 = vmatprep.subr.bf16.mxu1 %v7154_v9 }
 0xc25   :  { %4116 = vmatpush3.bf16.msra.mxu0 %v8664_v32  ;;  %2892 = vmatpush1.bf16.msra.mxu1 %v7161_v27 }
 0xc26   :  { %4117 = vmatprep.subr.bf16.mxu0 %v8666_v13  ;;  %2893 = vmatprep.subr.bf16.mxu1 %v7168_v18  ;;  %v7183_v13 = vld [vmem:[%s7681_s3 + $0xf4] ss:$24 sps:$4 sm:$0xff]  }
 0xc27   :  { %v2675_v39 = vpop.f32.mrb[68].mxu1  ;;  %8672 = vst [vmem:[#allocation42_spill] sm:$0xff] %v7183_v13 }
 0xc28   :  { %v2676_v1 = vadd.f32 %v2675_v39, %v8670_v31  ;;  %v2677_v42 = vpop.f32.mrb[69].mxu1 }
 0xc29   :  { %4118 = vmatpush3.bf16.msra.mxu0 %v8668_v21  ;;  %2894 = vmatpush1.bf16.msra.mxu1 %v7175_v12  ;;  %v8673_v21 = vld [vmem:[#allocation9_spill] sm:$0xff]  ;;  %v2679_v27 = vpop.f32.mrb[70].mxu1 }
 0xc2a   :  { %4119 = vmatprep.subr.bf16.mxu0 %v8671_v8  ;;  %2895 = vmatprep.subr.bf16.mxu1 %v7183_v13  ;;  %v2678_v18 = vadd.f32 %v2677_v42, %v8673_v21  ;;  %v2688_v32 = vmul.f32 0.125, %v2676_v1  ;;  %v2680_v9 = vadd.f32 %v2679_v27, %v8670_v31  ;;  %v2681_v54 = vpop.f32.mrb[71].mxu1  ;;  %v7193_v8 = vld [vmem:[%s7681_s3 + $0xf0] ss:$24 sps:$4 sm:$0xff]   ;;  %v7200_v42 = vld [vmem:[%s7681_s3 + $0x124] ss:$24 sps:$4 sm:$0xff]  }
 0xc2b   :  { %v2682_v39 = vadd.f32 %v2681_v54, %v8673_v21  ;;  %8675 = vst [vmem:[#allocation12_spill] sm:$0xff] %v7193_v8  ;;  %8677 = vst [vmem:[#allocation71_spill] sm:$0xff] %v7200_v42 }
 0xc2c   :  { %v2689_v12 = vmul.f32 0.125, %v2678_v18  ;;  %v2694_v13 = vmul.f32 0.125, %v2680_v9  ;;  %v8678_v18 = vld [vmem:[#allocation70_spill] sm:$0xff] }
 0xc2d   :  { %4120 = vmatpush3.bf16.msra.mxu0 %v8674_v4  ;;  %2896 = vmatpush1.bf16.msra.mxu1 %v7193_v8  ;;  %v8679_v1 = vclamps-f32 %v8678_v18, 1.0  ;;  %v2695_v27 = vmul.f32 0.125, %v2682_v39  ;;  %v8681_v4 = vld [vmem:[#allocation61_spill] sm:$0xff]  ;;  %v8684_v8 = vld [vmem:[#allocation62_spill] sm:$0xff] }
 0xc2e   :  { %4121 = vmatprep.subr.bf16.mxu0 %v8676_v46  ;;  %2897 = vmatprep.subr.bf16.mxu1 %v7200_v42  ;;  %v8682_v21 = vclamps-f32 %v8681_v4, 1.0  ;;  %v8685_v9 = vclamps-f32 %v8684_v8, 1.0  ;;  %v8687_v46 = vld [vmem:[#allocation13_spill] sm:$0xff]  ;;  %v8692_v4 = vld [vmem:[#allocation22_spill] sm:$0xff] }
 0xc2f   :  { %v7205_v54 = vadd.f32 %v8679_v1, %v2689_v12  ;;  %v8688_v25 = vclamps-f32 %v8687_v46, 1.0  ;;  %v7223_v12 = vld [vmem:[%s7681_s3 + $0x120] ss:$24 sps:$4 sm:$0xff]   ;;  %v7231_v8 = vld [vmem:[%s7681_s3 + $0x154] ss:$24 sps:$4 sm:$0xff]  }
 0xc30   :  { %v7209_v31 = vadd.f32 %v8682_v21, %v2688_v32  ;;  %v7213_v43 = vadd.f32 %v8685_v9, %v2694_v13  ;;  %8691 = vst [vmem:[#allocation47_spill] sm:$0xff] %v7223_v12  ;;  %8693 = vst [vmem:[#allocation30_spill] sm:$0xff] %v7231_v8  ;;  %v8694_v13 = vld [vmem:[#allocation24_spill] sm:$0xff]  ;;  %v7245_v18 = vld [vmem:[%s7681_s3 + $0x150] ss:$24 sps:$4 sm:$0xff]  }
 0xc31   :  { %8680 = vst [vmem:[#allocation43_spill] sm:$0xff] %v7205_v54  ;;  %v7217_v49 = vadd.f32 %v8688_v25, %v2695_v27  ;;  %4122 = vmatpush3.bf16.msra.mxu0 %v8690_v0  ;;  %2898 = vmatpush1.bf16.msra.mxu1 %v7223_v12  ;;  %v8111_v25 = vclamps-f32 %v7205_v54, 1.0  ;;  %8695 = vst [vmem:[#allocation49_spill] sm:$0xff] %v7245_v18  ;;  %v8696_v27 = vld [vmem:[#allocation25_spill] sm:$0xff] }
 0xc32   :  { %8683 = vst [vmem:[#allocation46_spill] sm:$0xff] %v7209_v31  ;;  %8686 = vst [vmem:[#allocation72_spill] sm:$0xff] %v7213_v43  ;;  %v8113_v21 = vclamps-f32 %v7213_v43, 1.0  ;;  %4123 = vmatprep.subr.bf16.mxu0 %v8692_v4  ;;  %2899 = vmatprep.subr.bf16.mxu1 %v7231_v8  ;;  %v8114_v32 = vclamps-f32 %v7209_v31, 1.0  ;;  %v7256_v9 = vld [vmem:[%s7681_s3 + $0x14] ss:$24 sps:$4 sm:$0xff]  }
 0xc33   :  { %8689 = vst [vmem:[#allocation26_spill] sm:$0xff] %v7217_v49  ;;  %v8110_v46 = vclamps-f32 %v7217_v49, 1.0  ;;  %8697 = vst [vmem:[#allocation31_spill] sm:$0xff] %v7256_v9 }
 0xc34   :  { %v2737_v1 = vpack.c.bf16 %v8113_v21, %v8114_v32  ;;  %v7266_v21 = vld [vmem:[%s7681_s3 + $0x6c] ss:$24 sps:$4 sm:$0xff]   ;;  %v7284_v32 = vld [vmem:[%s7681_s3 + $0x98] ss:$24 sps:$4 sm:$0xff]  }
 0xc35   :  { %4124 = vmatpush3.bf16.msra.mxu0 %v8694_v13  ;;  %v2738_v39 = vpack.c.bf16 %v8110_v46, %v8111_v25  ;;  %2900 = vmatpush1.bf16.msra.mxu1 %v7245_v18  ;;  %v8698_v46 = vld [vmem:[#allocation38_spill] sm:$0xff]  ;;  %v8699_v25 = vld [vmem:[#allocation40_spill] sm:$0xff]  ;;  %8701 = vst [vmem:[#allocation51_spill] sm:$0xff] %v7266_v21  ;;  %8704 = vst [vmem:[#allocation35_spill] sm:$0xff] %v7284_v32 }
 0xc36   :  { %2928 = vmatprep.subr.bf16.mxu0 %v8696_v27  ;;  %2971 = vmatprep.subr.bf16.mxu1 %v7256_v9  ;;  %v8700_v18 = vld [vmem:[#allocation16_spill] sm:$0xff] }
 0xc37   :  { %2857 = vmatprep.mubr.bf16.mxu0 %v2738_v39  ;;  %v7272_v39 = vld [vmem:[%s7681_s3 + $0x68] ss:$24 sps:$4 sm:$0xff]  }
 0xc38   :  { %2858 = vmatmul.mubr.bf16.vlgmr.msra.gmra.mrb[76].mxu0 %v2737_v1  ;;  %8702 = vst [vmem:[#allocation34_spill] sm:$0xff] %v7272_v39  ;;  %v7278_v1 = vld [vmem:[%s7681_s3 + $0x9c] ss:$24 sps:$4 sm:$0xff]  }
 0xc39   :  { %2929 = vmatpush1.bf16.msra.mxu0 %v8698_v46  ;;  %2960 = vmatprep.mubr.bf16.mxu0 %v8205_v40  ;;  %8703 = vst [vmem:[#allocation53_spill] sm:$0xff] %v7278_v1 }
 0xc3a   :  { %2930 = vmatprep.subr.bf16.mxu0 %v8699_v25 }
 0xc3d   :  { %2931 = vmatpush1.bf16.msra.mxu0 %v8700_v18 }
 0xc3e   :  { %2932 = vmatprep.subr.bf16.mxu0 %v7266_v21  ;;  %v7290_v21 = vld [vmem:[%s7681_s3 + $0xcc] ss:$24 sps:$4 sm:$0xff]  }
 0xc3f   :  { %8705 = vst [vmem:[#allocation55_spill] sm:$0xff] %v7290_v21 }
 0xc41   :  { %2933 = vmatpush1.bf16.msra.mxu0 %v7272_v39  ;;  %v7296_v39 = vld [vmem:[%s7681_s3 + $0xc8] ss:$24 sps:$4 sm:$0xff]  }
 0xc42   :  { %2934 = vmatprep.subr.bf16.mxu0 %v7278_v1  ;;  %8706 = vst [vmem:[#allocation65_spill] sm:$0xff] %v7296_v39  ;;  %v7302_v1 = vld [vmem:[%s7681_s3 + $0xfc] ss:$24 sps:$4 sm:$0xff]  }
 0xc43   :  { %8707 = vst [vmem:[#allocation57_spill] sm:$0xff] %v7302_v1 }
 0xc45   :  { %2935 = vmatpush1.bf16.msra.mxu0 %v7284_v32  ;;  %v7308_v32 = vld [vmem:[%s7681_s3 + $0xf8] ss:$24 sps:$4 sm:$0xff]  }
 0xc46   :  { %2936 = vmatprep.subr.bf16.mxu0 %v7290_v21  ;;  %8708 = vst [vmem:[#allocation66_spill] sm:$0xff] %v7308_v32  ;;  %v7314_v21 = vld [vmem:[%s7681_s3 + $0x12c] ss:$24 sps:$4 sm:$0xff]  }
 0xc47   :  { %8709 = vst [vmem:[#allocation59_spill] sm:$0xff] %v7314_v21 }
 0xc49   :  { %2937 = vmatpush1.bf16.msra.mxu0 %v7296_v39  ;;  %v7320_v39 = vld [vmem:[%s7681_s3 + $0x128] ss:$24 sps:$4 sm:$0xff]  }
 0xc4a   :  { %2938 = vmatprep.subr.bf16.mxu0 %v7302_v1  ;;  %8710 = vst [vmem:[#allocation67_spill] sm:$0xff] %v7320_v39  ;;  %v7326_v1 = vld [vmem:[%s7681_s3 + $0x15c] ss:$24 sps:$4 sm:$0xff]  }
 0xc4b   :  { %8711 = vst [vmem:[#allocation70_spill] sm:$0xff] %v7326_v1 }
 0xc4d   :  { %2939 = vmatpush1.bf16.msra.mxu0 %v7308_v32  ;;  %v7332_v32 = vld [vmem:[%s7681_s3 + $0x158] ss:$24 sps:$4 sm:$0xff]  }
 0xc4e   :  { %2940 = vmatprep.subr.bf16.mxu0 %v7314_v21  ;;  %8712 = vst [vmem:[#allocation61_spill] sm:$0xff] %v7332_v32  ;;  %v8713_v21 = vld [vmem:[#allocation39_spill] sm:$0xff] }
 0xc51   :  { %2941 = vmatpush1.bf16.msra.mxu0 %v7320_v39  ;;  %v3643_v39 = vld [vmem:[%s7680_s2 + $0x6] ss:$0 sm:$0xff] }
 0xc52   :  { %2942 = vmatprep.subr.bf16.mxu0 %v7326_v1 }
 0xc55   :  { %2943 = vmatpush1.bf16.msra.mxu0 %v7332_v32 }
 0xc56   :  { %4131 = vmatprep.subr.bf16.mxu0 %v8713_v21 }
 0xceb   :  { %v4081_v18 = vpop.f32.mrb[72].mxu0  ;;  %v4103_v25 = vpop.f32.mrb[72].mxu1 }
 0xcec   :  { %v4082_v46 = vpop.f32.mrb[73].mxu0  ;;  %v4104_v9 = vpop.f32.mrb[73].mxu1 }
 0xced   :  { %v4083_v27 = vadd.f32 %v4082_v46, %v4081_v18  ;;  %v4105_v13 = vadd.f32 %v4104_v9, %v4103_v25  ;;  %v4084_v1 = vpop.f32.mrb[74].mxu0  ;;  %v4106_v8 = vpop.f32.mrb[74].mxu1 }
 0xcee   :  { %v4085_v4 = vpop.f32.mrb[75].mxu0  ;;  %v4107_v12 = vpop.f32.mrb[75].mxu1 }
 0xcef   :  { %v2778_v0 = vadd.f32 %v4083_v27, %v3643_v39  ;;  %v4086_v49 = vadd.f32 %v4085_v4, %v4084_v1  ;;  %v4108_v43 = vadd.f32 %v4107_v12, %v4106_v8 }
 0xcf1   :  { %v2819_v32 = vadd.f32 %v4105_v13, %v2778_v0  ;;  %v2781_v31 = vadd.f32 %v4086_v49, %v3643_v39 }
 0xcf3   :  { %v2822_v21 = vadd.f32 %v4108_v43, %v2781_v31 }
 0xd0b   :  { %v4125_v54 = vpop.f32.mrb[76].mxu0 }
 0xd0c   :  { %v4126_v42 = vpop.f32.mrb[77].mxu0 }
 0xd0d   :  { %v4127_v44 = vadd.f32 %v4126_v42, %v4125_v54  ;;  %v4128_v62 = vpop.f32.mrb[78].mxu0 }
 0xd0e   :  { %v4129_v55 = vpop.f32.mrb[79].mxu0 }
 0xd0f   :  { %v2860_v36 = vadd.f32 %v4127_v44, %v2819_v32  ;;  %v4130_v38 = vadd.f32 %v4129_v55, %v4128_v62 }
 0xd11   :  { %v2866_v2 = vmul.f32 %v2860_v36, %v2860_v36  ;;  %v2863_v46 = vadd.f32 %v4130_v38, %v2822_v21 }
 0xd13   :  { %v2868_v25 = vmul.f32 %v2866_v2, %v2860_v36  ;;  %v2867_v18 = vmul.f32 %v2863_v46, %v2863_v46  ;;  %v7363_v2 = vld [vmem:[%s7681_s3 + $0x74] ss:$24 sps:$4 sm:$0xff]  }
 0xd15   :  { %v2870_v9 = vmul.f32 0.044715, %v2868_v25  ;;  %v2869_v59 = vmul.f32 %v2867_v18, %v2863_v46 }
 0xd17   :  { %v2872_v45 = vadd.f32 %v2870_v9, %v2860_v36  ;;  %v2871_v27 = vmul.f32 0.044715, %v2869_v59  ;;  %v7342_v59 = vld [vmem:[%s7681_s3 + $0x10] ss:$24 sps:$4 sm:$0xff]   ;;  %v8719_v9 = vclamps-f32 %v7060_v28, 1.0  ;;  %v8725_v28 = vld [vmem:[#allocation44_spill] sm:$0xff] }
 0xd19   :  { %v2874_v4 = vmul.f32 0.7978846, %v2872_v45  ;;  %v2873_v12 = vadd.f32 %v2871_v27, %v2863_v46  ;;  %v7349_v45 = vld [vmem:[%s7681_s3 + $0x44] ss:$24 sps:$4 sm:$0xff]  }
 0xd1b   :  { %4346 = vtanh.f32 %v2874_v4  ;;  %v2875_v0 = vmul.f32 0.7978846, %v2873_v12  ;;  %v8720_v4 = vclamps-f32 %v7064_v11, 1.0  ;;  %v8727_v11 = vld [vmem:[#allocation18_spill] sm:$0xff] }
 0xd1d   :  { %4348 = vtanh.f32 %v2875_v0 }
 0xd25   :  { %v4347_v31 = vpop.eup %4346 }
 0xd26   :  { %v2878_v49 = vadd.f32 1.0, %v4347_v31 }
 0xd27   :  { %v4349_v43 = vpop.eup %4348 }
 0xd28   :  { %v2879_v42 = vadd.f32 1.0, %v4349_v43  ;;  %v2880_v54 = vmul.f32 0.5, %v2878_v49  ;;  %v8721_v49 = vclamps-f32 %v7068_v58, 1.0 }
 0xd2a   :  { %v2881_v44 = vmul.f32 0.5, %v2879_v42  ;;  %v2882_v62 = vmul.f32 %v2880_v54, %v2860_v36  ;;  %v7357_v36 = vld [vmem:[%s7681_s3 + $0x40] ss:$24 sps:$4 sm:$0xff]   ;;  %v8722_v42 = vclamps-f32 %v7072_v6, 1.0 }
 0xd2c   :  { %v2883_v55 = vmul.f32 %v2881_v44, %v2863_v46  ;;  %v8723_v44 = vld [vmem:[#allocation17_spill] sm:$0xff] }
 0xd2e   :  { %v2884_v38 = vpack.c.bf16 %v2883_v55, %v2882_v62  ;;  %v8724_v62 = vclamps-f32 %v8723_v44, 1.0 }
 0xd30   :  { %2918 = vmatmul.mubr.bf16.vlgmr.msra.gmra.mrb[76].mxu1 %v2884_v38  ;;  %2961 = vmatmul.mubr.bf16.vlgmr.msra.gmra.mrb[80].mxu0 %v2884_v38 }
 0xd31   :  { %2972 = vmatpush1.bf16.msra.mxu1 %v7342_v59  ;;  %3003 = vmatprep.mubr.bf16.mxu1 %v8205_v40 }
 0xd32   :  { %2973 = vmatprep.subr.bf16.mxu1 %v7349_v45  ;;  %4132 = vmatpush3.bf16.msra.mxu0 %v6549_v16  ;;  %v7371_v16 = vld [vmem:[%s7681_s3 + $0x70] ss:$24 sps:$4 sm:$0xff]  }
 0xd33   :  { %4133 = vmatprep.subr.bf16.mxu0 %v6555_v47  ;;  %v7377_v47 = vld [vmem:[%s7681_s3 + $0xa4] ss:$24 sps:$4 sm:$0xff]  }
 0xd35   :  { %2974 = vmatpush1.bf16.msra.mxu1 %v7357_v36 }
 0xd36   :  { %2975 = vmatprep.subr.bf16.mxu1 %v7363_v2  ;;  %4134 = vmatpush3.bf16.msra.mxu0 %v6563_v61  ;;  %v7385_v61 = vld [vmem:[%s7681_s3 + $0xa0] ss:$24 sps:$4 sm:$0xff]  }
 0xd37   :  { %4135 = vmatprep.subr.bf16.mxu0 %v6569_v17  ;;  %v7391_v17 = vld [vmem:[%s7681_s3 + $0xd4] ss:$24 sps:$4 sm:$0xff]  }
 0xd39   :  { %2976 = vmatpush1.bf16.msra.mxu1 %v7371_v16 }
 0xd3a   :  { %2977 = vmatprep.subr.bf16.mxu1 %v7377_v47  ;;  %4136 = vmatpush3.bf16.msra.mxu0 %v6577_v57  ;;  %v7399_v57 = vld [vmem:[%s7681_s3 + $0xd0] ss:$24 sps:$4 sm:$0xff]  }
 0xd3b   :  { %4137 = vmatprep.subr.bf16.mxu0 %v6583_v60  ;;  %v7405_v60 = vld [vmem:[%s7681_s3 + $0x104] ss:$24 sps:$4 sm:$0xff]  }
 0xd3d   :  { %2978 = vmatpush1.bf16.msra.mxu1 %v7385_v61 }
 0xd3e   :  { %2979 = vmatprep.subr.bf16.mxu1 %v7391_v17  ;;  %4138 = vmatpush3.bf16.msra.mxu0 %v6591_v41  ;;  %v7413_v41 = vld [vmem:[%s7681_s3 + $0x100] ss:$24 sps:$4 sm:$0xff]  }
 0xd3f   :  { %4139 = vmatprep.subr.bf16.mxu0 %v6597_v7  ;;  %v7419_v7 = vld [vmem:[%s7681_s3 + $0x134] ss:$24 sps:$4 sm:$0xff]  }
 0xd41   :  { %2980 = vmatpush1.bf16.msra.mxu1 %v7399_v57 }
 0xd42   :  { %2981 = vmatprep.subr.bf16.mxu1 %v7405_v60  ;;  %4140 = vmatpush3.bf16.msra.mxu0 %v6605_v22  ;;  %v7427_v22 = vld [vmem:[%s7681_s3 + $0x130] ss:$24 sps:$4 sm:$0xff]  }
 0xd43   :  { %4141 = vmatprep.subr.bf16.mxu0 %v6611_v30  ;;  %v7433_v30 = vld [vmem:[%s7681_s3 + $0x164] ss:$24 sps:$4 sm:$0xff]  }
 0xd45   :  { %2982 = vmatpush1.bf16.msra.mxu1 %v7413_v41 }
 0xd46   :  { %2983 = vmatprep.subr.bf16.mxu1 %v7419_v7  ;;  %4142 = vmatpush3.bf16.msra.mxu0 %v6619_v35  ;;  %v7441_v35 = vld [vmem:[%s7681_s3 + $0x160] ss:$24 sps:$4 sm:$0xff]  }
 0xd47   :  { %4143 = vmatprep.subr.bf16.mxu0 %v8616_v51  ;;  %v8714_v51 = vld [vmem:[#allocation33_spill] sm:$0xff] }
 0xd49   :  { %2984 = vmatpush1.bf16.msra.mxu1 %v7427_v22 }
 0xd4a   :  { %2985 = vmatprep.subr.bf16.mxu1 %v7433_v30  ;;  %4144 = vmatpush3.bf16.msra.mxu0 %v8619_v53  ;;  %v8715_v53 = vld [vmem:[#allocation68_spill] sm:$0xff] }
 0xd4b   :  { %4145 = vmatprep.subr.bf16.mxu0 %v8620_v56  ;;  %v8716_v56 = vld [vmem:[#allocation45_spill] sm:$0xff] }
 0xd4d   :  { %2986 = vmatpush1.bf16.msra.mxu1 %v7441_v35 }
 0xd4e   :  { %4153 = vmatprep.subr.bf16.mxu1 %v8622_v23  ;;  %4146 = vmatpush3.bf16.msra.mxu0 %v8623_v26  ;;  %v8717_v23 = vld [vmem:[#allocation41_spill] sm:$0xff] }
 0xd4f   :  { %4175 = vmatprep.subr.bf16.mxu0 %v8624_v37 }
 0xd50   :  { %3004 = vmatmul.mubr.bf16.vlgmr.msra.gmra.mrb[80].mxu1 %v2884_v38  ;;  %v8726_v38 = vclamps-f32 %v8725_v28, 1.0  ;;  %v8748_v28 = vld [vmem:[#allocation11_spill] sm:$0xff] }
 0xd51   :  { %4154 = vmatpush3.bf16.msra.mxu1 %v8625_v63 }
 0xd52   :  { %4155 = vmatprep.subr.bf16.mxu1 %v8626_v3  ;;  %v8718_v3 = vld [vmem:[#allocation64_spill] sm:$0xff] }
 0xd55   :  { %4156 = vmatpush3.bf16.msra.mxu1 %v8627_v10 }
 0xd56   :  { %4157 = vmatprep.subr.bf16.mxu1 %v8628_v29 }
 0xd59   :  { %4158 = vmatpush3.bf16.msra.mxu1 %v8629_v33 }
 0xd5a   :  { %4159 = vmatprep.subr.bf16.mxu1 %v8630_v24 }
 0xd5d   :  { %4160 = vmatpush3.bf16.msra.mxu1 %v8631_v14 }
 0xd5e   :  { %4161 = vmatprep.subr.bf16.mxu1 %v8632_v5 }
 0xd61   :  { %4162 = vmatpush3.bf16.msra.mxu1 %v8633_v34 }
 0xd62   :  { %4163 = vmatprep.subr.bf16.mxu1 %v8634_v48 }
 0xd65   :  { %4164 = vmatpush3.bf16.msra.mxu1 %v8635_v52 }
 0xd66   :  { %4165 = vmatprep.subr.bf16.mxu1 %v8636_v50 }
 0xd69   :  { %4166 = vmatpush3.bf16.msra.mxu1 %v8714_v51 }
 0xd6a   :  { %4167 = vmatprep.subr.bf16.mxu1 %v8715_v53  ;;  %v8728_v53 = vclamps-f32 %v8727_v11, 1.0 }
 0xd6d   :  { %4168 = vmatpush3.bf16.msra.mxu1 %v8716_v56 }
 0xd6e   :  { %3215 = vmatprep.subr.bf16.mxu1 %v8717_v23  ;;  %v8729_v23 = vld [vmem:[#allocation19_spill] sm:$0xff] }
 0xd6f   :  { %v8730_v58 = vclamps-f32 %v8729_v23, 1.0  ;;  %v8750_v23 = vld [vmem:[#allocation58_spill] sm:$0xff] }
 0xe03   :  { %v2919_v26 = vpop.f32.mrb[76].mxu1  ;;  %v2962_v37 = vpop.f32.mrb[80].mxu0 }
 0xe04   :  { %v2920_v63 = vadd.f32 %v2919_v26, %v5308_v15  ;;  %v2963_v10 = vadd.f32 %v2962_v37, %v8718_v3  ;;  %v2921_v29 = vpop.f32.mrb[77].mxu1  ;;  %v2964_v33 = vpop.f32.mrb[81].mxu0 }
 0xe05   :  { %v2922_v24 = vadd.f32 %v2921_v29, %v5314_v19  ;;  %v2965_v14 = vadd.f32 %v2964_v33, %v5317_v20  ;;  %v2923_v5 = vpop.f32.mrb[78].mxu1  ;;  %v2966_v34 = vpop.f32.mrb[82].mxu0 }
 0xe06   :  { %v3014_v48 = vmul.f32 0.125, %v2920_v63  ;;  %v3016_v52 = vmul.f32 0.125, %v2963_v10  ;;  %v2924_v50 = vadd.f32 %v2923_v5, %v5308_v15  ;;  %v2967_v8 = vadd.f32 %v2966_v34, %v8718_v3  ;;  %v2925_v32 = vpop.f32.mrb[79].mxu1  ;;  %v2968_v13 = vpop.f32.mrb[83].mxu0 }
 0xe07   :  { %v3015_v39 = vmul.f32 0.125, %v2922_v24  ;;  %v3017_v1 = vmul.f32 0.125, %v2965_v14  ;;  %v2926_v21 = vadd.f32 %v2925_v32, %v5314_v19  ;;  %v2969_v46 = vadd.f32 %v2968_v13, %v5317_v20  ;;  %v8733_v32 = vld [vmem:[#allocation50_spill] sm:$0xff]  ;;  %v8734_v13 = vld [vmem:[#allocation23_spill] sm:$0xff] }
 0xe08   :  { %v3020_v25 = vmul.f32 0.125, %v2924_v50  ;;  %v3022_v18 = vmul.f32 0.125, %v2967_v8  ;;  %v7481_v43 = vadd.f32 %v8721_v49, %v3014_v48  ;;  %v7485_v54 = vadd.f32 %v8722_v42, %v3016_v52  ;;  %v8731_v50 = vld [vmem:[#allocation48_spill] sm:$0xff]  ;;  %v8732_v8 = vld [vmem:[#allocation21_spill] sm:$0xff]  ;;  %v8745_v49 = vld [vmem:[#allocation54_spill] sm:$0xff] }
 0xe09   :  { %v7473_v27 = vadd.f32 %v8719_v9, %v3015_v39  ;;  %v7477_v12 = vadd.f32 %v8720_v4, %v3017_v1  ;;  %v3021_v0 = vmul.f32 0.125, %v2926_v21  ;;  %v3023_v31 = vmul.f32 0.125, %v2969_v46  ;;  %v8735_v39 = vld [vmem:[#allocation63_spill] sm:$0xff]  ;;  %v8736_v1 = vld [vmem:[#allocation20_spill] sm:$0xff]  ;;  %v8737_v21 = vld [vmem:[#allocation14_spill] sm:$0xff] }
 0xe0a   :  { %v7489_v55 = vadd.f32 %v8724_v62, %v3020_v25  ;;  %v7493_v51 = vadd.f32 %v8726_v38, %v3022_v18  ;;  %v3644_v24 = vclamps-f32 %v7481_v43, 1.0  ;;  %v3646_v14 = vclamps-f32 %v7485_v54, 1.0  ;;  %v8738_v46 = vld [vmem:[#allocation27_spill] sm:$0xff]  ;;  %v8739_v25 = vld [vmem:[#allocation37_spill] sm:$0xff]  ;;  %v8740_v18 = vld [vmem:[#allocation28_spill] sm:$0xff] }
 0xe0b   :  { %v7497_v56 = vadd.f32 %v8728_v53, %v3021_v0  ;;  %v7501_v26 = vadd.f32 %v8730_v58, %v3023_v31  ;;  %v3645_v63 = vclamps-f32 %v7473_v27, 1.0  ;;  %v8151_v10 = vclamps-f32 %v7477_v12, 1.0  ;;  %v8741_v9 = vld [vmem:[#allocation15_spill] sm:$0xff]  ;;  %v8742_v4 = vld [vmem:[#allocation52_spill] sm:$0xff]  ;;  %v8744_v31 = vld [vmem:[#allocation10_spill] sm:$0xff] }
 0xe0c   :  { %v8150_v6 = vclamps-f32 %v7489_v55, 1.0  ;;  %v8149_v37 = vclamps-f32 %v7493_v51, 1.0  ;;  %v8743_v0 = vld [vmem:[#allocation32_spill] sm:$0xff]  ;;  %v8746_v42 = vld [vmem:[#allocation29_spill] sm:$0xff]  ;;  %v8751_v58 = vld [vmem:[#allocation42_spill] sm:$0xff]  ;;  %v8790_v43 = vclamps-f32 %v7493_v51, 1.0 }
 0xe0d   :  { %v8148_v29 = vclamps-f32 %v7497_v56, 1.0  ;;  %v8147_v33 = vclamps-f32 %v7501_v26, 1.0  ;;  %v8747_v62 = vld [vmem:[#allocation56_spill] sm:$0xff]  ;;  %v8792_v27 = vclamps-f32 %v7501_v26, 1.0 }
 0xe0e   :  { %v3063_v48 = vpack.c.bf16 %v8150_v6, %v3644_v24  ;;  %v3065_v52 = vpack.c.bf16 %v8149_v37, %v3646_v14  ;;  %v8749_v38 = vld [vmem:[#allocation8_spill] sm:$0xff] }
 0xe0f   :  { %v3064_v5 = vpack.c.bf16 %v8148_v29, %v3645_v63  ;;  %v3066_v34 = vpack.c.bf16 %v8147_v33, %v8151_v10 }
 0xe11   :  { %3105 = vmatprep.mubr.bf16.mxu0 %v3064_v5  ;;  %3146 = vmatprep.mubr.bf16.mxu1 %v3066_v34  ;;  %v8752_v5 = vld [vmem:[#allocation9_spill] sm:$0xff] }
 0xe12   :  { %3106 = vmatmul.mubr.bf16.vlgmr.msra.gmra.mrb[84].mxu0 %v3063_v48  ;;  %3147 = vmatmul.mubr.bf16.vlgmr.msra.gmra.mrb[84].mxu1 %v3065_v52 }
 0xe13   :  { %4176 = vmatpush3.bf16.msra.mxu0 %v8731_v50  ;;  %3216 = vmatpush1.bf16.msra.mxu1 %v8732_v8 }
 0xe14   :  { %4177 = vmatprep.subr.bf16.mxu0 %v8733_v32  ;;  %3217 = vmatprep.subr.bf16.mxu1 %v8734_v13 }
 0xe15   :  { %3247 = vmatprep.mubr.bf16.mxu1 %v8205_v40 }
 0xe17   :  { %4178 = vmatpush3.bf16.msra.mxu0 %v8735_v39  ;;  %3218 = vmatpush1.bf16.msra.mxu1 %v8736_v1  ;;  %v8753_v39 = vld [vmem:[#allocation60_spill] sm:$0xff] }
 0xe18   :  { %4179 = vmatprep.subr.bf16.mxu0 %v8737_v21  ;;  %3219 = vmatprep.subr.bf16.mxu1 %v8738_v46  ;;  %v8754_v1 = vld [vmem:[#allocation12_spill] sm:$0xff]  ;;  %v8755_v46 = vld [vmem:[#allocation69_spill] sm:$0xff] }
 0xe1b   :  { %4180 = vmatpush3.bf16.msra.mxu0 %v8739_v25  ;;  %3220 = vmatpush1.bf16.msra.mxu1 %v8740_v18  ;;  %v8756_v25 = vld [vmem:[#allocation71_spill] sm:$0xff] }
 0xe1c   :  { %4181 = vmatprep.subr.bf16.mxu0 %v8741_v9  ;;  %3221 = vmatprep.subr.bf16.mxu1 %v8742_v4  ;;  %v8757_v18 = vld [vmem:[#allocation43_spill] sm:$0xff] }
 0xe1d   :  { %v8758_v9 = vclamps-f32 %v8757_v18, 1.0  ;;  %v8772_v18 = vld [vmem:[#allocation31_spill] sm:$0xff] }
 0xe1f   :  { %4182 = vmatpush3.bf16.msra.mxu0 %v8743_v0  ;;  %3222 = vmatpush1.bf16.msra.mxu1 %v8744_v31  ;;  %v8759_v31 = vld [vmem:[#allocation46_spill] sm:$0xff] }
 0xe20   :  { %4183 = vmatprep.subr.bf16.mxu0 %v8745_v49  ;;  %3223 = vmatprep.subr.bf16.mxu1 %v8746_v42  ;;  %v8760_v49 = vclamps-f32 %v8759_v31, 1.0  ;;  %v8775_v31 = vld [vmem:[#allocation16_spill] sm:$0xff] }
 0xe23   :  { %v3005_v44 = vpop.f32.mrb[80].mxu1  ;;  %4184 = vmatpush3.bf16.msra.mxu0 %v8747_v62  ;;  %3224 = vmatpush1.bf16.msra.mxu1 %v8748_v28 }
 0xe24   :  { %v3006_v11 = vadd.f32 %v3005_v44, %v8749_v38  ;;  %v3007_v53 = vpop.f32.mrb[81].mxu1  ;;  %4185 = vmatprep.subr.bf16.mxu0 %v8750_v23  ;;  %3225 = vmatprep.subr.bf16.mxu1 %v8751_v58  ;;  %v8761_v44 = vld [vmem:[#allocation72_spill] sm:$0xff] }
 0xe25   :  { %v3008_v34 = vadd.f32 %v3007_v53, %v8752_v5  ;;  %v3009_v48 = vpop.f32.mrb[82].mxu1  ;;  %v8762_v62 = vclamps-f32 %v8761_v44, 1.0  ;;  %v8765_v58 = vld [vmem:[#allocation36_spill] sm:$0xff]  ;;  %v8777_v44 = vld [vmem:[#allocation34_spill] sm:$0xff] }
 0xe26   :  { %v3018_v52 = vmul.f32 0.125, %v3006_v11  ;;  %v3010_v50 = vadd.f32 %v3009_v48, %v8749_v38  ;;  %v3011_v8 = vpop.f32.mrb[83].mxu1  ;;  %v8763_v11 = vld [vmem:[#allocation26_spill] sm:$0xff] }
 0xe27   :  { %v3019_v32 = vmul.f32 0.125, %v3008_v34  ;;  %v3012_v13 = vadd.f32 %v3011_v8, %v8752_v5  ;;  %4186 = vmatpush3.bf16.msra.mxu0 %v8753_v39  ;;  %3226 = vmatpush1.bf16.msra.mxu1 %v8754_v1  ;;  %v8764_v53 = vclamps-f32 %v8763_v11, 1.0  ;;  %v8766_v34 = vld [vmem:[#allocation47_spill] sm:$0xff]  ;;  %v8768_v8 = vld [vmem:[#allocation30_spill] sm:$0xff]  ;;  %v8769_v39 = vld [vmem:[#allocation24_spill] sm:$0xff] }
 0xe28   :  { %v3024_v21 = vmul.f32 0.125, %v3010_v50  ;;  %4187 = vmatprep.subr.bf16.mxu0 %v8755_v46  ;;  %3227 = vmatprep.subr.bf16.mxu1 %v8756_v25  ;;  %v7562_v42 = vadd.f32 %v8760_v49, %v3018_v52  ;;  %v8767_v50 = vld [vmem:[#allocation22_spill] sm:$0xff]  ;;  %v8771_v25 = vld [vmem:[#allocation25_spill] sm:$0xff]  ;;  %v8776_v49 = vld [vmem:[#allocation51_spill] sm:$0xff] }
 0xe29   :  { %v7558_v4 = vadd.f32 %v8758_v9, %v3019_v32  ;;  %v3025_v0 = vmul.f32 0.125, %v3012_v13  ;;  %v8773_v9 = vld [vmem:[#allocation38_spill] sm:$0xff]  ;;  %v8779_v11 = vld [vmem:[#allocation35_spill] sm:$0xff] }
 0xe2a   :  { %v7566_v28 = vadd.f32 %v8762_v62, %v3024_v21  ;;  %v8146_v13 = vclamps-f32 %v7562_v42, 1.0  ;;  %v8770_v21 = vld [vmem:[#allocation49_spill] sm:$0xff] }
 0xe2b   :  { %v7570_v23 = vadd.f32 %v8764_v53, %v3025_v0  ;;  %4188 = vmatpush3.bf16.msra.mxu0 %v8765_v58  ;;  %3228 = vmatpush1.bf16.msra.mxu1 %v8766_v34  ;;  %v8145_v52 = vclamps-f32 %v7558_v4, 1.0  ;;  %v8774_v0 = vld [vmem:[#allocation40_spill] sm:$0xff]  ;;  %v8778_v62 = vld [vmem:[#allocation53_spill] sm:$0xff]  ;;  %v8780_v53 = vld [vmem:[#allocation55_spill] sm:$0xff] }
 0xe2c   :  { %v8144_v48 = vclamps-f32 %v7566_v28, 1.0  ;;  %4189 = vmatprep.subr.bf16.mxu0 %v8767_v50  ;;  %3229 = vmatprep.subr.bf16.mxu1 %v8768_v8  ;;  %v8781_v58 = vld [vmem:[#allocation65_spill] sm:$0xff]  ;;  %v8783_v50 = vld [vmem:[#allocation66_spill] sm:$0xff]  ;;  %v8784_v8 = vld [vmem:[#allocation59_spill] sm:$0xff] }
 0xe2d   :  { %v8143_v32 = vclamps-f32 %v7570_v23, 1.0  ;;  %v8782_v34 = vld [vmem:[#allocation57_spill] sm:$0xff] }
 0xe2e   :  { %v3067_v46 = vpack.c.bf16 %v8144_v48, %v8146_v13 }
 0xe2f   :  { %4190 = vmatpush3.bf16.msra.mxu0 %v8769_v39  ;;  %v3068_v1 = vpack.c.bf16 %v8143_v32, %v8145_v52  ;;  %3230 = vmatpush1.bf16.msra.mxu1 %v8770_v21  ;;  %v8785_v39 = vld [vmem:[#allocation67_spill] sm:$0xff]  ;;  %v8787_v21 = vld [vmem:[#allocation61_spill] sm:$0xff] }
 0xe30   :  { %3258 = vmatprep.subr.bf16.mxu0 %v8771_v25  ;;  %3301 = vmatprep.subr.bf16.mxu1 %v8772_v18  ;;  %v3656_v18 = vld [vmem:[%s7680_s2 + $0x7] ss:$0 sm:$0xff]  ;;  %s4598_s2 = smov [#allocation5]  }
 0xe31   :  { %3187 = vmatprep.mubr.bf16.mxu0 %v3068_v1  ;;  %v8786_v1 = vld [vmem:[#allocation70_spill] sm:$0xff]  ;;  %s3457_s27 = sshll.u32 %s4598_s2, 4  ;;  %s3458_s27 = int_to_ptr.vmem [resolvable:$true] %s3457_s27 }
 0xe32   :  { %3188 = vmatmul.mubr.bf16.vlgmr.msra.gmra.mrb[88].mxu0 %v3067_v46  ;;  %s4568_s30 = scalar_lea.vmem %s3458_s27, 1536  ;;  %p4573_p9 = scmp.lt.s32.totalorder %s3458_s27, %s3458_s27 }
 0xe33   :  { %3259 = vmatpush1.bf16.msra.mxu0 %v8773_v9  ;;  %3290 = vmatprep.mubr.bf16.mxu0 %v8205_v40  ;;  %p4569_p8 = scmp.ne.s32.totalorder %s3458_s27, %s4568_s30  ;;  %p4574_p10 = scmp.lt.s32.totalorder %s4568_s30, %s4568_s30 }
 0xe34   :  { %3260 = vmatprep.subr.bf16.mxu0 %v8774_v0 }
 0xe35   :  { %p4575_p11 = por %p4574_p10, %p4573_p9 }
 0xe37   :  { %3261 = vmatpush1.bf16.msra.mxu0 %v8775_v31  ;;  %p4576_p12 = pnand %p4575_p11, %p4569_p8 }
 0xe38   :  { %3262 = vmatprep.subr.bf16.mxu0 %v8776_v49 }
 0xe3b   :  { %3263 = vmatpush1.bf16.msra.mxu0 %v8777_v44 }
 0xe3c   :  { %3264 = vmatprep.subr.bf16.mxu0 %v8778_v62 }
 0xe3f   :  { %3265 = vmatpush1.bf16.msra.mxu0 %v8779_v11 }
 0xe40   :  { %3266 = vmatprep.subr.bf16.mxu0 %v8780_v53 }
 0xe43   :  { %3267 = vmatpush1.bf16.msra.mxu0 %v8781_v58 }
 0xe44   :  { %3268 = vmatprep.subr.bf16.mxu0 %v8782_v34 }
 0xe47   :  { %3269 = vmatpush1.bf16.msra.mxu0 %v8783_v50 }
 0xe48   :  { %3270 = vmatprep.subr.bf16.mxu0 %v8784_v8 }
 0xe4b   :  { %3271 = vmatpush1.bf16.msra.mxu0 %v8785_v39 }
 0xe4c   :  { %3272 = vmatprep.subr.bf16.mxu0 %v8786_v1 }
 0xe4f   :  { %3273 = vmatpush1.bf16.msra.mxu0 %v8787_v21 }
 0xee5   :  { %v4147_v46 = vpop.f32.mrb[84].mxu0  ;;  %v4169_v25 = vpop.f32.mrb[84].mxu1 }
 0xee6   :  { %v4148_v9 = vpop.f32.mrb[85].mxu0  ;;  %v4170_v0 = vpop.f32.mrb[85].mxu1 }
 0xee7   :  { %v4149_v31 = vadd.f32 %v4148_v9, %v4147_v46  ;;  %v4171_v49 = vadd.f32 %v4170_v0, %v4169_v25  ;;  %v4150_v44 = vpop.f32.mrb[86].mxu0  ;;  %v4172_v62 = vpop.f32.mrb[86].mxu1 }
 0xee8   :  { %v4151_v11 = vpop.f32.mrb[87].mxu0  ;;  %v4173_v53 = vpop.f32.mrb[87].mxu1 }
 0xee9   :  { %v3108_v58 = vadd.f32 %v4149_v31, %v3656_v18  ;;  %v4152_v34 = vadd.f32 %v4151_v11, %v4150_v44  ;;  %v4174_v50 = vadd.f32 %v4173_v53, %v4172_v62 }
 0xeeb   :  { %v3149_v8 = vadd.f32 %v4171_v49, %v3108_v58  ;;  %v3111_v39 = vadd.f32 %v4152_v34, %v3656_v18 }
 0xeed   :  { %v3152_v1 = vadd.f32 %v4174_v50, %v3111_v39 }
 0xf05   :  { %v4191_v21 = vpop.f32.mrb[88].mxu0 }
 0xf06   :  { %v4192_v32 = vpop.f32.mrb[89].mxu0 }
 0xf07   :  { %v4193_v48 = vadd.f32 %v4192_v32, %v4191_v21  ;;  %v4194_v52 = vpop.f32.mrb[90].mxu0 }
 0xf08   :  { %v4195_v13 = vpop.f32.mrb[91].mxu0 }
 0xf09   :  { %v3190_v33 = vadd.f32 %v4193_v48, %v3149_v8  ;;  %v4196_v29 = vadd.f32 %v4195_v13, %v4194_v52 }
 0xf0b   :  { %v3196_v37 = vmul.f32 %v3190_v33, %v3190_v33  ;;  %v3193_v46 = vadd.f32 %v4196_v29, %v3152_v1 }
 0xf0d   :  { %v3198_v25 = vmul.f32 %v3196_v37, %v3190_v33  ;;  %v3197_v9 = vmul.f32 %v3193_v46, %v3193_v46 }
 0xf0f   :  { %v3200_v0 = vmul.f32 0.044715, %v3198_v25  ;;  %v3199_v6 = vmul.f32 %v3197_v9, %v3193_v46 }
 0xf11   :  { %v3202_v10 = vadd.f32 %v3200_v0, %v3190_v33  ;;  %v3201_v31 = vmul.f32 0.044715, %v3199_v6  ;;  %v8791_v0 = vclamps-f32 %v7497_v56, 1.0 }
 0xf13   :  { %v3204_v44 = vmul.f32 0.7978846, %v3202_v10  ;;  %v3203_v62 = vadd.f32 %v3201_v31, %v3193_v46 }
 0xf15   :  { %4350 = vtanh.f32 %v3204_v44  ;;  %v3205_v18 = vmul.f32 0.7978846, %v3203_v62 }
 0xf17   :  { %4352 = vtanh.f32 %v3205_v18 }
 0xf1f   :  { %v4351_v49 = vpop.eup %4350 }
 0xf20   :  { %v3208_v11 = vadd.f32 1.0, %v4351_v49 }
 0xf21   :  { %v4353_v32 = vpop.eup %4352 }
 0xf22   :  { %v3209_v53 = vadd.f32 1.0, %v4353_v32  ;;  %v3210_v58 = vmul.f32 0.5, %v3208_v11 }
 0xf24   :  { %v3211_v48 = vmul.f32 0.5, %v3209_v53  ;;  %v3212_v52 = vmul.f32 %v3210_v58, %v3190_v33 }
 0xf26   :  { %v3213_v13 = vmul.f32 %v3211_v48, %v3193_v46 }
 0xf28   :  { %v3214_v29 = vpack.c.bf16 %v3213_v13, %v3212_v52 }
 0xf2a   :  { %3248 = vmatmul.mubr.bf16.vlgmr.msra.gmra.mrb[88].mxu1 %v3214_v29  ;;  %3291 = vmatmul.mubr.bf16.vlgmr.msra.gmra.mrb[92].mxu0 %v3214_v29 }
 0xf2b   :  { %3302 = vmatpush1.bf16.msra.mxu1 %v7342_v59  ;;  %3333 = vmatprep.mubr.bf16.mxu1 %v8205_v40 }
 0xf2c   :  { %3303 = vmatprep.subr.bf16.mxu1 %v7349_v45 }
 0xf2f   :  { %3304 = vmatpush1.bf16.msra.mxu1 %v7357_v36 }
 0xf30   :  { %3305 = vmatprep.subr.bf16.mxu1 %v7363_v2 }
 0xf33   :  { %3306 = vmatpush1.bf16.msra.mxu1 %v7371_v16 }
 0xf34   :  { %3307 = vmatprep.subr.bf16.mxu1 %v7377_v47 }
 0xf37   :  { %3308 = vmatpush1.bf16.msra.mxu1 %v7385_v61 }
 0xf38   :  { %3309 = vmatprep.subr.bf16.mxu1 %v7391_v17 }
 0xf3b   :  { %3310 = vmatpush1.bf16.msra.mxu1 %v7399_v57 }
 0xf3c   :  { %3311 = vmatprep.subr.bf16.mxu1 %v7405_v60 }
 0xf3f   :  { %3312 = vmatpush1.bf16.msra.mxu1 %v7413_v41 }
 0xf40   :  { %3313 = vmatprep.subr.bf16.mxu1 %v7419_v7 }
 0xf43   :  { %3314 = vmatpush1.bf16.msra.mxu1 %v7427_v22 }
 0xf44   :  { %3315 = vmatprep.subr.bf16.mxu1 %v7433_v30 }
 0xf47   :  { %3316 = vmatpush1.bf16.msra.mxu1 %v7441_v35 }
 0xf4a   :  { %3334 = vmatmul.mubr.bf16.vlgmr.msra.gmra.mrb[92].mxu1 %v3214_v29 }
 0xffd   :  { %v3249_v40 = vpop.f32.mrb[88].mxu1  ;;  %v3292_v59 = vpop.f32.mrb[92].mxu0 }
 0xffe   :  { %v3250_v45 = vadd.f32 %v3249_v40, %v5308_v15  ;;  %v3293_v36 = vadd.f32 %v3292_v59, %v8718_v3  ;;  %v3251_v2 = vpop.f32.mrb[89].mxu1  ;;  %v3294_v16 = vpop.f32.mrb[93].mxu0 }
 0xfff   :  { %v3252_v47 = vadd.f32 %v3251_v2, %v5314_v19  ;;  %v3295_v61 = vadd.f32 %v3294_v16, %v5317_v20  ;;  %v3253_v17 = vpop.f32.mrb[90].mxu1  ;;  %v3296_v57 = vpop.f32.mrb[94].mxu0 }
0x1000   :  { %v3344_v60 = vmul.f32 0.125, %v3250_v45  ;;  %v3346_v41 = vmul.f32 0.125, %v3293_v36  ;;  %v3254_v7 = vadd.f32 %v3253_v17, %v5308_v15  ;;  %v3297_v22 = vadd.f32 %v3296_v57, %v8718_v3  ;;  %v3255_v30 = vpop.f32.mrb[91].mxu1  ;;  %v3298_v35 = vpop.f32.mrb[95].mxu0 }
0x1001   :  { %v3345_v6 = vmul.f32 0.125, %v3252_v47  ;;  %v3347_v37 = vmul.f32 0.125, %v3295_v61  ;;  %v3256_v10 = vadd.f32 %v3255_v30, %v5314_v19  ;;  %v3299_v33 = vadd.f32 %v3298_v35, %v5317_v20 }
0x1002   :  { %v3356_v34 = vadd.f32 %v3644_v24, %v3344_v60  ;;  %v3358_v50 = vadd.f32 %v3646_v14, %v3346_v41  ;;  %v3350_v8 = vmul.f32 0.125, %v3254_v7  ;;  %v3352_v39 = vmul.f32 0.125, %v3297_v22 }
0x1003   :  { %v3357_v15 = vadd.f32 %v3645_v63, %v3345_v6  ;;  %v8788_v3 = vclamps-f32 %v7477_v12, 1.0  ;;  %v3351_v21 = vmul.f32 0.125, %v3256_v10  ;;  %v3353_v46 = vmul.f32 0.125, %v3299_v33 }
0x1004   :  { %v3657_v25 = vclamps-f32 %v3356_v34, 1.0  ;;  %v3659_v19 = vclamps-f32 %v3358_v50, 1.0  ;;  %v8789_v20 = vclamps-f32 %v7489_v55, 1.0  ;;  %v3364_v24 = vadd.f32 %v8790_v43, %v3352_v39 }
0x1005   :  { %v3359_v1 = vadd.f32 %v8788_v3, %v3347_v37  ;;  %v3658_v54 = vclamps-f32 %v3357_v15, 1.0  ;;  %v3363_v31 = vadd.f32 %v8791_v0, %v3351_v21  ;;  %v3365_v63 = vadd.f32 %v8792_v27, %v3353_v46 }
0x1006   :  { %v3362_v9 = vadd.f32 %v8789_v20, %v3350_v8  ;;  %v3392_v12 = vadd.f32 1.0, %v3657_v25  ;;  %v3394_v44 = vadd.f32 1.0, %v3659_v19  ;;  %v3665_v18 = vclamps-f32 %v3364_v24, 1.0 }
0x1007   :  { %v3660_v14 = vclamps-f32 %v3359_v1, 1.0  ;;  %v3393_v49 = vadd.f32 1.0, %v3658_v54  ;;  %v3664_v32 = vclamps-f32 %v3363_v31, 1.0  ;;  %v3666_v55 = vclamps-f32 %v3365_v63, 1.0 }
0x1008   :  { %v3663_v62 = vclamps-f32 %v3362_v9, 1.0  ;;  %v3404_v53 = vmul.f32 0.5, %v3392_v12  ;;  %v3406_v58 = vmul.f32 0.5, %v3394_v44  ;;  %v3400_v48 = vadd.f32 1.0, %v3665_v18 }
0x1009   :  { %v3395_v11 = vadd.f32 1.0, %v3660_v14  ;;  %v3405_v52 = vmul.f32 0.5, %v3393_v49  ;;  %v3399_v29 = vadd.f32 1.0, %v3664_v32  ;;  %v3401_v56 = vadd.f32 1.0, %v3666_v55 }
0x100a   :  { %v3398_v51 = vadd.f32 1.0, %v3663_v62  ;;  %v3416_v40 = vmax.f32 %v3404_v53, 0.0  ;;  %v3418_v59 = vmax.f32 %v3406_v58, 0.0  ;;  %v3412_v45 = vmul.f32 0.5, %v3400_v48 }
0x100b   :  { %v3407_v13 = vmul.f32 0.5, %v3395_v11  ;;  %v3417_v36 = vmax.f32 %v3405_v52, 0.0  ;;  %v3411_v16 = vmul.f32 0.5, %v3399_v29  ;;  %v3413_v47 = vmul.f32 0.5, %v3401_v56 }
0x100c   :  { %v3410_v26 = vmul.f32 0.5, %v3398_v51  ;;  %v3428_v61 = vmin.f32 %v3416_v40, 1.0  ;;  %v3430_v17 = vmin.f32 %v3418_v59, 1.0  ;;  %v3424_v60 = vmax.f32 %v3412_v45, 0.0 }
0x100d   :  { %v3419_v2 = vmax.f32 %v3407_v13, 0.0  ;;  %v3429_v41 = vmin.f32 %v3417_v36, 1.0  ;;  %v3423_v22 = vmax.f32 %v3411_v16, 0.0  ;;  %v3425_v30 = vmax.f32 %v3413_v47, 0.0 }
0x100e   :  { %v3422_v57 = vmax.f32 %v3410_v26, 0.0  ;;  %3440 = vst [vmem:[#allocation5] sm:$0xff] %v3428_v61  ;;  %3442 = vst [vmem:[#allocation5 + $0x10] sm:$0xff] %v3430_v17  ;;  %v3436_v6 = vmin.f32 %v3424_v60, 1.0  ;;  %v8793_v25 = vclamps-f32 %v7562_v42, 1.0  ;;  %v8794_v9 = vclamps-f32 %v7558_v4, 1.0 }
0x100f   :  { %v3431_v7 = vmin.f32 %v3419_v2, 1.0  ;;  %3441 = vst [vmem:[#allocation5 + $0x8] sm:$0xff] %v3429_v41  ;;  %v3435_v37 = vmin.f32 %v3423_v22, 1.0  ;;  %v3437_v10 = vmin.f32 %v3425_v30, 1.0  ;;  %v8795_v14 = vclamps-f32 %v7566_v28, 1.0 }
0x1010   :  { %v3434_v35 = vmin.f32 %v3422_v57, 1.0  ;;  %3448 = vst [vmem:[#allocation5 + $0x40] sm:$0xff] %v3436_v6  ;;  %v8796_v27 = vclamps-f32 %v7570_v23, 1.0 }
0x1011   :  { %3443 = vst [vmem:[#allocation5 + $0x18] sm:$0xff] %v3431_v7  ;;  %3447 = vst [vmem:[#allocation5 + $0x38] sm:$0xff] %v3435_v37 }
0x1012   :  { %3446 = vst [vmem:[#allocation5 + $0x30] sm:$0xff] %v3434_v35  ;;  %3449 = vst [vmem:[#allocation5 + $0x48] sm:$0xff] %v3437_v10 }
0x101d   :  { %v3335_v33 = vpop.f32.mrb[92].mxu1 }
0x101e   :  { %v3336_v34 = vadd.f32 %v3335_v33, %v8749_v38  ;;  %v3337_v50 = vpop.f32.mrb[93].mxu1 }
0x101f   :  { %v3338_v8 = vadd.f32 %v3337_v50, %v8752_v5  ;;  %v3339_v39 = vpop.f32.mrb[94].mxu1 }
0x1020   :  { %v3348_v15 = vmul.f32 0.125, %v3336_v34  ;;  %v3340_v3 = vadd.f32 %v3339_v39, %v8749_v38  ;;  %v3341_v1 = vpop.f32.mrb[95].mxu1 }
0x1021   :  { %v3349_v21 = vmul.f32 0.125, %v3338_v8  ;;  %v3342_v46 = vadd.f32 %v3341_v1, %v8752_v5 }
0x1022   :  { %v3360_v19 = vadd.f32 %v8793_v25, %v3348_v15  ;;  %v3354_v20 = vmul.f32 0.125, %v3340_v3 }
0x1023   :  { %v3361_v43 = vadd.f32 %v8794_v9, %v3349_v21  ;;  %v3355_v24 = vmul.f32 0.125, %v3342_v46 }
0x1024   :  { %v3661_v54 = vclamps-f32 %v3360_v19, 1.0  ;;  %v3366_v0 = vadd.f32 %v8795_v14, %v3354_v20 }
0x1025   :  { %v3662_v31 = vclamps-f32 %v3361_v43, 1.0  ;;  %v3367_v38 = vadd.f32 %v8796_v27, %v3355_v24 }
0x1026   :  { %v3396_v63 = vadd.f32 1.0, %v3661_v54  ;;  %v3667_v12 = vclamps-f32 %v3366_v0, 1.0 }
0x1027   :  { %v3397_v44 = vadd.f32 1.0, %v3662_v31  ;;  %v3668_v5 = vclamps-f32 %v3367_v38, 1.0 }
0x1028   :  { %v3408_v62 = vmul.f32 0.5, %v3396_v63  ;;  %v3402_v42 = vadd.f32 1.0, %v3667_v12 }
0x1029   :  { %v3409_v18 = vmul.f32 0.5, %v3397_v44  ;;  %v3403_v49 = vadd.f32 1.0, %v3668_v5 }
0x102a   :  { %v3420_v11 = vmax.f32 %v3408_v62, 0.0  ;;  %v3414_v4 = vmul.f32 0.5, %v3402_v42 }
0x102b   :  { %v3421_v32 = vmax.f32 %v3409_v18, 0.0  ;;  %v3415_v55 = vmul.f32 0.5, %v3403_v49 }
0x102c   :  { %v3432_v53 = vmin.f32 %v3420_v11, 1.0  ;;  %v3426_v58 = vmax.f32 %v3414_v4, 0.0 }
0x102d   :  { %v3433_v28 = vmin.f32 %v3421_v32, 1.0  ;;  %v3427_v51 = vmax.f32 %v3415_v55, 0.0 }
0x102e   :  { %3444 = vst [vmem:[#allocation5 + $0x20] sm:$0xff] %v3432_v53  ;;  %v3438_v23 = vmin.f32 %v3426_v58, 1.0 }
0x102f   :  { %3445 = vst [vmem:[#allocation5 + $0x28] sm:$0xff] %v3433_v28  ;;  %v3439_v48 = vmin.f32 %v3427_v51, 1.0 }
0x1030   :  { %3450 = vst [vmem:[#allocation5 + $0x50] sm:$0xff] %v3438_v23 }
0x1031   :  { %3451 = vst [vmem:[#allocation5 + $0x58] sm:$0xff] %v3439_v48 }
0x1032   :  { %4579 = shalt.err (!%p4576_p12)
}
0x1033   :  { %s4580_s8 = scalar_lea.hbm %s7683_s5, 1536 }
0x1034   :  { %p4581_p13 = scmp.ne.s32.totalorder %s7683_s5, %s4580_s8  ;;  %p4584_p0 = scmp.lt.u32.totalorder %s4580_s8, %s7683_s5 }
0x1036   :  { %p4586_p1 = pnand %p4584_p0, %p4581_p13 }
0x1038   :  { %4589 = shalt.err (!%p4586_p1)
}
0x1039   :  { %3463 = dma.vmem_to_hbm [thread:$0]  %s3458_s27, 1536, %s7683_s5, [#allocation4], %s4595_s28, %s4595_s28, %s4596_s29  }
0x103a   :  { %4592 = dma.done.wait [#allocation4], 1536  }
0x103b   :  { %4593 = vsyncadd [#allocation4], 4294965760 }
0x103c   :  { %3467 = vsyncpa [#allocation3], 1 }
0x103d   :  { %3468 = vsyncpa [#allocation4], 1 }

</bundles_post_ra>
